<compile_context>
chip_gen: v5e
topology: v5e:2x2
jax: 0.10.0
libtpu: 0.0.40
codegen_flags: <defaults>
</compile_context>

<pallas_src>
import math
import jax
import jax.numpy as jnp
from jax.experimental import pallas as pl
from jax.experimental.pallas import tpu as pltpu


_LN_EPS = 1e-5
_NUM_VEC_ROWS = 11  # packed per-layer D-wide vectors (see init_transformer_decoder)


# ----------------------------- in-kernel helpers -----------------------------

def _layernorm(x, w, b, eps=_LN_EPS):
    mu = jnp.mean(x, axis=-1, keepdims=True)
    xc = x - mu
    var = jnp.mean(xc * xc, axis=-1, keepdims=True)
    return xc * jax.lax.rsqrt(var + eps) * w + b


def _gelu(x):
    # exact (erf-based) GELU in f32, matching torch.nn.GELU default
    return 0.5 * x * (1.0 + jax.lax.erf(x * (1.0 / math.sqrt(2.0))))


def _softmax(x):
    m = jnp.max(x, axis=-1, keepdims=True)
    e = jnp.exp(x - m)
    # reciprocal on the EUP slot instead of a VALU divide
    return e * pl.reciprocal(jnp.sum(e, axis=-1, keepdims=True), approx=True)


# q @ k^T without materializing the transpose: contract dim 1 of both operands.
_SCORE_DNUMS = (((1,), (1,)), ((), ()))


# --------------------- fused (all layers) decoder kernel ----------------------

def make_decoder_kernel(TB, Nq, Nv, D, H):
    hd = D // H
    scale = hd ** -0.5

    def _heads_to_ctx(q_all, k_all, v_all, n_q, n_kv, ctx_ref):
        """q_all: (TB*n_q, D) bf16; k_all/v_all: (TB*n_kv, D) bf16.

        Per (batch element, head): score + softmax + PV matmul; each head's context is
        written into ctx_ref (TB*n_q, D) f32 at its static lane offset so the output
        projection is a single D-wide MXU matmul afterwards.
        """
        for b in range(TB):
            q_rows = slice(b * n_q, (b + 1) * n_q)
            kv_rows = slice(b * n_kv, (b + 1) * n_kv)
            for h in range(H):
                lanes = slice(h * hd, (h + 1) * hd)
                s = jax.lax.dot_general(
                    q_all[q_rows, lanes], k_all[kv_rows, lanes], _SCORE_DNUMS,
                    preferred_element_type=jnp.float32) * scale
                p = _softmax(s).astype(jnp.bfloat16)
                ctx_ref[q_rows, lanes] = jnp.dot(
                    p, v_all[kv_rows, lanes], preferred_element_type=jnp.float32)

    def kernel(q_ref, v_ref, vec_ref, fc1b_ref,
               sa_qkv_w_ref, sa_proj_w_ref,
               ca_q_w_ref, ca_kv_w_ref, ca_proj_w_ref,
               fc1w_ref, fc2w_ref,
               o_ref, vhat_ref, ctx_ref):
        layer = pl.program_id(1)

        @pl.when(layer == 0)
        def _():
            # q carry: output block stays VMEM-resident across the innermost layer axis
            o_ref[...] = q_ref[...]
            # hoist the layer-invariant v LayerNorm statistics into scratch
            vflat = v_ref[...].reshape(TB * Nv, D)
            mu = jnp.mean(vflat, axis=-1, keepdims=True)
            vc = vflat - mu
            var = jnp.mean(vc * vc, axis=-1, keepdims=True)
            vhat_ref[...] = vc * jax.lax.rsqrt(var + _LN_EPS)

        # packed per-layer vectors: rows =
        #   0 ln1_w  1 ln1_b  2 nq_w  3 nq_b  4 nv_w  5 nv_b
        #   6 ln2_w  7 ln2_b  8 sa_proj_b  9 ca_proj_b  10 fc2_b
        vec = vec_ref[0]                                        # (11, D) f32
        ln1_w, ln1_b = vec[0:1], vec[1:2]
        nq_w, nq_b = vec[2:3], vec[3:4]
        nv_w, nv_b = vec[4:5], vec[5:6]
        ln2_w, ln2_b = vec[6:7], vec[7:8]
        sa_proj_b, ca_proj_b, fc2_b = vec[8:9], vec[9:10], vec[10:11]

        x = o_ref[...].reshape(TB * Nq, D)                      # (TB*Nq, D) f32 carry

        # ---- 1) global self-attention: x + Attn(norm1(x)) --------------------
        xn = _layernorm(x, ln1_w, ln1_b).astype(jnp.bfloat16)
        qkv = jnp.dot(xn, sa_qkv_w_ref[0],
                      preferred_element_type=jnp.float32).astype(jnp.bfloat16)  # (TB*Nq, 3D)
        _heads_to_ctx(qkv[:, 0:D], qkv[:, D:2 * D], qkv[:, 2 * D:3 * D],
                      Nq, Nq, ctx_ref)
        sa = jnp.dot(ctx_ref[...].astype(jnp.bfloat16), sa_proj_w_ref[0],
                     preferred_element_type=jnp.float32)
        x = x + sa + sa_proj_b

        # ---- 2) global cross-attention: x + CrossAttn(norm_q(x), norm_v(v)) --
        qn = _layernorm(x, nq_w, nq_b).astype(jnp.bfloat16)
        vn = (vhat_ref[...] * nv_w + nv_b).astype(jnp.bfloat16)   # hoisted v stats
        qm = jnp.dot(qn, ca_q_w_ref[0],
                     preferred_element_type=jnp.float32).astype(jnp.bfloat16)   # (TB*Nq, D)
        kv = jnp.dot(vn, ca_kv_w_ref[0],
                     preferred_element_type=jnp.float32).astype(jnp.bfloat16)   # (TB*Nv, 2D)
        _heads_to_ctx(qm, kv[:, 0:D], kv[:, D:2 * D], Nq, Nv, ctx_ref)
        ca = jnp.dot(ctx_ref[...].astype(jnp.bfloat16), ca_proj_w_ref[0],
                     preferred_element_type=jnp.float32)
        x = x + ca + ca_proj_b

        # ---- 3) MLP: x + fc2(GELU(fc1(norm2(x)))) -----------------------------
        xn2 = _layernorm(x, ln2_w, ln2_b).astype(jnp.bfloat16)
        hid = jnp.dot(xn2, fc1w_ref[0],
                      preferred_element_type=jnp.float32) + fc1b_ref[0]
        hid = _gelu(hid).astype(jnp.bfloat16)
        mo = jnp.dot(hid, fc2w_ref[0],
                     preferred_element_type=jnp.float32) + fc2_b
        x = x + mo

        o_ref[...] = x.reshape(TB, Nq, D)

    return kernel


# ------------------------------- host wrapper ---------------------------------

def _choose_block_batch(B, Nq, row_target=256):
    """Largest divisor TB of B with TB*Nq <= row_target (MXU rows), preferring
    configurations that keep >= 2 parallel batch blocks (megacore on v7x)."""
    divs = [d for d in range(1, B + 1) if B % d == 0 and d * Nq <= max(row_target, Nq)]
    if not divs:
        return 1
    two_plus = [d for d in divs if B // d >= 2]
    return max(two_plus) if two_plus else max(divs)


def _vmem_limit_bytes(TB, Nq, Nv, D, Dh):
    f32b, bf16b = 4, 2
    act = (2 * TB * Nq * D + TB * Nv * D) * f32b            # q + out + v blocks
    wts = (8 * D * D + 2 * D * Dh) * bf16b                  # per-layer matmul weights
    vecs = (_NUM_VEC_ROWS * D + Dh) * f32b                  # packed vectors + fc1_b
    scratch = (TB * Nv * D + TB * Nq * D) * f32b            # vhat + head-ctx scratch
    need = 2 * (act + wts + vecs) + scratch                 # double-buffered pipeline
    limit = int(need * 1.5) + 8 * 1024 * 1024               # compiler-internal headroom
    # clamp: stay safe on v7x (64 MiB physical VMEM), never below a useful floor
    return max(16 * 1024 * 1024, min(limit, 56 * 1024 * 1024))


def transformer_decoder_forward(q, v, q_pos, v_pos, params, num_heads,
                                block_batch=None):
    # TODO(synk): knn_point(self.k, q_pos, q_pos) / knn_point(self.k, v_pos, q_pos)
    # only feed the (unimplemented) deform/graph local branches -> skipped as dead work.
    del q_pos, v_pos
    B, Nq, D = q.shape
    _, Nv, _ = v.shape
    L = params['sa_qkv_w'].shape[0]
    Dh = params['fc1_w'].shape[2]
    assert D % num_heads == 0

    TB = block_batch if block_batch is not None else _choose_block_batch(B, Nq)
    assert B % TB == 0

    kern = make_decoder_kernel(TB, Nq, Nv, D, num_heads)

    def bmap(b, l):
        return (b, 0, 0)

    def lmap(b, l):
        return (l, 0, 0)

    in_specs = [
        pl.BlockSpec((TB, Nq, D), bmap),                 # q (carry source)
        pl.BlockSpec((TB, Nv, D), bmap),                 # v (memory tokens)
        pl.BlockSpec((1, _NUM_VEC_ROWS, D), lmap),       # packed per-layer vectors
        pl.BlockSpec((1, 1, Dh), lmap),                  # fc1 bias
        pl.BlockSpec((1, D, 3 * D), lmap),               # self-attn qkv weight
        pl.BlockSpec((1, D, D), lmap),                   # self-attn output proj
        pl.BlockSpec((1, D, D), lmap),                   # cross-attn q_map
        pl.BlockSpec((1, D, 2 * D), lmap),               # cross-attn k_map|v_map fused
        pl.BlockSpec((1, D, D), lmap),                   # cross-attn output proj
        pl.BlockSpec((1, D, Dh), lmap),                  # mlp fc1
        pl.BlockSpec((1, Dh, D), lmap),                  # mlp fc2
    ]

    return pl.pallas_call(
        kern,
        out_shape=jax.ShapeDtypeStruct((B, Nq, D), jnp.float32),
        grid=(B // TB, L),                               # layer LAST -> q carry valid
        in_specs=in_specs,
        out_specs=pl.BlockSpec((TB, Nq, D), bmap),
        scratch_shapes=[
            pltpu.VMEM((TB * Nv, D), jnp.float32),       # hoisted normalized v
            pltpu.VMEM((TB * Nq, D), jnp.float32),       # per-head context staging
        ],
        compiler_params=pltpu.CompilerParams(
            dimension_semantics=("parallel", "arbitrary"),
            vmem_limit_bytes=_vmem_limit_bytes(TB, Nq, Nv, D, Dh),
        ),
    )(q, v, params['vecs'], params['fc1_b'],
      params['sa_qkv_w'], params['sa_proj_w'],
      params['ca_q_w'], params['ca_kv_w'], params['ca_proj_w'],
      params['fc1_w'], params['fc2_w'])


# ----------------------------- parameter init --------------------------------

def init_transformer_decoder(key, embed_dim, depth, num_heads, mlp_ratio=4.0):
    D, L = embed_dim, depth
    Dh = int(D * mlp_ratio)

    def w(k, shape):
        # matmul weights stored/streamed as bf16 (halves weight DMA / VMEM)
        return (0.02 * jax.random.normal(k, shape, jnp.float32)).astype(jnp.bfloat16)

    ks = jax.random.split(key, 7)
    ones_v = jnp.ones((L, D), jnp.float32)
    zeros_v = jnp.zeros((L, D), jnp.float32)
    # packed per-layer vector rows (order must match the kernel):
    #   0 ln1_w  1 ln1_b  2 nq_w  3 nq_b  4 nv_w  5 nv_b
    #   6 ln2_w  7 ln2_b  8 sa_proj_b  9 ca_proj_b  10 fc2_b
    vecs = jnp.stack([ones_v, zeros_v, ones_v, zeros_v, ones_v, zeros_v,
                      ones_v, zeros_v, zeros_v, zeros_v, zeros_v], axis=1)

    # NOTE: weights are stored (in, out) and applied as x @ W; transpose torch
    # nn.Linear weights ((out, in)) when importing a checkpoint.  ca_kv_w is the
    # k_map | v_map pair fused along the output dim; proj weights are full (D, D).
    return dict(
        vecs=vecs,
        fc1_b=jnp.zeros((L, 1, Dh), jnp.float32),
        sa_qkv_w=w(ks[0], (L, D, 3 * D)),
        sa_proj_w=w(ks[1], (L, D, D)),
        ca_q_w=w(ks[2], (L, D, D)),
        ca_kv_w=w(ks[3], (L, D, 2 * D)),
        ca_proj_w=w(ks[4], (L, D, D)),
        fc1_w=w(ks[5], (L, D, Dh)),
        fc2_w=w(ks[6], (L, Dh, D)),
    )


# ------------------------------------ main ------------------------------------

if __name__ == "__main__":
    # small but lane-dense shapes: D multiple of 128, Nq/Nv multiples of 8
    B, Nq, Nv, D = 2, 16, 32, 128
    num_heads, depth, mlp_ratio = 4, 2, 4.0

    key = jax.random.PRNGKey(0)
    kq, kv, kqp, kvp, kw = jax.random.split(key, 5)
    q = jax.random.normal(kq, (B, Nq, D), jnp.float32)
    v = jax.random.normal(kv, (B, Nv, D), jnp.float32)
    q_pos = jax.random.normal(kqp, (B, Nq, 3), jnp.float32)
    v_pos = jax.random.normal(kvp, (B, Nv, 3), jnp.float32)

    params = init_transformer_decoder(kw, D, depth, num_heads, mlp_ratio)

    out = transformer_decoder_forward(q, v, q_pos, v_pos, params, num_heads)
    out = jax.block_until_ready(out)
    assert out.shape == (B, Nq, D)
    assert bool(jnp.all(jnp.isfinite(out)))
    print("KERNEL_OK")
</pallas_src>

<mosaic_0001>
module attributes {stable_mosaic.version = 11 : i64} {
  func.func @kernel(%arg0: i32, %arg1: i32, %arg2: memref<1x16x128xf32, #tpu.memory_space<vmem>>, %arg3: memref<1x32x128xf32, #tpu.memory_space<vmem>>, %arg4: memref<1x11x128xf32, #tpu.memory_space<vmem>>, %arg5: memref<1x1x512xf32, #tpu.memory_space<vmem>>, %arg6: memref<1x128x384xbf16, #tpu.memory_space<vmem>>, %arg7: memref<1x128x128xbf16, #tpu.memory_space<vmem>>, %arg8: memref<1x128x128xbf16, #tpu.memory_space<vmem>>, %arg9: memref<1x128x256xbf16, #tpu.memory_space<vmem>>, %arg10: memref<1x128x128xbf16, #tpu.memory_space<vmem>>, %arg11: memref<1x128x512xbf16, #tpu.memory_space<vmem>>, %arg12: memref<1x512x128xbf16, #tpu.memory_space<vmem>>, %arg13: memref<1x16x128xf32, #tpu.memory_space<vmem>>, %arg14: memref<32x128xf32, #tpu.memory_space<vmem>>, %arg15: memref<16x128xf32, #tpu.memory_space<vmem>>) attributes {dimension_semantics = [#tpu.dimension_semantics<parallel>, #tpu.dimension_semantics<arbitrary>], iteration_bounds = array<i64: 2, 2>, scalar_prefetch = 0 : i64, scratch_operands = 2 : i64, tpu.core_type = #tpu.core_type<tc>, window_params = [{transform_indices = @transform_0, window_bounds = array<i64: 1, 16, 128>}, {transform_indices = @transform_1, window_bounds = array<i64: 1, 32, 128>}, {transform_indices = @transform_2, window_bounds = array<i64: 1, 11, 128>}, {transform_indices = @transform_3, window_bounds = array<i64: 1, 1, 512>}, {transform_indices = @transform_4, window_bounds = array<i64: 1, 128, 384>}, {transform_indices = @transform_5, window_bounds = array<i64: 1, 128, 128>}, {transform_indices = @transform_6, window_bounds = array<i64: 1, 128, 128>}, {transform_indices = @transform_7, window_bounds = array<i64: 1, 128, 256>}, {transform_indices = @transform_8, window_bounds = array<i64: 1, 128, 128>}, {transform_indices = @transform_9, window_bounds = array<i64: 1, 128, 512>}, {transform_indices = @transform_10, window_bounds = array<i64: 1, 512, 128>}, {transform_indices = @transform_11, window_bounds = array<i64: 1, 16, 128>}]} {
    %c0_i32 = arith.constant 0 : i32
    %0 = arith.cmpi eq, %arg1, %c0_i32 : i32
    %1 = arith.extui %0 : i1 to i32
    %c0_i32_0 = arith.constant 0 : i32
    %2 = arith.cmpi ne, %1, %c0_i32_0 : i32
    scf.if %2 {
      %c0_116 = arith.constant 0 : index
      %c0_117 = arith.constant 0 : index
      %c0_118 = arith.constant 0 : index
      %296 = vector.load %arg2[%c0_116, %c0_117, %c0_118] : memref<1x16x128xf32, #tpu.memory_space<vmem>>, vector<1x16x128xf32>
      %c0_119 = arith.constant 0 : index
      %c0_120 = arith.constant 0 : index
      %c0_121 = arith.constant 0 : index
      %297 = vector.load %arg13[%c0_119, %c0_120, %c0_121] : memref<1x16x128xf32, #tpu.memory_space<vmem>>, vector<1x16x128xf32>
      tpu.vector_store %arg13[%c0_119, %c0_120, %c0_121], %296 {strides = array<i32>} : memref<1x16x128xf32, #tpu.memory_space<vmem>>, vector<1x16x128xf32>,
      %c0_122 = arith.constant 0 : index
      %c0_123 = arith.constant 0 : index
      %c0_124 = arith.constant 0 : index
      %298 = vector.load %arg3[%c0_122, %c0_123, %c0_124] : memref<1x32x128xf32, #tpu.memory_space<vmem>>, vector<1x32x128xf32>
      %299 = vector.shape_cast %298 : vector<1x32x128xf32> to vector<32x128xf32>
      %cst_125 = arith.constant dense<0.000000e+00> : vector<32xf32>
      %300 = vector.multi_reduction <add>, %299, %cst_125 [1] : vector<32x128xf32> to vector<32xf32>
      %301 = vector.shape_cast %300 : vector<32xf32> to vector<32x1xf32>
      %cst_126 = arith.constant 1.280000e+02 : f32
      %302 = vector.broadcast %cst_126 : f32 to vector<32x1xf32>
      %303 = arith.divf %301, %302 : vector<32x1xf32>
      %304 = vector.broadcast %303 : vector<32x1xf32> to vector<32x128xf32>
      %305 = arith.subf %299, %304 : vector<32x128xf32>
      %306 = arith.mulf %305, %305 : vector<32x128xf32>
      %cst_127 = arith.constant dense<0.000000e+00> : vector<32xf32>
      %307 = vector.multi_reduction <add>, %306, %cst_127 [1] : vector<32x128xf32> to vector<32xf32>
      %308 = vector.shape_cast %307 : vector<32xf32> to vector<32x1xf32>
      %cst_128 = arith.constant 1.280000e+02 : f32
      %309 = vector.broadcast %cst_128 : f32 to vector<32x1xf32>
      %310 = arith.divf %308, %309 : vector<32x1xf32>
      %cst_129 = arith.constant 9.99999974E-6 : f32
      %311 = vector.broadcast %cst_129 : f32 to vector<32x1xf32>
      %312 = arith.addf %310, %311 : vector<32x1xf32>
      %313 = math.rsqrt %312 : vector<32x1xf32>
      %314 = vector.broadcast %313 : vector<32x1xf32> to vector<32x128xf32>
      %315 = arith.mulf %305, %314 : vector<32x128xf32>
      %c0_130 = arith.constant 0 : index
      %c0_131 = arith.constant 0 : index
      %316 = vector.load %arg14[%c0_130, %c0_131] : memref<32x128xf32, #tpu.memory_space<vmem>>, vector<32x128xf32>
      tpu.vector_store %arg14[%c0_130, %c0_131], %315 {strides = array<i32>} : memref<32x128xf32, #tpu.memory_space<vmem>>, vector<32x128xf32>,
    } else {
    }
    %c0 = arith.constant 0 : index
    %c0_1 = arith.constant 0 : index
    %c0_2 = arith.constant 0 : index
    %3 = vector.load %arg4[%c0, %c0_1, %c0_2] : memref<1x11x128xf32, #tpu.memory_space<vmem>>, vector<1x11x128xf32>
    %4 = vector.shape_cast %3 : vector<1x11x128xf32> to vector<11x128xf32>
    %5 = vector.extract_strided_slice %4 {offsets = [0, 0], sizes = [1, 128], strides = [1, 1]} : vector<11x128xf32> to vector<1x128xf32>
    %6 = vector.extract_strided_slice %4 {offsets = [1, 0], sizes = [1, 128], strides = [1, 1]} : vector<11x128xf32> to vector<1x128xf32>
    %7 = vector.extract_strided_slice %4 {offsets = [2, 0], sizes = [1, 128], strides = [1, 1]} : vector<11x128xf32> to vector<1x128xf32>
    %8 = vector.extract_strided_slice %4 {offsets = [3, 0], sizes = [1, 128], strides = [1, 1]} : vector<11x128xf32> to vector<1x128xf32>
    %9 = vector.extract_strided_slice %4 {offsets = [4, 0], sizes = [1, 128], strides = [1, 1]} : vector<11x128xf32> to vector<1x128xf32>
    %10 = vector.extract_strided_slice %4 {offsets = [5, 0], sizes = [1, 128], strides = [1, 1]} : vector<11x128xf32> to vector<1x128xf32>
    %11 = vector.extract_strided_slice %4 {offsets = [6, 0], sizes = [1, 128], strides = [1, 1]} : vector<11x128xf32> to vector<1x128xf32>
    %12 = vector.extract_strided_slice %4 {offsets = [7, 0], sizes = [1, 128], strides = [1, 1]} : vector<11x128xf32> to vector<1x128xf32>
    %13 = vector.extract_strided_slice %4 {offsets = [8, 0], sizes = [1, 128], strides = [1, 1]} : vector<11x128xf32> to vector<1x128xf32>
    %14 = vector.extract_strided_slice %4 {offsets = [9, 0], sizes = [1, 128], strides = [1, 1]} : vector<11x128xf32> to vector<1x128xf32>
    %15 = vector.extract_strided_slice %4 {offsets = [10, 0], sizes = [1, 128], strides = [1, 1]} : vector<11x128xf32> to vector<1x128xf32>
    %c0_3 = arith.constant 0 : index
    %c0_4 = arith.constant 0 : index
    %c0_5 = arith.constant 0 : index
    %16 = vector.load %arg13[%c0_3, %c0_4, %c0_5] : memref<1x16x128xf32, #tpu.memory_space<vmem>>, vector<1x16x128xf32>
    %17 = vector.shape_cast %16 : vector<1x16x128xf32> to vector<16x128xf32>
    %cst = arith.constant dense<0.000000e+00> : vector<16xf32>
    %18 = vector.multi_reduction <add>, %17, %cst [1] : vector<16x128xf32> to vector<16xf32>
    %19 = vector.shape_cast %18 : vector<16xf32> to vector<16x1xf32>
    %cst_6 = arith.constant 1.280000e+02 : f32
    %20 = vector.broadcast %cst_6 : f32 to vector<16x1xf32>
    %21 = arith.divf %19, %20 : vector<16x1xf32>
    %22 = vector.broadcast %21 : vector<16x1xf32> to vector<16x128xf32>
    %23 = arith.subf %17, %22 : vector<16x128xf32>
    %24 = arith.mulf %23, %23 : vector<16x128xf32>
    %cst_7 = arith.constant dense<0.000000e+00> : vector<16xf32>
    %25 = vector.multi_reduction <add>, %24, %cst_7 [1] : vector<16x128xf32> to vector<16xf32>
    %26 = vector.shape_cast %25 : vector<16xf32> to vector<16x1xf32>
    %cst_8 = arith.constant 1.280000e+02 : f32
    %27 = vector.broadcast %cst_8 : f32 to vector<16x1xf32>
    %28 = arith.divf %26, %27 : vector<16x1xf32>
    %cst_9 = arith.constant 9.99999974E-6 : f32
    %29 = vector.broadcast %cst_9 : f32 to vector<16x1xf32>
    %30 = arith.addf %28, %29 : vector<16x1xf32>
    %31 = math.rsqrt %30 : vector<16x1xf32>
    %32 = vector.broadcast %31 : vector<16x1xf32> to vector<16x128xf32>
    %33 = arith.mulf %23, %32 : vector<16x128xf32>
    %34 = vector.broadcast %5 : vector<1x128xf32> to vector<16x128xf32>
    %35 = arith.mulf %33, %34 : vector<16x128xf32>
    %36 = vector.broadcast %6 : vector<1x128xf32> to vector<16x128xf32>
    %37 = arith.addf %35, %36 : vector<16x128xf32>
    %38 = arith.truncf %37 : vector<16x128xf32> to vector<16x128xbf16>
    %c0_10 = arith.constant 0 : index
    %c0_11 = arith.constant 0 : index
    %c0_12 = arith.constant 0 : index
    %39 = vector.load %arg6[%c0_10, %c0_11, %c0_12] : memref<1x128x384xbf16, #tpu.memory_space<vmem>>, vector<1x128x384xbf16>
    %40 = vector.shape_cast %39 : vector<1x128x384xbf16> to vector<128x384xbf16>
    %cst_13 = arith.constant dense<0.000000e+00> : vector<16x384xf32>
    %41 = tpu.matmul %38, %40, %cst_13 {dimension_numbers = #tpu.dot_dimension_numbers<[1], [0], [0], [1], [0, 0, 1, 1], [], []>} : vector<16x128xbf16>, vector<128x384xbf16>, vector<16x384xf32> -> vector<16x384xf32>
    %42 = arith.truncf %41 : vector<16x384xf32> to vector<16x384xbf16>
    %43 = vector.extract_strided_slice %42 {offsets = [0, 0], sizes = [16, 128], strides = [1, 1]} : vector<16x384xbf16> to vector<16x128xbf16>
    %44 = vector.extract_strided_slice %42 {offsets = [0, 128], sizes = [16, 128], strides = [1, 1]} : vector<16x384xbf16> to vector<16x128xbf16>
    %45 = vector.extract_strided_slice %42 {offsets = [0, 256], sizes = [16, 128], strides = [1, 1]} : vector<16x384xbf16> to vector<16x128xbf16>
    %46 = vector.extract_strided_slice %43 {offsets = [0, 0], sizes = [16, 32], strides = [1, 1]} : vector<16x128xbf16> to vector<16x32xbf16>
    %47 = vector.extract_strided_slice %44 {offsets = [0, 0], sizes = [16, 32], strides = [1, 1]} : vector<16x128xbf16> to vector<16x32xbf16>
    %cst_14 = arith.constant dense<0.000000e+00> : vector<16x16xf32>
    %48 = tpu.matmul %46, %47, %cst_14 {dimension_numbers = #tpu.dot_dimension_numbers<[1], [1], [0], [0], [0, 0, 1, 0], [], []>} : vector<16x32xbf16>, vector<16x32xbf16>, vector<16x16xf32> -> vector<16x16xf32>
    %cst_15 = arith.constant 0.176776692 : f32
    %49 = vector.broadcast %cst_15 : f32 to vector<16x16xf32>
    %50 = arith.mulf %48, %49 : vector<16x16xf32>
    %cst_16 = arith.constant dense<0xFF800000> : vector<16xf32>
    %51 = vector.multi_reduction <maximumf>, %50, %cst_16 [1] : vector<16x16xf32> to vector<16xf32>
    %52 = vector.shape_cast %51 : vector<16xf32> to vector<16x1xf32>
    %53 = vector.broadcast %52 : vector<16x1xf32> to vector<16x16xf32>
    %54 = arith.subf %50, %53 : vector<16x16xf32>
    %55 = math.exp %54 : vector<16x16xf32>
    %cst_17 = arith.constant dense<0.000000e+00> : vector<16xf32>
    %56 = vector.multi_reduction <add>, %55, %cst_17 [1] : vector<16x16xf32> to vector<16xf32>
    %57 = vector.shape_cast %56 : vector<16xf32> to vector<16x1xf32>
    %58 = tpu.reciprocal %57 {approx = true} : vector<16x1xf32> -> vector<16x1xf32>
    %59 = vector.broadcast %58 : vector<16x1xf32> to vector<16x16xf32>
    %60 = arith.mulf %55, %59 : vector<16x16xf32>
    %61 = arith.truncf %60 : vector<16x16xf32> to vector<16x16xbf16>
    %62 = vector.extract_strided_slice %45 {offsets = [0, 0], sizes = [16, 32], strides = [1, 1]} : vector<16x128xbf16> to vector<16x32xbf16>
    %cst_18 = arith.constant dense<0.000000e+00> : vector<16x32xf32>
    %63 = tpu.matmul %61, %62, %cst_18 {dimension_numbers = #tpu.dot_dimension_numbers<[1], [0], [0], [1], [0, 0, 1, 1], [], []>} : vector<16x16xbf16>, vector<16x32xbf16>, vector<16x32xf32> -> vector<16x32xf32>
    %c0_19 = arith.constant 0 : index
    %c0_20 = arith.constant 0 : index
    %64 = vector.load %arg15[%c0_19, %c0_20] : memref<16x128xf32, #tpu.memory_space<vmem>>, vector<16x32xf32>
    tpu.vector_store %arg15[%c0_19, %c0_20], %63 {strides = array<i32>} : memref<16x128xf32, #tpu.memory_space<vmem>>, vector<16x32xf32>,
    %65 = vector.extract_strided_slice %43 {offsets = [0, 32], sizes = [16, 32], strides = [1, 1]} : vector<16x128xbf16> to vector<16x32xbf16>
    %66 = vector.extract_strided_slice %44 {offsets = [0, 32], sizes = [16, 32], strides = [1, 1]} : vector<16x128xbf16> to vector<16x32xbf16>
    %cst_21 = arith.constant dense<0.000000e+00> : vector<16x16xf32>
    %67 = tpu.matmul %65, %66, %cst_21 {dimension_numbers = #tpu.dot_dimension_numbers<[1], [1], [0], [0], [0, 0, 1, 0], [], []>} : vector<16x32xbf16>, vector<16x32xbf16>, vector<16x16xf32> -> vector<16x16xf32>
    %cst_22 = arith.constant 0.176776692 : f32
    %68 = vector.broadcast %cst_22 : f32 to vector<16x16xf32>
    %69 = arith.mulf %67, %68 : vector<16x16xf32>
    %cst_23 = arith.constant dense<0xFF800000> : vector<16xf32>
    %70 = vector.multi_reduction <maximumf>, %69, %cst_23 [1] : vector<16x16xf32> to vector<16xf32>
    %71 = vector.shape_cast %70 : vector<16xf32> to vector<16x1xf32>
    %72 = vector.broadcast %71 : vector<16x1xf32> to vector<16x16xf32>
    %73 = arith.subf %69, %72 : vector<16x16xf32>
    %74 = math.exp %73 : vector<16x16xf32>
    %cst_24 = arith.constant dense<0.000000e+00> : vector<16xf32>
    %75 = vector.multi_reduction <add>, %74, %cst_24 [1] : vector<16x16xf32> to vector<16xf32>
    %76 = vector.shape_cast %75 : vector<16xf32> to vector<16x1xf32>
    %77 = tpu.reciprocal %76 {approx = true} : vector<16x1xf32> -> vector<16x1xf32>
    %78 = vector.broadcast %77 : vector<16x1xf32> to vector<16x16xf32>
    %79 = arith.mulf %74, %78 : vector<16x16xf32>
    %80 = arith.truncf %79 : vector<16x16xf32> to vector<16x16xbf16>
    %81 = vector.extract_strided_slice %45 {offsets = [0, 32], sizes = [16, 32], strides = [1, 1]} : vector<16x128xbf16> to vector<16x32xbf16>
    %cst_25 = arith.constant dense<0.000000e+00> : vector<16x32xf32>
    %82 = tpu.matmul %80, %81, %cst_25 {dimension_numbers = #tpu.dot_dimension_numbers<[1], [0], [0], [1], [0, 0, 1, 1], [], []>} : vector<16x16xbf16>, vector<16x32xbf16>, vector<16x32xf32> -> vector<16x32xf32>
    %c0_26 = arith.constant 0 : index
    %c32 = arith.constant 32 : index
    %83 = vector.load %arg15[%c0_26, %c32] : memref<16x128xf32, #tpu.memory_space<vmem>>, vector<16x32xf32>
    tpu.vector_store %arg15[%c0_26, %c32], %82 {strides = array<i32>} : memref<16x128xf32, #tpu.memory_space<vmem>>, vector<16x32xf32>,
    %84 = vector.extract_strided_slice %43 {offsets = [0, 64], sizes = [16, 32], strides = [1, 1]} : vector<16x128xbf16> to vector<16x32xbf16>
    %85 = vector.extract_strided_slice %44 {offsets = [0, 64], sizes = [16, 32], strides = [1, 1]} : vector<16x128xbf16> to vector<16x32xbf16>
    %cst_27 = arith.constant dense<0.000000e+00> : vector<16x16xf32>
    %86 = tpu.matmul %84, %85, %cst_27 {dimension_numbers = #tpu.dot_dimension_numbers<[1], [1], [0], [0], [0, 0, 1, 0], [], []>} : vector<16x32xbf16>, vector<16x32xbf16>, vector<16x16xf32> -> vector<16x16xf32>
    %cst_28 = arith.constant 0.176776692 : f32
    %87 = vector.broadcast %cst_28 : f32 to vector<16x16xf32>
    %88 = arith.mulf %86, %87 : vector<16x16xf32>
    %cst_29 = arith.constant dense<0xFF800000> : vector<16xf32>
    %89 = vector.multi_reduction <maximumf>, %88, %cst_29 [1] : vector<16x16xf32> to vector<16xf32>
    %90 = vector.shape_cast %89 : vector<16xf32> to vector<16x1xf32>
    %91 = vector.broadcast %90 : vector<16x1xf32> to vector<16x16xf32>
    %92 = arith.subf %88, %91 : vector<16x16xf32>
    %93 = math.exp %92 : vector<16x16xf32>
    %cst_30 = arith.constant dense<0.000000e+00> : vector<16xf32>
    %94 = vector.multi_reduction <add>, %93, %cst_30 [1] : vector<16x16xf32> to vector<16xf32>
    %95 = vector.shape_cast %94 : vector<16xf32> to vector<16x1xf32>
    %96 = tpu.reciprocal %95 {approx = true} : vector<16x1xf32> -> vector<16x1xf32>
    %97 = vector.broadcast %96 : vector<16x1xf32> to vector<16x16xf32>
    %98 = arith.mulf %93, %97 : vector<16x16xf32>
    %99 = arith.truncf %98 : vector<16x16xf32> to vector<16x16xbf16>
    %100 = vector.extract_strided_slice %45 {offsets = [0, 64], sizes = [16, 32], strides = [1, 1]} : vector<16x128xbf16> to vector<16x32xbf16>
    %cst_31 = arith.constant dense<0.000000e+00> : vector<16x32xf32>
    %101 = tpu.matmul %99, %100, %cst_31 {dimension_numbers = #tpu.dot_dimension_numbers<[1], [0], [0], [1], [0, 0, 1, 1], [], []>} : vector<16x16xbf16>, vector<16x32xbf16>, vector<16x32xf32> -> vector<16x32xf32>
    %c0_32 = arith.constant 0 : index
    %c64 = arith.constant 64 : index
    %102 = vector.load %arg15[%c0_32, %c64] : memref<16x128xf32, #tpu.memory_space<vmem>>, vector<16x32xf32>
    tpu.vector_store %arg15[%c0_32, %c64], %101 {strides = array<i32>} : memref<16x128xf32, #tpu.memory_space<vmem>>, vector<16x32xf32>,
    %103 = vector.extract_strided_slice %43 {offsets = [0, 96], sizes = [16, 32], strides = [1, 1]} : vector<16x128xbf16> to vector<16x32xbf16>
    %104 = vector.extract_strided_slice %44 {offsets = [0, 96], sizes = [16, 32], strides = [1, 1]} : vector<16x128xbf16> to vector<16x32xbf16>
    %cst_33 = arith.constant dense<0.000000e+00> : vector<16x16xf32>
    %105 = tpu.matmul %103, %104, %cst_33 {dimension_numbers = #tpu.dot_dimension_numbers<[1], [1], [0], [0], [0, 0, 1, 0], [], []>} : vector<16x32xbf16>, vector<16x32xbf16>, vector<16x16xf32> -> vector<16x16xf32>
    %cst_34 = arith.constant 0.176776692 : f32
    %106 = vector.broadcast %cst_34 : f32 to vector<16x16xf32>
    %107 = arith.mulf %105, %106 : vector<16x16xf32>
    %cst_35 = arith.constant dense<0xFF800000> : vector<16xf32>
    %108 = vector.multi_reduction <maximumf>, %107, %cst_35 [1] : vector<16x16xf32> to vector<16xf32>
    %109 = vector.shape_cast %108 : vector<16xf32> to vector<16x1xf32>
    %110 = vector.broadcast %109 : vector<16x1xf32> to vector<16x16xf32>
    %111 = arith.subf %107, %110 : vector<16x16xf32>
    %112 = math.exp %111 : vector<16x16xf32>
    %cst_36 = arith.constant dense<0.000000e+00> : vector<16xf32>
    %113 = vector.multi_reduction <add>, %112, %cst_36 [1] : vector<16x16xf32> to vector<16xf32>
    %114 = vector.shape_cast %113 : vector<16xf32> to vector<16x1xf32>
    %115 = tpu.reciprocal %114 {approx = true} : vector<16x1xf32> -> vector<16x1xf32>
    %116 = vector.broadcast %115 : vector<16x1xf32> to vector<16x16xf32>
    %117 = arith.mulf %112, %116 : vector<16x16xf32>
    %118 = arith.truncf %117 : vector<16x16xf32> to vector<16x16xbf16>
    %119 = vector.extract_strided_slice %45 {offsets = [0, 96], sizes = [16, 32], strides = [1, 1]} : vector<16x128xbf16> to vector<16x32xbf16>
    %cst_37 = arith.constant dense<0.000000e+00> : vector<16x32xf32>
    %120 = tpu.matmul %118, %119, %cst_37 {dimension_numbers = #tpu.dot_dimension_numbers<[1], [0], [0], [1], [0, 0, 1, 1], [], []>} : vector<16x16xbf16>, vector<16x32xbf16>, vector<16x32xf32> -> vector<16x32xf32>
    %c0_38 = arith.constant 0 : index
    %c96 = arith.constant 96 : index
    %121 = vector.load %arg15[%c0_38, %c96] : memref<16x128xf32, #tpu.memory_space<vmem>>, vector<16x32xf32>
    tpu.vector_store %arg15[%c0_38, %c96], %120 {strides = array<i32>} : memref<16x128xf32, #tpu.memory_space<vmem>>, vector<16x32xf32>,
    %c0_39 = arith.constant 0 : index
    %c0_40 = arith.constant 0 : index
    %122 = vector.load %arg15[%c0_39, %c0_40] : memref<16x128xf32, #tpu.memory_space<vmem>>, vector<16x128xf32>
    %123 = arith.truncf %122 : vector<16x128xf32> to vector<16x128xbf16>
    %c0_41 = arith.constant 0 : index
    %c0_42 = arith.constant 0 : index
    %c0_43 = arith.constant 0 : index
    %124 = vector.load %arg7[%c0_41, %c0_42, %c0_43] : memref<1x128x128xbf16, #tpu.memory_space<vmem>>, vector<1x128x128xbf16>
    %125 = vector.shape_cast %124 : vector<1x128x128xbf16> to vector<128x128xbf16>
    %cst_44 = arith.constant dense<0.000000e+00> : vector<16x128xf32>
    %126 = tpu.matmul %123, %125, %cst_44 {dimension_numbers = #tpu.dot_dimension_numbers<[1], [0], [0], [1], [0, 0, 1, 1], [], []>} : vector<16x128xbf16>, vector<128x128xbf16>, vector<16x128xf32> -> vector<16x128xf32>
    %127 = arith.addf %17, %126 : vector<16x128xf32>
    %128 = vector.broadcast %13 : vector<1x128xf32> to vector<16x128xf32>
    %129 = arith.addf %127, %128 : vector<16x128xf32>
    %cst_45 = arith.constant dense<0.000000e+00> : vector<16xf32>
    %130 = vector.multi_reduction <add>, %129, %cst_45 [1] : vector<16x128xf32> to vector<16xf32>
    %131 = vector.shape_cast %130 : vector<16xf32> to vector<16x1xf32>
    %cst_46 = arith.constant 1.280000e+02 : f32
    %132 = vector.broadcast %cst_46 : f32 to vector<16x1xf32>
    %133 = arith.divf %131, %132 : vector<16x1xf32>
    %134 = vector.broadcast %133 : vector<16x1xf32> to vector<16x128xf32>
    %135 = arith.subf %129, %134 : vector<16x128xf32>
    %136 = arith.mulf %135, %135 : vector<16x128xf32>
    %cst_47 = arith.constant dense<0.000000e+00> : vector<16xf32>
    %137 = vector.multi_reduction <add>, %136, %cst_47 [1] : vector<16x128xf32> to vector<16xf32>
    %138 = vector.shape_cast %137 : vector<16xf32> to vector<16x1xf32>
    %cst_48 = arith.constant 1.280000e+02 : f32
    %139 = vector.broadcast %cst_48 : f32 to vector<16x1xf32>
    %140 = arith.divf %138, %139 : vector<16x1xf32>
    %cst_49 = arith.constant 9.99999974E-6 : f32
    %141 = vector.broadcast %cst_49 : f32 to vector<16x1xf32>
    %142 = arith.addf %140, %141 : vector<16x1xf32>
    %143 = math.rsqrt %142 : vector<16x1xf32>
    %144 = vector.broadcast %143 : vector<16x1xf32> to vector<16x128xf32>
    %145 = arith.mulf %135, %144 : vector<16x128xf32>
    %146 = vector.broadcast %7 : vector<1x128xf32> to vector<16x128xf32>
    %147 = arith.mulf %145, %146 : vector<16x128xf32>
    %148 = vector.broadcast %8 : vector<1x128xf32> to vector<16x128xf32>
    %149 = arith.addf %147, %148 : vector<16x128xf32>
    %150 = arith.truncf %149 : vector<16x128xf32> to vector<16x128xbf16>
    %c0_50 = arith.constant 0 : index
    %c0_51 = arith.constant 0 : index
    %151 = vector.load %arg14[%c0_50, %c0_51] : memref<32x128xf32, #tpu.memory_space<vmem>>, vector<32x128xf32>
    %152 = vector.broadcast %9 : vector<1x128xf32> to vector<32x128xf32>
    %153 = arith.mulf %151, %152 : vector<32x128xf32>
    %154 = vector.broadcast %10 : vector<1x128xf32> to vector<32x128xf32>
    %155 = arith.addf %153, %154 : vector<32x128xf32>
    %156 = arith.truncf %155 : vector<32x128xf32> to vector<32x128xbf16>
    %c0_52 = arith.constant 0 : index
    %c0_53 = arith.constant 0 : index
    %c0_54 = arith.constant 0 : index
    %157 = vector.load %arg8[%c0_52, %c0_53, %c0_54] : memref<1x128x128xbf16, #tpu.memory_space<vmem>>, vector<1x128x128xbf16>
    %158 = vector.shape_cast %157 : vector<1x128x128xbf16> to vector<128x128xbf16>
    %cst_55 = arith.constant dense<0.000000e+00> : vector<16x128xf32>
    %159 = tpu.matmul %150, %158, %cst_55 {dimension_numbers = #tpu.dot_dimension_numbers<[1], [0], [0], [1], [0, 0, 1, 1], [], []>} : vector<16x128xbf16>, vector<128x128xbf16>, vector<16x128xf32> -> vector<16x128xf32>
    %160 = arith.truncf %159 : vector<16x128xf32> to vector<16x128xbf16>
    %c0_56 = arith.constant 0 : index
    %c0_57 = arith.constant 0 : index
    %c0_58 = arith.constant 0 : index
    %161 = vector.load %arg9[%c0_56, %c0_57, %c0_58] : memref<1x128x256xbf16, #tpu.memory_space<vmem>>, vector<1x128x256xbf16>
    %162 = vector.shape_cast %161 : vector<1x128x256xbf16> to vector<128x256xbf16>
    %cst_59 = arith.constant dense<0.000000e+00> : vector<32x256xf32>
    %163 = tpu.matmul %156, %162, %cst_59 {dimension_numbers = #tpu.dot_dimension_numbers<[1], [0], [0], [1], [0, 0, 1, 1], [], []>} : vector<32x128xbf16>, vector<128x256xbf16>, vector<32x256xf32> -> vector<32x256xf32>
    %164 = arith.truncf %163 : vector<32x256xf32> to vector<32x256xbf16>
    %165 = vector.extract_strided_slice %164 {offsets = [0, 0], sizes = [32, 128], strides = [1, 1]} : vector<32x256xbf16> to vector<32x128xbf16>
    %166 = vector.extract_strided_slice %164 {offsets = [0, 128], sizes = [32, 128], strides = [1, 1]} : vector<32x256xbf16> to vector<32x128xbf16>
    %167 = vector.extract_strided_slice %160 {offsets = [0, 0], sizes = [16, 32], strides = [1, 1]} : vector<16x128xbf16> to vector<16x32xbf16>
    %168 = vector.extract_strided_slice %165 {offsets = [0, 0], sizes = [32, 32], strides = [1, 1]} : vector<32x128xbf16> to vector<32x32xbf16>
    %cst_60 = arith.constant dense<0.000000e+00> : vector<16x32xf32>
    %169 = tpu.matmul %167, %168, %cst_60 {dimension_numbers = #tpu.dot_dimension_numbers<[1], [1], [0], [0], [0, 0, 1, 0], [], []>} : vector<16x32xbf16>, vector<32x32xbf16>, vector<16x32xf32> -> vector<16x32xf32>
    %cst_61 = arith.constant 0.176776692 : f32
    %170 = vector.broadcast %cst_61 : f32 to vector<16x32xf32>
    %171 = arith.mulf %169, %170 : vector<16x32xf32>
    %cst_62 = arith.constant dense<0xFF800000> : vector<16xf32>
    %172 = vector.multi_reduction <maximumf>, %171, %cst_62 [1] : vector<16x32xf32> to vector<16xf32>
    %173 = vector.shape_cast %172 : vector<16xf32> to vector<16x1xf32>
    %174 = vector.broadcast %173 : vector<16x1xf32> to vector<16x32xf32>
    %175 = arith.subf %171, %174 : vector<16x32xf32>
    %176 = math.exp %175 : vector<16x32xf32>
    %cst_63 = arith.constant dense<0.000000e+00> : vector<16xf32>
    %177 = vector.multi_reduction <add>, %176, %cst_63 [1] : vector<16x32xf32> to vector<16xf32>
    %178 = vector.shape_cast %177 : vector<16xf32> to vector<16x1xf32>
    %179 = tpu.reciprocal %178 {approx = true} : vector<16x1xf32> -> vector<16x1xf32>
    %180 = vector.broadcast %179 : vector<16x1xf32> to vector<16x32xf32>
    %181 = arith.mulf %176, %180 : vector<16x32xf32>
    %182 = arith.truncf %181 : vector<16x32xf32> to vector<16x32xbf16>
    %183 = vector.extract_strided_slice %166 {offsets = [0, 0], sizes = [32, 32], strides = [1, 1]} : vector<32x128xbf16> to vector<32x32xbf16>
    %cst_64 = arith.constant dense<0.000000e+00> : vector<16x32xf32>
    %184 = tpu.matmul %182, %183, %cst_64 {dimension_numbers = #tpu.dot_dimension_numbers<[1], [0], [0], [1], [0, 0, 1, 1], [], []>} : vector<16x32xbf16>, vector<32x32xbf16>, vector<16x32xf32> -> vector<16x32xf32>
    %c0_65 = arith.constant 0 : index
    %c0_66 = arith.constant 0 : index
    %185 = vector.load %arg15[%c0_65, %c0_66] : memref<16x128xf32, #tpu.memory_space<vmem>>, vector<16x32xf32>
    tpu.vector_store %arg15[%c0_65, %c0_66], %184 {strides = array<i32>} : memref<16x128xf32, #tpu.memory_space<vmem>>, vector<16x32xf32>,
    %186 = vector.extract_strided_slice %160 {offsets = [0, 32], sizes = [16, 32], strides = [1, 1]} : vector<16x128xbf16> to vector<16x32xbf16>
    %187 = vector.extract_strided_slice %165 {offsets = [0, 32], sizes = [32, 32], strides = [1, 1]} : vector<32x128xbf16> to vector<32x32xbf16>
    %cst_67 = arith.constant dense<0.000000e+00> : vector<16x32xf32>
    %188 = tpu.matmul %186, %187, %cst_67 {dimension_numbers = #tpu.dot_dimension_numbers<[1], [1], [0], [0], [0, 0, 1, 0], [], []>} : vector<16x32xbf16>, vector<32x32xbf16>, vector<16x32xf32> -> vector<16x32xf32>
    %cst_68 = arith.constant 0.176776692 : f32
    %189 = vector.broadcast %cst_68 : f32 to vector<16x32xf32>
    %190 = arith.mulf %188, %189 : vector<16x32xf32>
    %cst_69 = arith.constant dense<0xFF800000> : vector<16xf32>
    %191 = vector.multi_reduction <maximumf>, %190, %cst_69 [1] : vector<16x32xf32> to vector<16xf32>
    %192 = vector.shape_cast %191 : vector<16xf32> to vector<16x1xf32>
    %193 = vector.broadcast %192 : vector<16x1xf32> to vector<16x32xf32>
    %194 = arith.subf %190, %193 : vector<16x32xf32>
    %195 = math.exp %194 : vector<16x32xf32>
    %cst_70 = arith.constant dense<0.000000e+00> : vector<16xf32>
    %196 = vector.multi_reduction <add>, %195, %cst_70 [1] : vector<16x32xf32> to vector<16xf32>
    %197 = vector.shape_cast %196 : vector<16xf32> to vector<16x1xf32>
    %198 = tpu.reciprocal %197 {approx = true} : vector<16x1xf32> -> vector<16x1xf32>
    %199 = vector.broadcast %198 : vector<16x1xf32> to vector<16x32xf32>
    %200 = arith.mulf %195, %199 : vector<16x32xf32>
    %201 = arith.truncf %200 : vector<16x32xf32> to vector<16x32xbf16>
    %202 = vector.extract_strided_slice %166 {offsets = [0, 32], sizes = [32, 32], strides = [1, 1]} : vector<32x128xbf16> to vector<32x32xbf16>
    %cst_71 = arith.constant dense<0.000000e+00> : vector<16x32xf32>
    %203 = tpu.matmul %201, %202, %cst_71 {dimension_numbers = #tpu.dot_dimension_numbers<[1], [0], [0], [1], [0, 0, 1, 1], [], []>} : vector<16x32xbf16>, vector<32x32xbf16>, vector<16x32xf32> -> vector<16x32xf32>
    %c0_72 = arith.constant 0 : index
    %c32_73 = arith.constant 32 : index
    %204 = vector.load %arg15[%c0_72, %c32_73] : memref<16x128xf32, #tpu.memory_space<vmem>>, vector<16x32xf32>
    tpu.vector_store %arg15[%c0_72, %c32_73], %203 {strides = array<i32>} : memref<16x128xf32, #tpu.memory_space<vmem>>, vector<16x32xf32>,
    %205 = vector.extract_strided_slice %160 {offsets = [0, 64], sizes = [16, 32], strides = [1, 1]} : vector<16x128xbf16> to vector<16x32xbf16>
    %206 = vector.extract_strided_slice %165 {offsets = [0, 64], sizes = [32, 32], strides = [1, 1]} : vector<32x128xbf16> to vector<32x32xbf16>
    %cst_74 = arith.constant dense<0.000000e+00> : vector<16x32xf32>
    %207 = tpu.matmul %205, %206, %cst_74 {dimension_numbers = #tpu.dot_dimension_numbers<[1], [1], [0], [0], [0, 0, 1, 0], [], []>} : vector<16x32xbf16>, vector<32x32xbf16>, vector<16x32xf32> -> vector<16x32xf32>
    %cst_75 = arith.constant 0.176776692 : f32
    %208 = vector.broadcast %cst_75 : f32 to vector<16x32xf32>
    %209 = arith.mulf %207, %208 : vector<16x32xf32>
    %cst_76 = arith.constant dense<0xFF800000> : vector<16xf32>
    %210 = vector.multi_reduction <maximumf>, %209, %cst_76 [1] : vector<16x32xf32> to vector<16xf32>
    %211 = vector.shape_cast %210 : vector<16xf32> to vector<16x1xf32>
    %212 = vector.broadcast %211 : vector<16x1xf32> to vector<16x32xf32>
    %213 = arith.subf %209, %212 : vector<16x32xf32>
    %214 = math.exp %213 : vector<16x32xf32>
    %cst_77 = arith.constant dense<0.000000e+00> : vector<16xf32>
    %215 = vector.multi_reduction <add>, %214, %cst_77 [1] : vector<16x32xf32> to vector<16xf32>
    %216 = vector.shape_cast %215 : vector<16xf32> to vector<16x1xf32>
    %217 = tpu.reciprocal %216 {approx = true} : vector<16x1xf32> -> vector<16x1xf32>
    %218 = vector.broadcast %217 : vector<16x1xf32> to vector<16x32xf32>
    %219 = arith.mulf %214, %218 : vector<16x32xf32>
    %220 = arith.truncf %219 : vector<16x32xf32> to vector<16x32xbf16>
    %221 = vector.extract_strided_slice %166 {offsets = [0, 64], sizes = [32, 32], strides = [1, 1]} : vector<32x128xbf16> to vector<32x32xbf16>
    %cst_78 = arith.constant dense<0.000000e+00> : vector<16x32xf32>
    %222 = tpu.matmul %220, %221, %cst_78 {dimension_numbers = #tpu.dot_dimension_numbers<[1], [0], [0], [1], [0, 0, 1, 1], [], []>} : vector<16x32xbf16>, vector<32x32xbf16>, vector<16x32xf32> -> vector<16x32xf32>
    %c0_79 = arith.constant 0 : index
    %c64_80 = arith.constant 64 : index
    %223 = vector.load %arg15[%c0_79, %c64_80] : memref<16x128xf32, #tpu.memory_space<vmem>>, vector<16x32xf32>
    tpu.vector_store %arg15[%c0_79, %c64_80], %222 {strides = array<i32>} : memref<16x128xf32, #tpu.memory_space<vmem>>, vector<16x32xf32>,
    %224 = vector.extract_strided_slice %160 {offsets = [0, 96], sizes = [16, 32], strides = [1, 1]} : vector<16x128xbf16> to vector<16x32xbf16>
    %225 = vector.extract_strided_slice %165 {offsets = [0, 96], sizes = [32, 32], strides = [1, 1]} : vector<32x128xbf16> to vector<32x32xbf16>
    %cst_81 = arith.constant dense<0.000000e+00> : vector<16x32xf32>
    %226 = tpu.matmul %224, %225, %cst_81 {dimension_numbers = #tpu.dot_dimension_numbers<[1], [1], [0], [0], [0, 0, 1, 0], [], []>} : vector<16x32xbf16>, vector<32x32xbf16>, vector<16x32xf32> -> vector<16x32xf32>
    %cst_82 = arith.constant 0.176776692 : f32
    %227 = vector.broadcast %cst_82 : f32 to vector<16x32xf32>
    %228 = arith.mulf %226, %227 : vector<16x32xf32>
    %cst_83 = arith.constant dense<0xFF800000> : vector<16xf32>
    %229 = vector.multi_reduction <maximumf>, %228, %cst_83 [1] : vector<16x32xf32> to vector<16xf32>
    %230 = vector.shape_cast %229 : vector<16xf32> to vector<16x1xf32>
    %231 = vector.broadcast %230 : vector<16x1xf32> to vector<16x32xf32>
    %232 = arith.subf %228, %231 : vector<16x32xf32>
    %233 = math.exp %232 : vector<16x32xf32>
    %cst_84 = arith.constant dense<0.000000e+00> : vector<16xf32>
    %234 = vector.multi_reduction <add>, %233, %cst_84 [1] : vector<16x32xf32> to vector<16xf32>
    %235 = vector.shape_cast %234 : vector<16xf32> to vector<16x1xf32>
    %236 = tpu.reciprocal %235 {approx = true} : vector<16x1xf32> -> vector<16x1xf32>
    %237 = vector.broadcast %236 : vector<16x1xf32> to vector<16x32xf32>
    %238 = arith.mulf %233, %237 : vector<16x32xf32>
    %239 = arith.truncf %238 : vector<16x32xf32> to vector<16x32xbf16>
    %240 = vector.extract_strided_slice %166 {offsets = [0, 96], sizes = [32, 32], strides = [1, 1]} : vector<32x128xbf16> to vector<32x32xbf16>
    %cst_85 = arith.constant dense<0.000000e+00> : vector<16x32xf32>
    %241 = tpu.matmul %239, %240, %cst_85 {dimension_numbers = #tpu.dot_dimension_numbers<[1], [0], [0], [1], [0, 0, 1, 1], [], []>} : vector<16x32xbf16>, vector<32x32xbf16>, vector<16x32xf32> -> vector<16x32xf32>
    %c0_86 = arith.constant 0 : index
    %c96_87 = arith.constant 96 : index
    %242 = vector.load %arg15[%c0_86, %c96_87] : memref<16x128xf32, #tpu.memory_space<vmem>>, vector<16x32xf32>
    tpu.vector_store %arg15[%c0_86, %c96_87], %241 {strides = array<i32>} : memref<16x128xf32, #tpu.memory_space<vmem>>, vector<16x32xf32>,
    %c0_88 = arith.constant 0 : index
    %c0_89 = arith.constant 0 : index
    %243 = vector.load %arg15[%c0_88, %c0_89] : memref<16x128xf32, #tpu.memory_space<vmem>>, vector<16x128xf32>
    %244 = arith.truncf %243 : vector<16x128xf32> to vector<16x128xbf16>
    %c0_90 = arith.constant 0 : index
    %c0_91 = arith.constant 0 : index
    %c0_92 = arith.constant 0 : index
    %245 = vector.load %arg10[%c0_90, %c0_91, %c0_92] : memref<1x128x128xbf16, #tpu.memory_space<vmem>>, vector<1x128x128xbf16>
    %246 = vector.shape_cast %245 : vector<1x128x128xbf16> to vector<128x128xbf16>
    %cst_93 = arith.constant dense<0.000000e+00> : vector<16x128xf32>
    %247 = tpu.matmul %244, %246, %cst_93 {dimension_numbers = #tpu.dot_dimension_numbers<[1], [0], [0], [1], [0, 0, 1, 1], [], []>} : vector<16x128xbf16>, vector<128x128xbf16>, vector<16x128xf32> -> vector<16x128xf32>
    %248 = arith.addf %129, %247 : vector<16x128xf32>
    %249 = vector.broadcast %14 : vector<1x128xf32> to vector<16x128xf32>
    %250 = arith.addf %248, %249 : vector<16x128xf32>
    %cst_94 = arith.constant dense<0.000000e+00> : vector<16xf32>
    %251 = vector.multi_reduction <add>, %250, %cst_94 [1] : vector<16x128xf32> to vector<16xf32>
    %252 = vector.shape_cast %251 : vector<16xf32> to vector<16x1xf32>
    %cst_95 = arith.constant 1.280000e+02 : f32
    %253 = vector.broadcast %cst_95 : f32 to vector<16x1xf32>
    %254 = arith.divf %252, %253 : vector<16x1xf32>
    %255 = vector.broadcast %254 : vector<16x1xf32> to vector<16x128xf32>
    %256 = arith.subf %250, %255 : vector<16x128xf32>
    %257 = arith.mulf %256, %256 : vector<16x128xf32>
    %cst_96 = arith.constant dense<0.000000e+00> : vector<16xf32>
    %258 = vector.multi_reduction <add>, %257, %cst_96 [1] : vector<16x128xf32> to vector<16xf32>
    %259 = vector.shape_cast %258 : vector<16xf32> to vector<16x1xf32>
    %cst_97 = arith.constant 1.280000e+02 : f32
    %260 = vector.broadcast %cst_97 : f32 to vector<16x1xf32>
    %261 = arith.divf %259, %260 : vector<16x1xf32>
    %cst_98 = arith.constant 9.99999974E-6 : f32
    %262 = vector.broadcast %cst_98 : f32 to vector<16x1xf32>
    %263 = arith.addf %261, %262 : vector<16x1xf32>
    %264 = math.rsqrt %263 : vector<16x1xf32>
    %265 = vector.broadcast %264 : vector<16x1xf32> to vector<16x128xf32>
    %266 = arith.mulf %256, %265 : vector<16x128xf32>
    %267 = vector.broadcast %11 : vector<1x128xf32> to vector<16x128xf32>
    %268 = arith.mulf %266, %267 : vector<16x128xf32>
    %269 = vector.broadcast %12 : vector<1x128xf32> to vector<16x128xf32>
    %270 = arith.addf %268, %269 : vector<16x128xf32>
    %271 = arith.truncf %270 : vector<16x128xf32> to vector<16x128xbf16>
    %c0_99 = arith.constant 0 : index
    %c0_100 = arith.constant 0 : index
    %c0_101 = arith.constant 0 : index
    %272 = vector.load %arg11[%c0_99, %c0_100, %c0_101] : memref<1x128x512xbf16, #tpu.memory_space<vmem>>, vector<1x128x512xbf16>
    %273 = vector.shape_cast %272 : vector<1x128x512xbf16> to vector<128x512xbf16>
    %cst_102 = arith.constant dense<0.000000e+00> : vector<16x512xf32>
    %274 = tpu.matmul %271, %273, %cst_102 {dimension_numbers = #tpu.dot_dimension_numbers<[1], [0], [0], [1], [0, 0, 1, 1], [], []>} : vector<16x128xbf16>, vector<128x512xbf16>, vector<16x512xf32> -> vector<16x512xf32>
    %c0_103 = arith.constant 0 : index
    %c0_104 = arith.constant 0 : index
    %c0_105 = arith.constant 0 : index
    %275 = vector.load %arg5[%c0_103, %c0_104, %c0_105] : memref<1x1x512xf32, #tpu.memory_space<vmem>>, vector<1x1x512xf32>
    %276 = vector.shape_cast %275 : vector<1x1x512xf32> to vector<1x512xf32>
    %277 = vector.broadcast %276 : vector<1x512xf32> to vector<16x512xf32>
    %278 = arith.addf %274, %277 : vector<16x512xf32>
    %cst_106 = arith.constant 5.000000e-01 : f32
    %279 = vector.broadcast %cst_106 : f32 to vector<16x512xf32>
    %280 = arith.mulf %279, %278 : vector<16x512xf32>
    %cst_107 = arith.constant 0.707106769 : f32
    %281 = vector.broadcast %cst_107 : f32 to vector<16x512xf32>
    %282 = arith.mulf %278, %281 : vector<16x512xf32>
    %283 = math.erf %282 : vector<16x512xf32>
    %cst_108 = arith.constant 1.000000e+00 : f32
    %284 = vector.broadcast %cst_108 : f32 to vector<16x512xf32>
    %285 = arith.addf %284, %283 : vector<16x512xf32>
    %286 = arith.mulf %280, %285 : vector<16x512xf32>
    %287 = arith.truncf %286 : vector<16x512xf32> to vector<16x512xbf16>
    %c0_109 = arith.constant 0 : index
    %c0_110 = arith.constant 0 : index
    %c0_111 = arith.constant 0 : index
    %288 = vector.load %arg12[%c0_109, %c0_110, %c0_111] : memref<1x512x128xbf16, #tpu.memory_space<vmem>>, vector<1x512x128xbf16>
    %289 = vector.shape_cast %288 : vector<1x512x128xbf16> to vector<512x128xbf16>
    %cst_112 = arith.constant dense<0.000000e+00> : vector<16x128xf32>
    %290 = tpu.matmul %287, %289, %cst_112 {dimension_numbers = #tpu.dot_dimension_numbers<[1], [0], [0], [1], [0, 0, 1, 1], [], []>} : vector<16x512xbf16>, vector<512x128xbf16>, vector<16x128xf32> -> vector<16x128xf32>
    %291 = vector.broadcast %15 : vector<1x128xf32> to vector<16x128xf32>
    %292 = arith.addf %290, %291 : vector<16x128xf32>
    %293 = arith.addf %250, %292 : vector<16x128xf32>
    %294 = vector.shape_cast %293 : vector<16x128xf32> to vector<1x16x128xf32>
    %c0_113 = arith.constant 0 : index
    %c0_114 = arith.constant 0 : index
    %c0_115 = arith.constant 0 : index
    %295 = vector.load %arg13[%c0_113, %c0_114, %c0_115] : memref<1x16x128xf32, #tpu.memory_space<vmem>>, vector<1x16x128xf32>
    tpu.vector_store %arg13[%c0_113, %c0_114, %c0_115], %294 {strides = array<i32>} : memref<1x16x128xf32, #tpu.memory_space<vmem>>, vector<1x16x128xf32>,
    return
  }
  func.func @transform_0(%arg0: i32, %arg1: i32) -> (i32, i32, i32) {
    %c0_i32 = arith.constant 0 : i32
    %c0_i32_0 = arith.constant 0 : i32
    %c0_i32_1 = arith.constant 0 : i32
    return %arg0, %c0_i32, %c0_i32_0 : i32, i32, i32
  }
  func.func @transform_1(%arg0: i32, %arg1: i32) -> (i32, i32, i32) {
    %c0_i32 = arith.constant 0 : i32
    %c0_i32_0 = arith.constant 0 : i32
    %c0_i32_1 = arith.constant 0 : i32
    return %arg0, %c0_i32, %c0_i32_0 : i32, i32, i32
  }
  func.func @transform_2(%arg0: i32, %arg1: i32) -> (i32, i32, i32) {
    %c0_i32 = arith.constant 0 : i32
    %c0_i32_0 = arith.constant 0 : i32
    %c0_i32_1 = arith.constant 0 : i32
    return %arg1, %c0_i32, %c0_i32_0 : i32, i32, i32
  }
  func.func @transform_3(%arg0: i32, %arg1: i32) -> (i32, i32, i32) {
    %c0_i32 = arith.constant 0 : i32
    %c0_i32_0 = arith.constant 0 : i32
    %c0_i32_1 = arith.constant 0 : i32
    return %arg1, %c0_i32, %c0_i32_0 : i32, i32, i32
  }
  func.func @transform_4(%arg0: i32, %arg1: i32) -> (i32, i32, i32) {
    %c0_i32 = arith.constant 0 : i32
    %c0_i32_0 = arith.constant 0 : i32
    %c0_i32_1 = arith.constant 0 : i32
    return %arg1, %c0_i32, %c0_i32_0 : i32, i32, i32
  }
  func.func @transform_5(%arg0: i32, %arg1: i32) -> (i32, i32, i32) {
    %c0_i32 = arith.constant 0 : i32
    %c0_i32_0 = arith.constant 0 : i32
    %c0_i32_1 = arith.constant 0 : i32
    return %arg1, %c0_i32, %c0_i32_0 : i32, i32, i32
  }
  func.func @transform_6(%arg0: i32, %arg1: i32) -> (i32, i32, i32) {
    %c0_i32 = arith.constant 0 : i32
    %c0_i32_0 = arith.constant 0 : i32
    %c0_i32_1 = arith.constant 0 : i32
    return %arg1, %c0_i32, %c0_i32_0 : i32, i32, i32
  }
  func.func @transform_7(%arg0: i32, %arg1: i32) -> (i32, i32, i32) {
    %c0_i32 = arith.constant 0 : i32
    %c0_i32_0 = arith.constant 0 : i32
    %c0_i32_1 = arith.constant 0 : i32
    return %arg1, %c0_i32, %c0_i32_0 : i32, i32, i32
  }
  func.func @transform_8(%arg0: i32, %arg1: i32) -> (i32, i32, i32) {
    %c0_i32 = arith.constant 0 : i32
    %c0_i32_0 = arith.constant 0 : i32
    %c0_i32_1 = arith.constant 0 : i32
    return %arg1, %c0_i32, %c0_i32_0 : i32, i32, i32
  }
  func.func @transform_9(%arg0: i32, %arg1: i32) -> (i32, i32, i32) {
    %c0_i32 = arith.constant 0 : i32
    %c0_i32_0 = arith.constant 0 : i32
    %c0_i32_1 = arith.constant 0 : i32
    return %arg1, %c0_i32, %c0_i32_0 : i32, i32, i32
  }
  func.func @transform_10(%arg0: i32, %arg1: i32) -> (i32, i32, i32) {
    %c0_i32 = arith.constant 0 : i32
    %c0_i32_0 = arith.constant 0 : i32
    %c0_i32_1 = arith.constant 0 : i32
    return %arg1, %c0_i32, %c0_i32_0 : i32, i32, i32
  }
  func.func @transform_11(%arg0: i32, %arg1: i32) -> (i32, i32, i32) {
    %c0_i32 = arith.constant 0 : i32
    %c0_i32_0 = arith.constant 0 : i32
    %c0_i32_1 = arith.constant 0 : i32
    return %arg0, %c0_i32, %c0_i32_0 : i32, i32, i32
  }
}

</mosaic_0001>

<bundles_post_ra>
// kernel: tpu_custom_call.1
= control target key start
LH: loop header
LB: loop body
LE: loop exit
PB: predicated region body
PF: predicated region fallthrough
CT: control target
= control target key end

     0   :  { %s6149_s0 = inlined_call_operand.vmem [shape: f32[2,16,128], index: 0, kind: input, shape index: {}]   ;;  %s6150_s1 = inlined_call_operand.hbm [shape: f32[2,32,128], index: 1, kind: input, shape index: {}]   ;;  %s6151_s2 = inlined_call_operand.vmem [shape: f32[2,11,128], index: 2, kind: input, shape index: {}]   ;;  %s6152_s3 = inlined_call_operand.vmem [shape: f32[2,1,512], index: 3, kind: input, shape index: {}]   ;;  %s6153_s4 = inlined_call_operand.hbm [shape: bf16[2,128,384], index: 4, kind: input, shape index: {}]   ;;  %s6154_s5 = inlined_call_operand.hbm [shape: bf16[2,128,128], index: 5, kind: input, shape index: {}]   ;;  %s6155_s6 = inlined_call_operand.hbm [shape: bf16[2,128,128], index: 6, kind: input, shape index: {}]   ;;  %s6156_s7 = inlined_call_operand.hbm [shape: bf16[2,128,256], index: 7, kind: input, shape index: {}]   ;;  %s6157_s8 = inlined_call_operand.hbm [shape: bf16[2,128,128], index: 8, kind: input, shape index: {}]   ;;  %s6158_s9 = inlined_call_operand.hbm [shape: bf16[2,128,512], index: 9, kind: input, shape index: {}]   ;;  %s6159_s10 = inlined_call_operand.hbm [shape: bf16[2,512,128], index: 10, kind: input, shape index: {}]   ;;  %s6160_s11 = inlined_call_operand.hbm [shape: f32[2,16,128], index: 11, kind: output, shape index: {}]  }
   0x1   :  { %6187 = sst [smem:[#allocation42_spill]] %s6149_s0 }
   0x2   :  { %6188 = sst [smem:[#allocation43_spill]] %s6150_s1 }
   0x3   :  { %6189 = sst [smem:[#allocation44_spill]] %s6151_s2 }
   0x4   :  { %6190 = sst [smem:[#allocation45_spill]] %s6152_s3 }
   0x5   :  { %6191 = sst [smem:[#allocation46_spill]] %s6153_s4 }
   0x6   :  { %6192 = sst [smem:[#allocation47_spill]] %s6154_s5 }
   0x7   :  { %6193 = sst [smem:[#allocation48_spill]] %s6155_s6 }
   0x8   :  { %6194 = sst [smem:[#allocation49_spill]] %s6156_s7 }
   0x9   :  { %6195 = sst [smem:[#allocation50_spill]] %s6157_s8 }
   0xa   :  { %6196 = sst [smem:[#allocation51_spill]] %s6158_s9 }
   0xb   :  { %6197 = sst [smem:[#allocation52_spill]] %s6159_s10 }
   0xc   :  { %6198 = sst [smem:[#allocation53_spill]] %s6160_s11 }
   0xd   :  { %16 = vsyncpa [#allocation5], 0 }
   0xe   :  { %18 = vsyncpa [#allocation5 + $0x1], 0 }
   0xf   :  { %19 = vsyncpa [#allocation8], 0 }
  0x10   :  { %21 = vsyncpa [#allocation8 + $0x1], 0 }
  0x11   :  { %22 = vsyncpa [#allocation11], 0 }
  0x12   :  { %24 = vsyncpa [#allocation11 + $0x1], 0 }
  0x13   :  { %25 = vsyncpa [#allocation14], 0 }
  0x14   :  { %27 = vsyncpa [#allocation14 + $0x1], 0 }
  0x15   :  { %28 = vsyncpa [#allocation17], 0 }
  0x16   :  { %30 = vsyncpa [#allocation17 + $0x1], 0 }
  0x17   :  { %31 = vsyncpa [#allocation6], 0 }
  0x18   :  { %33 = vsyncpa [#allocation6 + $0x1], 0  ;;  %s4955_s17 = smov 0   ;;  %s4957_s18 = smov 0  }
  0x19   :  { %s4959_s19 = smov 0   ;;  %s4961_s20 = smov 0  }
  0x1a   :  { %s4963_s21 = smov 0   ;;  %s4965_s22 = smov 0  }
  0x1b   :  { %s4967_s23 = smov 0   ;;  %s4969_s24 = smov 0  }
  0x1c   :  { %s4971_s25 = smov 0   ;;  %s4973_s26 = smov 0  }
  0x1d   :  { %s4975_s27 = smov 0  }
  0x1e LB: > { %6199 = sst [smem:[#allocation25_spill]] %s4842_s18  ;;  %p92_p0 = scmp.eq.s32.totalorder %s4878_s27, 0  ;;  %s4878_s27 = sphi %s4975_s27, %s39_s27   ;;  %s4874_s26 = sphi %s4973_s26, %s6276_s26   ;;  %s4870_s25 = sphi %s4971_s25, %s6275_s25   ;;  %s4866_s24 = sphi %s4969_s24, %s6274_s24   ;;  %s4862_s23 = sphi %s4967_s23, %s6273_s23   ;;  %s4858_s22 = sphi %s4965_s22, %s6272_s22   ;;  %s4854_s21 = sphi %s4963_s21, %s6271_s21   ;;  %s4850_s20 = sphi %s4961_s20, %s6270_s20   ;;  %s4846_s19 = sphi %s4959_s19, %s6269_s19   ;;  %s4842_s18 = sphi %s4957_s18, %s6268_s18   ;;  %s4838_s17 = sphi %s4955_s17, %s6267_s17  }
  0x1f   : > { %6200 = sst [smem:[#allocation26_spill]] %s4846_s19  ;;  %p169_p1 = scmp.ne.s32.totalorder %s4846_s19, %s4842_s18 }
  0x20   : > { %6201 = sst [smem:[#allocation27_spill]] %s4854_s21  ;;  %p175_p2 = scmp.ne.s32.totalorder %s4842_s18, %s4838_s17 }
  0x21   : > { %6202 = sst [smem:[#allocation28_spill]] %s4858_s22  ;;  %p6168_p3 = scmp.lt.s32.totalorder %s4878_s27, 4 }
  0x22   : > { %6203 = sst [smem:[#allocation29_spill]] %s4862_s23  ;;  %p171_p4 = por %p169_p1, %p92_p0 }
  0x23   : > { %6204 = sst [smem:[#allocation30_spill]] %s4866_s24  ;;  %s5020_s29 = sand.u32 1, %s4878_s27  }
  0x24   : > { %6205 = sst [smem:[#allocation31_spill]] %s4870_s25  ;;  %s5023_s30 = sand.u32 1, %s4846_s19  }
  0x25   : > { %6206 = sst [smem:[#allocation32_spill]] %s4874_s26  ;;  %s4239_s12 = smul.u32 192, %s5023_s30 }
  0x26   : > { %p5028_p5 = pnand %p6168_p3, %p171_p4  ;;  %s4240_s14 = smul.u32 192, %s4870_s25 }
  0x27   : > { %s6208_s4 = sld [smem:[#allocation46_spill]]  ;;  %s430_s11 = scalar_lea.vmem [#allocation7], %s4239_s12 }
  0x28   : > { %s438_s3 = sshll.u32 %s430_s11, 4  ;;  %s6164_s0 = scalar_lea.sflag [#allocation8], %s5020_s29  ;;  %s439_s3 = int_to_ptr.vmem [resolvable:$true] %s438_s3 }
  0x29   : > { %s4880_s23 = smov 192   ;;  %s4881_s24 = smov 12  }
  0x2a   : > { %p3545_p6 = scmp.ge.s32.totalorder %s4878_s27, 1  ;;  %p578_p7 = scmp.lt.s32.totalorder %s4878_s27, 5 }
  0x2b   : > { %s5044_s10 = sshll.u32 %s5023_s30, 6  ;;  %s5047_s12 = sshll.u32 %s4870_s25, 6 }
  0x2c   : > { %p5049_p8 = pnand %p3545_p6, %p578_p7  ;;  %s6211_s6 = sld [smem:[#allocation48_spill]] }
  0x2d   : > { %s435_s28 = scalar_lea.hbm %s6208_s4, %s4240_s14  ;;  %s6169_s16 = smov 64  }
  0x2e   : > { %s436_s2 = sshll.u32 %s435_s28, 4  ;;  %s6212_s8 = sld [smem:[#allocation50_spill]]  ;;  %s437_s2 = int_to_ptr.hbm [resolvable:$true] %s436_s2 }
  0x2f   : > { %4266 = dma.hbm_to_vmem [thread:$0]  (!%p5028_p5), %s437_s2, 3072, %s439_s3, %s6164_s0, %s4880_s23, %s4880_s23, %s4881_s24  }
  0x30   : > { %s6209_s11 = scalar_select %p5049_p8, 1, 0 }
  0x31   : > { %s474_s3 = scalar_lea.vmem [#allocation10], %s5044_s10  ;;  %s6167_s24 = scalar_lea.sflag [#allocation11], %s5020_s29 }
  0x32   : > { %6210 = sst [smem:[#allocation33_spill]] %s6209_s11  ;;  %s479_s15 = scalar_lea.hbm %s6211_s6, %s5047_s12 }
  0x33   : > { %s480_s2 = sshll.u32 %s479_s15, 4  ;;  %s482_s23 = sshll.u32 %s474_s3, 4  ;;  %s481_s2 = int_to_ptr.hbm [resolvable:$true] %s480_s2  ;;  %s483_s23 = int_to_ptr.vmem [resolvable:$true] %s482_s23 }
  0x34   : > { %s6171_s0 = smov 4   ;;  %s523_s15 = scalar_lea.hbm %s6212_s8, %s5047_s12 }
  0x35   : > { %4272 = dma.hbm_to_vmem [thread:$0]  (!%p5028_p5), %s481_s2, 1024, %s483_s23, %s6167_s24, %s6169_s16, %s6169_s16, %s6171_s0  }
  0x36   : > { %s518_s3 = scalar_lea.vmem [#allocation13], %s5044_s10  ;;  %s524_s6 = sshll.u32 %s523_s15, 4  ;;  %s525_s6 = int_to_ptr.hbm [resolvable:$true] %s524_s6 }
  0x37   : > { %s526_s4 = sshll.u32 %s518_s3, 4  ;;  %s6166_s11 = scalar_lea.sflag [#allocation14], %s5020_s29  ;;  %s527_s4 = int_to_ptr.vmem [resolvable:$true] %s526_s4 }
  0x38   : > { %4278 = dma.hbm_to_vmem [thread:$0]  (!%p5028_p5), %s525_s6, 1024, %s527_s4, %s6166_s11, %s6169_s16, %s6169_s16, %s6171_s0  }
  0x39   : > { %s5080_s2 = sadd.s32 4294967295, %s4878_s27   ;;  %s3520_s23 = sadd.s32 4294967294, %s4878_s27  }
  0x3a   : > { %6213 = sst [smem:[#allocation34_spill]] %s5080_s2  ;;  %s48_s28 = sadd.s32 1, %s4870_s25 }
  0x3b   : > { %p49_p9 = scmp.ge.s32.totalorder %s48_s28, 2  ;;  %s51_s14 = sadd.s32 1, %s4874_s26 }
  0x3c   : > { %s84_s15 = sadd.s32 1, %s4858_s22  ;;  %p91_p10 = scmp.ne.s32.totalorder %s4858_s22, %s4854_s21 }
  0x3d   : > { %s6278_s28 = smov (%p49_p9, %s48_s28), 0  ;;  %s6280_s14 = smov (!%p49_p9, %s51_s14), %s4874_s26 }
  0x3e   : > { %6214 = sst [smem:[#allocation35_spill]] %s6278_s28  ;;  %p5096_p11 = por %p92_p0, %p91_p10 }
  0x3f   : > { %p97_p12 = scmp.ne.s32.totalorder %s4854_s21, %s4850_s20  ;;  %p53_p13 = scmp.ge.s32.totalorder %s6280_s14, 2 }
  0x40   : > { %p98_p1 = scmp.eq.s32.totalorder %s5080_s2, 0  ;;  %s159_s6 = ssub.s32 %s4870_s25, %s6278_s28 }
  0x41   : > { %p355_p4 = scmp.eq.s32.totalorder %s5080_s2, 3  ;;  %s6282_s14 = smov (%p53_p13, %s6280_s14), 0 }
  0x42   : > { %6216 = sst [smem:[#allocation36_spill]] %s6282_s14  ;;  %p5111_p6 = por %p98_p1, %p97_p12 }
  0x43   : > { %p160_p0 = scmp.eq.s32.totalorder %s159_s6, 0  ;;  %s81_s11 = ssub.s32 %s4874_s26, %s6282_s14 }
  0x44   : > { %p5120_p7 = por %p175_p2, %p98_p1  ;;  %p82_p9 = scmp.eq.s32.totalorder %s81_s11, 0 }
  0x45   : > { %p5127_p3 = por %p355_p4, %p91_p10  ;;  %s6222_s0 = sadd.s32 1, %s4846_s19 }
  0x46   : > { %s6218_s24 = scalar_select %p5120_p7, 1, 0 }
  0x47   : > { %s6220_s16 = scalar_select %p5127_p3, 1, 0 }
  0x48   : > { %6219 = sst [smem:[#allocation37_spill]] %s6218_s24  ;;  %p361_p13 = scmp.eq.s32.totalorder %s3520_s23, 3 }
  0x49   : > { %6221 = sst [smem:[#allocation38_spill]] %s6220_s16  ;;  %s389_s17 = sand.u32 1, %s4858_s22  }
  0x4a   : > { %s5134_s8 = scalar_select %p160_p0, %s4846_s19, %s6222_s0  }
  0x4b   : > { %s5137_s28 = scalar_select %p82_p9, %s4858_s22, %s84_s15  }
  0x4c   : > { %6223 = sst [smem:[#allocation39_spill]] %s5134_s8  ;;  %s3523_s6 = sshll.u32 %s389_s17, 5 }
  0x4d   : > { %6224 = sst [smem:[#allocation40_spill]] %s5137_s28  ;;  %p5143_p2 = por %p361_p13, %p97_p12 }
  0x4e   : > { %s4101_s11 = sshll.u32 %s4874_s26, 5  ;;  %s393_s24 = scalar_lea.vmem [#allocation4], %s3523_s6 }
  0x4f   : > { %s6225_s14 = scalar_select %p5143_p2, 1, 0 }
  0x50   : > { %s401_s18 = sshll.u32 %s393_s24, 4  ;;  %s6227_s1 = sld [smem:[#allocation43_spill]]  ;;  %s402_s18 = int_to_ptr.vmem [resolvable:$true] %s401_s18 }
  0x51   : > { %6226 = sst [smem:[#allocation41_spill]] %s6225_s14  ;;  %p6228_p10 = scmp.lt.s32.totalorder %s4878_s27, 4 }
  0x52   : > { %s390_s15 = scalar_lea.sflag [#allocation5], %s389_s17  ;;  %s4884_s28 = smov 128  }
  0x53   : > { %p4261_p1 = pnand %p6228_p10, %p5096_p11  ;;  %s4885_s22 = smov 8  }
  0x54   : > { %s6229_s5 = sld [smem:[#allocation47_spill]]  ;;  %s6230_s4 = smov 4  }
  0x55   : > { %s6232_s17 = scalar_lea.sflag [#allocation8], %s5020_s29  ;;  %s6233_s7 = sld [smem:[#allocation49_spill]] }
  0x56   : > { %s398_s0 = scalar_lea.hbm %s6227_s1, %s4101_s11  ;;  %s452_s11 = scalar_lea.vmem [#allocation9], %s5044_s10 }
  0x57   : > { %s399_s23 = sshll.u32 %s398_s0, 4  ;;  %s460_s1 = sshll.u32 %s452_s11, 4  ;;  %s400_s23 = int_to_ptr.hbm [resolvable:$true] %s399_s23  ;;  %s461_s1 = int_to_ptr.vmem [resolvable:$true] %s460_s1 }
  0x58   : > { %4263 = dma.hbm_to_vmem [thread:$0]  (!%p4261_p1), %s400_s23, 512, %s402_s18, %s390_s15, %s4884_s28, %s4884_s28, %s4885_s22  }
  0x59   : > { %s6231_s0 = smov 64   ;;  %s3533_s18 = sshll.u32 %s5023_s30, 7 }
  0x5a   : > { %s457_s16 = scalar_lea.hbm %s6229_s5, %s5047_s12  ;;  %s4104_s23 = sshll.u32 %s4870_s25, 7 }
  0x5b   : > { %s458_s2 = sshll.u32 %s457_s16, 4  ;;  %s501_s24 = scalar_lea.hbm %s6233_s7, %s4104_s23  ;;  %s459_s2 = int_to_ptr.hbm [resolvable:$true] %s458_s2 }
  0x5c   : > { %4269 = dma.hbm_to_vmem [thread:$0]  (!%p5028_p5), %s459_s2, 1024, %s461_s1, %s6232_s17, %s6231_s0, %s6231_s0, %s6230_s4  }
  0x5d   : > { %s502_s12 = sshll.u32 %s501_s24, 4  ;;  %s496_s16 = scalar_lea.vmem [#allocation12], %s3533_s18  ;;  %s503_s12 = int_to_ptr.hbm [resolvable:$true] %s502_s12 }
  0x5e   : > { %s504_s10 = sshll.u32 %s496_s16, 4  ;;  %s6234_s11 = scalar_lea.sflag [#allocation11], %s5020_s29  ;;  %s505_s10 = int_to_ptr.vmem [resolvable:$true] %s504_s10 }
  0x5f   : > { %4275 = dma.hbm_to_vmem [thread:$0]  (!%p5028_p5), %s503_s12, 2048, %s505_s10, %s6234_s11, %s4884_s28, %s4884_s28, %s4885_s22  }
  0x60   : > { %s3539_s5 = sshll.u32 %s5023_s30, 8  ;;  %s4106_s26 = sshll.u32 %s4870_s25, 8 }
  0x61   : > { %s6235_s9 = sld [smem:[#allocation51_spill]]  ;;  %s540_s23 = scalar_lea.vmem [#allocation15], %s3539_s5 }
  0x62   : > { %s548_s15 = sshll.u32 %s540_s23, 4  ;;  %s4886_s18 = smov 256   ;;  %s549_s15 = int_to_ptr.vmem [resolvable:$true] %s548_s15 }
  0x63   : > { %s4887_s6 = smov 16   ;;  %s6236_s24 = scalar_lea.sflag [#allocation14], %s5020_s29 }
  0x64   : > { %s6237_s28 = sld [smem:[#allocation52_spill]]  ;;  %s562_s10 = scalar_lea.vmem [#allocation16], %s3539_s5 }
  0x65   : > { %s570_s11 = sshll.u32 %s562_s10, 4  ;;  %s559_s1 = scalar_lea.sflag [#allocation17], %s5023_s30  ;;  %s571_s11 = int_to_ptr.vmem [resolvable:$true] %s570_s11 }
  0x66   : > { %s5197_s29 = sand.u32 (!%p5049_p8), 1, %s4854_s21  }
  0x67   : > { %s545_s2 = scalar_lea.hbm %s6235_s9, %s4106_s26  ;;  %s3546_s5 = sshll.u32 (!%p5049_p8), %s5197_s29, 5 }
  0x68   : > { %s546_s17 = sshll.u32 %s545_s2, 4  ;;  %582 = sbr.rel (%p5049_p8) target bundleno = 4105 (0x1009), region = 64  ;;  %s547_s17 = int_to_ptr.hbm [resolvable:$true] %s546_s17 }
  0x69   : > { %4281 = dma.hbm_to_vmem [thread:$0]  (!%p5028_p5), %s547_s17, 4096, %s549_s15, %s6236_s24, %s4886_s18, %s4886_s18, %s4887_s6  }
  0x6a   : > { %s567_s12 = scalar_lea.hbm %s6237_s28, %s4106_s26  ;;  %s585_s26 = scalar_lea.sflag (!%p5049_p8), [#allocation5], %s5197_s29 }
  0x6b   : > { %s568_s8 = sshll.u32 %s567_s12, 4  ;;  %s5201_s17 = scalar_lea.vmem (!%p5049_p8), [#allocation4], %s3546_s5  ;;  %s569_s8 = int_to_ptr.hbm [resolvable:$true] %s568_s8 }
  0x6c   : > { %4284 = dma.hbm_to_vmem [thread:$0]  (!%p5028_p5), %s569_s8, 4096, %s571_s11, %s559_s1, %s6231_s0, %s6231_s0, %s6230_s4  }
  0x6d   : > { %4813 = dma.done.wait (%p5111_p6), %s585_s26, 512  }
  0x6e   : > { %4815 = vsyncadd (%p5111_p6), %s585_s26, 4294966784  ;;  %s6239_s30 = sld [smem:[#allocation34_spill]] }
  0x6f   : > { %s6240_s13 = sld [smem:[#allocation25_spill]] }
  0x74   : > { %s594_s0 = sand.u32 1, %s6239_s30  }
  0x75   : > { %s596_s23 = sand.u32 1, %s6240_s13   ;;  %s595_s18 = scalar_lea.sflag [#allocation8], %s594_s0 }
  0x76   : > { %s4241_s15 = smul.u32 192, %s596_s23 }
  0x78   : > { %s5209_s6 = scalar_lea.vmem [#allocation7], %s4241_s15 }
  0x79   : > { %4817 = dma.done.wait (%p5120_p7), %s595_s18, 4096  }
  0x7a   : > { %4819 = vsyncadd (%p5120_p7), %s595_s18, 4294963200  ;;  %s3547_s24 = sshll.u32 %s596_s23, 6  ;;  %s615_s3 = scalar_lea.sflag [#allocation11], %s594_s0 }
  0x7b   : > { %s5215_s16 = scalar_lea.vmem [#allocation9], %s3547_s24  ;;  %s5217_s22 = scalar_lea.vmem [#allocation10], %s3547_s24 }
  0x7c   : > { %4821 = dma.done.wait (%p5120_p7), %s615_s3, 3072  }
  0x7d   : > { %4823 = vsyncadd (%p5120_p7), %s615_s3, 4294964224  ;;  %s3549_s28 = sshll.u32 %s596_s23, 7  ;;  %s635_s10 = scalar_lea.sflag [#allocation14], %s594_s0 }
  0x7e   : > { %s5223_s12 = scalar_lea.vmem [#allocation12], %s3549_s28  ;;  %s5225_s11 = scalar_lea.vmem [#allocation13], %s3547_s24 }
  0x7f   : > { %4825 = dma.done.wait (%p5120_p7), %s635_s10, 5120  }
  0x80   : > { %4827 = vsyncadd (%p5120_p7), %s635_s10, 4294962176  ;;  %s3551_s8 = sshll.u32 %s596_s23, 8  ;;  %s655_s2 = scalar_lea.sflag [#allocation17], %s596_s23 }
  0x81   : > { %s5231_s1 = scalar_lea.vmem [#allocation15], %s3551_s8  ;;  %s5233_s5 = scalar_lea.vmem [#allocation16], %s3551_s8 }
  0x82   : > { %4829 = dma.done.wait (%p5120_p7), %s655_s2, 4096  }
  0x83   : > { %4831 = vsyncadd (%p5120_p7), %s655_s2, 4294963200  ;;  %s6242_s26 = sld [smem:[#allocation30_spill]]  ;;  %s3553_s13 = sshll.u32 %s5197_s29, 4 }
  0x84   : > { %s6243_s30 = sld [smem:[#allocation29_spill]]  ;;  %s5259_s14 = scalar_lea.vmem [#allocation18], %s3553_s13 }
  0x85   : > { %s6244_s24 = sld [smem:[#allocation42_spill]] }
  0x86   : > { %s6245_s8 = sld [smem:[#allocation44_spill]] }
  0x87   : > { %s6246_s21 = sld [smem:[#allocation45_spill]] }
  0x89   : > { %p747_p5 = scmp.lt.s32.totalorder %s6242_s26, 1 }
  0x8a   : > { %p752_p8 = scmp.lt.s32.totalorder %s6243_s30, 1  ;;  %p3559_p11 = scmp.ne.s32.totalorder %s6243_s30, 0 }
  0x8b   : > { %s6284_s26 = smov (!%p747_p5, %s6242_s26), 1 }
  0x8c   : > { %s753_s0 = scalar_select %p752_p8, %s6243_s30, 1 }
  0x8d   : > { %s4108_s15 = sshll.u32 %s6284_s26, 4  ;;  %765 = sbr.rel (%p3559_p11) target bundleno = 419 (0x1a3), region = 100 }
  0x8e   : > { %s5247_s3 = scalar_lea.vmem %s6244_s24, %s4108_s15  ;;  %s4109_s28 = sshll.u32 %s753_s0, 4 }
  0x8f   : > { %s5252_s2 = scalar_lea.vmem %s6245_s8, %s4109_s28  ;;  %s3558_s7 = sshll.u32 %s753_s0, 2 }
  0x90   : > { %s5257_s19 = scalar_lea.vmem %s6246_s21, %s3558_s7 }
  0x92   : > { %v772_v0 = vld [vmem:[%s5201_s17 + $0x10] sm:$0xff]  ;;  %v770_v1 = vld [vmem:[%s5201_s17] sm:$0xff]  ;;  %v773_v2 = vld [vmem:[%s5201_s17 + $0x18] sm:$0xff]  ;;  %v4888_v4 = vmov 128.0  }
  0x93   : > { %778 = vadd.xlane.f32.xlu1 %v772_v0  ;;  %774 = vadd.xlane.f32.xlu0 %v770_v1  ;;  %v771_v3 = vld [vmem:[%s5201_s17 + $0x8] sm:$0xff]  ;;  %4394 = vrcp.f32 %v4888_v4  ;;  %v766_v31 = vld [vmem:[%s5247_s3] sm:$0xff]  ;;  %v767_v32 = vld [vmem:[%s5247_s3 + $0x8] sm:$0xff] }
  0x94   : > { %768 = vst [vmem:[%s5259_s14] sm:$0xff] %v766_v31 }
  0x95   : > { %769 = vst [vmem:[%s5259_s14 + $0x8] sm:$0xff] %v767_v32 }
  0x99   : > { %v4395_v5 = vpop.eup %4394 }
  0x9a   : > { %v783_v6 = vmul.f32 128.0, %v4395_v5  ;;  %vm787_vm0 = vweird.f32 %v4395_v5 }
  0x9b   : > { %780 = vadd.xlane.f32.xlu1 %v773_v2  ;;  %776 = vadd.xlane.f32.xlu0 %v771_v3 }
  0x9c   : > { %v784_v7 = vsub.f32 1.0, %v783_v6 }
  0x9e   : > { %v785_v8 = vmul.f32 %v4395_v5, %v784_v7 }
  0xa0   : > { %v786_v9 = vadd.f32 %v4395_v5, %v785_v8 }
  0xa2   : > { %v788_v10 = vsel %vm787_vm0, %v4395_v5, %v786_v9 }
 0x106   : > { %v779_v11 = vpop.xlane.xlu1 %778  ;;  %v775_v12 = vpop.xlane.xlu0 %774 }
 0x107   : > { %v791_v13 = vmul.f32 %v788_v10, %v779_v11  ;;  %v789_v14 = vmul.f32 %v788_v10, %v775_v12 }
 0x109   : > { %v5266_v15 = vsub.f32 %v772_v0, %v791_v13  ;;  %v793_v16 = vsub.f32 %v770_v1, %v789_v14 }
 0x10b   : > { %v799_v17 = vmul.f32 %v5266_v15, %v5266_v15  ;;  %v797_v18 = vmul.f32 %v793_v16, %v793_v16 }
 0x10d   : > { %805 = vadd.xlane.f32.xlu0 %v799_v17  ;;  %801 = vadd.xlane.f32.xlu2 %v797_v18 }
 0x10e   : > { %v781_v19 = vpop.xlane.xlu1 %780  ;;  %v777_v20 = vpop.xlane.xlu0 %776 }
 0x10f   : > { %v792_v21 = vmul.f32 %v788_v10, %v781_v19  ;;  %v790_v22 = vmul.f32 %v788_v10, %v777_v20 }
 0x111   : > { %v5270_v23 = vsub.f32 %v773_v2, %v792_v21  ;;  %v5272_v24 = vsub.f32 %v771_v3, %v790_v22 }
 0x113   : > { %v800_v25 = vmul.f32 %v5270_v23, %v5270_v23  ;;  %v798_v26 = vmul.f32 %v5272_v24, %v5272_v24 }
 0x115   : > { %807 = vadd.xlane.f32.xlu1 %v800_v25  ;;  %803 = vadd.xlane.f32.xlu2 %v798_v26 }
 0x180   : > { %v802_v27 = vpop.xlane.xlu2 %801  ;;  %v806_v28 = vpop.xlane.xlu0 %805 }
 0x181   : > { %v809_v29 = vmul.f32 %v802_v27, %v788_v10  ;;  %v811_v30 = vmul.f32 %v806_v28, %v788_v10 }
 0x183   : > { %v813_v33 = vadd.f32 1e-05, %v809_v29  ;;  %v815_v34 = vadd.f32 1e-05, %v811_v30 }
 0x185   : > { %4396 = vrsqrt.f32 %v813_v33  ;;  %vm823_vm3 = vweird.f32 %v813_v33  ;;  %vm843_vm5 = vweird.f32 %v815_v34 }
 0x186   : > { %4398 = vrsqrt.f32 %v815_v34 }
 0x188   : > { %v808_v35 = vpop.xlane.xlu1 %807  ;;  %v804_v36 = vpop.xlane.xlu2 %803 }
 0x189   : > { %v812_v37 = vmul.f32 %v808_v35, %v788_v10  ;;  %v810_v38 = vmul.f32 %v804_v36, %v788_v10 }
 0x18b   : > { %v4397_v39 = vpop.eup %4396  ;;  %v816_v40 = vadd.f32 1e-05, %v812_v37  ;;  %v814_v41 = vadd.f32 1e-05, %v810_v38 }
 0x18c   : > { %v4399_v42 = vpop.eup %4398  ;;  %v818_v43 = vmul.f32 %v4397_v39, %v813_v33  ;;  %vm824_vm1 = vweird.f32 %v4397_v39 }
 0x18d   : > { %v838_v44 = vmul.f32 %v4399_v42, %v815_v34  ;;  %4400 = vrsqrt.f32 %v816_v40  ;;  %vm844_vm2 = vweird.f32 %v4399_v42  ;;  %vm825_vm4 = vmor %vm823_vm3, %vm824_vm1  ;;  %vm853_vm9 = vweird.f32 %v816_v40 }
 0x18e   : > { %v819_v45 = vmul.f32 %v4397_v39, %v818_v43  ;;  %4402 = vrsqrt.f32 %v814_v41  ;;  %vm845_vm6 = vmor %vm843_vm5, %vm844_vm2  ;;  %vm833_vm11 = vweird.f32 %v814_v41 }
 0x18f   : > { %v839_v46 = vmul.f32 %v4399_v42, %v838_v44 }
 0x190   : > { %v820_v47 = vmul.f32 0.5, %v819_v45 }
 0x191   : > { %v840_v48 = vmul.f32 0.5, %v839_v46 }
 0x192   : > { %v821_v49 = vsub.f32 1.5, %v820_v47 }
 0x193   : > { %v4401_v50 = vpop.eup %4400  ;;  %v841_v51 = vsub.f32 1.5, %v840_v48 }
 0x194   : > { %v4403_v52 = vpop.eup %4402  ;;  %v822_v53 = vmul.f32 %v4397_v39, %v821_v49  ;;  %v848_v54 = vmul.f32 %v4401_v50, %v816_v40  ;;  %vm854_vm7 = vweird.f32 %v4401_v50 }
 0x195   : > { %v842_v55 = vmul.f32 %v4399_v42, %v841_v51  ;;  %v828_v56 = vmul.f32 %v4403_v52, %v814_v41  ;;  %vm834_vm8 = vweird.f32 %v4403_v52  ;;  %vm855_vm10 = vmor %vm853_vm9, %vm854_vm7 }
 0x196   : > { %v826_v57 = vsel %vm825_vm4, %v4397_v39, %v822_v53  ;;  %v849_v58 = vmul.f32 %v4401_v50, %v848_v54  ;;  %vm835_vm12 = vmor %vm833_vm11, %vm834_vm8 }
 0x197   : > { %v857_v59 = vmul.f32 %v826_v57, %v793_v16  ;;  %v846_v60 = vsel %vm845_vm6, %v4399_v42, %v842_v55  ;;  %v829_v61 = vmul.f32 %v4403_v52, %v828_v56 }
 0x198   : > { %v859_v62 = vmul.f32 %v846_v60, %v5266_v15  ;;  %v850_v63 = vmul.f32 0.5, %v849_v58 }
 0x199   : > { %861 = vst [vmem:[#allocation2 + $0x10] sm:$0xff] %v857_v59  ;;  %v830_v0 = vmul.f32 0.5, %v829_v61 }
 0x19a   : > { %863 = vst [vmem:[#allocation2 + $0x18] sm:$0xff] %v859_v62  ;;  %v851_v1 = vsub.f32 1.5, %v850_v63 }
 0x19b   : > { %v831_v2 = vsub.f32 1.5, %v830_v0 }
 0x19c   : > { %v852_v3 = vmul.f32 %v4401_v50, %v851_v1 }
 0x19d   : > { %v832_v4 = vmul.f32 %v4403_v52, %v831_v2 }
 0x19e   : > { %v856_v5 = vsel %vm855_vm10, %v4401_v50, %v852_v3 }
 0x19f   : > { %v860_v6 = vmul.f32 %v856_v5, %v5270_v23  ;;  %v836_v7 = vsel %vm835_vm12, %v4403_v52, %v832_v4 }
 0x1a0   : > { %v858_v8 = vmul.f32 %v836_v7, %v5272_v24 }
 0x1a1   : > { %864 = vst [vmem:[#allocation2 + $0x8] sm:$0xff] %v860_v6 }
 0x1a2   : > { %862 = vst [vmem:[#allocation2] sm:$0xff] %v858_v8 }
 0x1a3 PF: > { %v5286_v9 = vld [vmem:[%s5259_s14] sm:$0xff]  ;;  %v5290_v10 = vld [vmem:[%s5259_s14 + $0x8] sm:$0xff]  ;;  %v4889_v11 = vmov 128.0   ;;  %vm1137_vm4 = vcmask 261120   ;;  %vm1160_vm5 = vcmask 130048   ;;  %s4890_s7 = smov 96  }
 0x1a4   : > { %869 = vadd.xlane.f32.xlu0 %v5286_v9  ;;  %4404 = vrcp.f32 %v4889_v11  ;;  %v3646_v26 = vld [vmem:[%s5209_s6 + $0xa8] sm:$0xf]  ;;  %v4132_v27 = vld [vmem:[%s5209_s6 + $0xb0] sm:$0xf0]  ;;  %v4131_v28 = vld [vmem:[%s5209_s6 + $0xac] sm:$0xf] }
 0x1a5   : > { %v3647_v29 = vor.u32 %v4132_v27, %v3646_v26  ;;  %v3648_v30 = vld [vmem:[%s5209_s6 + $0xb4] sm:$0xf0]  ;;  %v3654_v31 = vld [vmem:[%s5209_s6 + $0xb0] sm:$0xf]  ;;  %v4133_v32 = vld [vmem:[%s5209_s6 + $0xb8] sm:$0xf0] }
 0x1a6   : > { %v3651_v33 = vor.u32 %v4131_v28, %v3648_v30  ;;  %v3655_v34 = vor.u32 %v4133_v32, %v3654_v31  ;;  %v3634_v35 = vld [vmem:[%s5209_s6 + $0x90] sm:$0xf]  ;;  %v4129_v36 = vld [vmem:[%s5209_s6 + $0x98] sm:$0xf0]  ;;  %v4128_v37 = vld [vmem:[%s5209_s6 + $0x94] sm:$0xf] }
 0x1a7   : > { %1083 = vmatpush.bf16.msra.mxu0 %v3647_v29  ;;  %v3635_v38 = vor.u32 %v4129_v36, %v3634_v35  ;;  %v3636_v39 = vld [vmem:[%s5209_s6 + $0x9c] sm:$0xf0]  ;;  %v3642_v40 = vld [vmem:[%s5209_s6 + $0x98] sm:$0xf]  ;;  %v4130_v41 = vld [vmem:[%s5209_s6 + $0xa0] sm:$0xf0] }
 0x1a8   : > { %1097 = vmatpush.bf16.msra.mxu1 %v3651_v33  ;;  %1111 = vmatpush.bf16.msra.mxu2 %v3655_v34  ;;  %v3639_v42 = vor.u32 %v4128_v37, %v3636_v39  ;;  %v3643_v43 = vor.u32 %v4130_v41, %v3642_v40  ;;  %v3622_v44 = vld [vmem:[%s5209_s6 + $0x78] sm:$0xf]  ;;  %v4126_v45 = vld [vmem:[%s5209_s6 + $0x80] sm:$0xf0]  ;;  %v4125_v46 = vld [vmem:[%s5209_s6 + $0x7c] sm:$0xf] }
 0x1a9   : > { %v3623_v47 = vor.u32 %v4126_v45, %v3622_v44  ;;  %v3624_v48 = vld [vmem:[%s5209_s6 + $0x84] sm:$0xf0]  ;;  %v3630_v49 = vld [vmem:[%s5209_s6 + $0x80] sm:$0xf]  ;;  %v4127_v50 = vld [vmem:[%s5209_s6 + $0x88] sm:$0xf0] }
 0x1aa   : > { %v4405_v12 = vpop.eup %4404  ;;  %v3627_v51 = vor.u32 %v4125_v46, %v3624_v48  ;;  %v3631_v52 = vor.u32 %v4127_v50, %v3630_v49  ;;  %v3610_v53 = vld [vmem:[%s5209_s6 + $0x60] sm:$0xf]  ;;  %v4123_v54 = vld [vmem:[%s5209_s6 + $0x68] sm:$0xf0]  ;;  %v4122_v55 = vld [vmem:[%s5209_s6 + $0x64] sm:$0xf] }
 0x1ab   : > { %v874_v13 = vmul.f32 128.0, %v4405_v12  ;;  %vm878_vm13 = vweird.f32 %v4405_v12  ;;  %1084 = vmatpush.bf16.msra.mxu0 %v3635_v38  ;;  %v3611_v56 = vor.u32 %v4123_v54, %v3610_v53  ;;  %v3612_v57 = vld [vmem:[%s5209_s6 + $0x6c] sm:$0xf0]  ;;  %v3618_v58 = vld [vmem:[%s5209_s6 + $0x68] sm:$0xf]  ;;  %s4891_s9 = smov 32  }
 0x1ac   : > { %871 = vadd.xlane.f32.xlu0 %v5290_v10  ;;  %1098 = vmatpush.bf16.msra.mxu1 %v3639_v42  ;;  %v4124_v59 = vld [vmem:[%s5209_s6 + $0x70] sm:$0xf0]  ;;  %v3615_v60 = vor.u32 %v4122_v55, %v3612_v57  ;;  %v3598_v62 = vld [vmem:[%s5209_s6 + $0x48] sm:$0xf]  ;;  %v4119_v0 = vld [vmem:[%s5209_s6 + $0x4c] sm:$0xf] }
 0x1ad   : > { %v875_v14 = vsub.f32 1.0, %v874_v13  ;;  %1112 = vmatpush.bf16.msra.mxu2 %v3643_v43  ;;  %v3619_v61 = vor.u32 %v4124_v59, %v3618_v58  ;;  %v4120_v63 = vld [vmem:[%s5209_s6 + $0x50] sm:$0xf0]  ;;  %v3600_v2 = vld [vmem:[%s5209_s6 + $0x54] sm:$0xf0]  ;;  %s4892_s21 = smov 64  }
 0x1ae   : > { %v3599_v1 = vor.u32 %v4120_v63, %v3598_v62  ;;  %v3606_v3 = vld [vmem:[%s5209_s6 + $0x50] sm:$0xf]  ;;  %v4121_v4 = vld [vmem:[%s5209_s6 + $0x58] sm:$0xf0]  ;;  %v3603_v5 = vor.u32 %v4119_v0, %v3600_v2  ;;  %v4116_v11 = vld [vmem:[%s5209_s6 + $0x34] sm:$0xf] }
 0x1af   : > { %v876_v15 = vmul.f32 %v4405_v12, %v875_v14  ;;  %1085 = vmatpush.bf16.msra.mxu0 %v3623_v47  ;;  %v3607_v6 = vor.u32 %v4121_v4, %v3606_v3  ;;  %v3586_v7 = vld [vmem:[%s5209_s6 + $0x30] sm:$0xf]  ;;  %v4117_v8 = vld [vmem:[%s5209_s6 + $0x38] sm:$0xf0]  ;;  %v3588_v13 = vld [vmem:[%s5209_s6 + $0x3c] sm:$0xf0] }
 0x1b0   : > { %1099 = vmatpush.bf16.msra.mxu1 %v3627_v51  ;;  %v3594_v14 = vld [vmem:[%s5209_s6 + $0x38] sm:$0xf]  ;;  %v3582_v26 = vld [vmem:[%s5209_s6 + $0x20] sm:$0xf]  ;;  %v4115_v27 = vld [vmem:[%s5209_s6 + $0x28] sm:$0xf0] }
 0x1b1   : > { %v877_v16 = vadd.f32 %v4405_v12, %v876_v15  ;;  %1113 = vmatpush.bf16.msra.mxu2 %v3631_v52  ;;  %v4118_v15 = vld [vmem:[%s5209_s6 + $0x40] sm:$0xf0]  ;;  %v3583_v29 = vor.u32 %v4115_v27, %v3582_v26  ;;  %v3562_v30 = vld [vmem:[%s5209_s6] sm:$0xf]  ;;  %v4111_v31 = vld [vmem:[%s5209_s6 + $0x8] sm:$0xf0] }
 0x1b2   : > { %v4110_v32 = vld [vmem:[%s5209_s6 + $0x4] sm:$0xf]  ;;  %v3563_v34 = vor.u32 %v4111_v31, %v3562_v30  ;;  %v3564_v35 = vld [vmem:[%s5209_s6 + $0xc] sm:$0xf0]  ;;  %v3570_v36 = vld [vmem:[%s5209_s6 + $0x8] sm:$0xf] }
 0x1b3   : > { %v5293_v17 = vsel %vm878_vm13, %v4405_v12, %v877_v16  ;;  %1086 = vmatpush.bf16.msra.mxu0 %v3611_v56  ;;  %v3587_v12 = vor.u32 %v4117_v8, %v3586_v7  ;;  %v3591_v16 = vor.u32 %v4116_v11, %v3588_v13  ;;  %v4112_v37 = vld [vmem:[%s5209_s6 + $0x10] sm:$0xf0]  ;;  %v3567_v39 = vor.u32 %v4110_v32, %v3564_v35 }
 0x1b4   : > { %1100 = vmatpush.bf16.msra.mxu1 %v3615_v60  ;;  %v3571_v40 = vor.u32 %v4112_v37, %v3570_v36  ;;  %v5358_v56 = vld [vmem:[%s5252_s2] sm:$0xff]  ;;  %vm1286_vm6 = vcmask 523520   ;;  %vm1366_vm7 = vcmask 785920   ;;  %vm1446_vm8 = vcmask 1048320  }
 0x1b5   : > { %1114 = vmatpush.bf16.msra.mxu2 %v3619_v61  ;;  %v916_v59 = vperm.slane %v5358_v56, 0  ;;  %v919_v0 = vperm.slane %v5358_v56, 1 }
 0x1b7   : > { %1087 = vmatpush.bf16.msra.mxu0 %v3599_v1 }
 0x1b8   : > { %1101 = vmatpush.bf16.msra.mxu1 %v3603_v5 }
 0x1b9   : > { %1115 = vmatpush.bf16.msra.mxu2 %v3607_v6 }
 0x1bb   : > { %1088 = vmatpush.bf16.msra.mxu0 %v3587_v12 }
 0x1bc   : > { %1102 = vmatpush.bf16.msra.mxu1 %v3591_v16 }
 0x217   : > { %v870_v18 = vpop.xlane.xlu0 %869 }
 0x218   : > { %v880_v19 = vmul.f32 %v5293_v17, %v870_v18  ;;  %v3595_v18 = vor.u32 %v4118_v15, %v3594_v14 }
 0x21a   : > { %v5297_v20 = vsub.f32 %v5286_v9, %v880_v19  ;;  %1116 = vmatpush.bf16.msra.mxu2 %v3595_v18  ;;  %v3574_v19 = vld [vmem:[%s5209_s6 + $0x18] sm:$0xf] }
 0x21c   : > { %v884_v21 = vmul.f32 %v5297_v20, %v5297_v20 }
 0x21e   : > { %886 = vadd.xlane.f32.xlu1 %v884_v21  ;;  %v4114_v21 = vld [vmem:[%s5209_s6 + $0x20] sm:$0xf0]  ;;  %1117 = vmatpush.bf16.msra.mxu2 %v3583_v29 }
 0x21f   : > { %v872_v22 = vpop.xlane.xlu0 %871 }
 0x220   : > { %v881_v23 = vmul.f32 %v5293_v17, %v872_v22  ;;  %v4113_v22 = vld [vmem:[%s5209_s6 + $0x1c] sm:$0xf] }
 0x222   : > { %v5303_v24 = vsub.f32 %v5290_v10, %v881_v23  ;;  %v3575_v23 = vor.u32 %v4114_v21, %v3574_v19  ;;  %1118 = vmatpush.bf16.msra.mxu2 %v3571_v40 }
 0x224   : > { %v885_v25 = vmul.f32 %v5303_v24, %v5303_v24  ;;  %1089 = vmatpush.bf16.msra.mxu0 %v3575_v23 }
 0x226   : > { %888 = vadd.xlane.f32.xlu1 %v885_v25  ;;  %v3576_v25 = vld [vmem:[%s5209_s6 + $0x24] sm:$0xf0] }
 0x227   : > { %v3579_v28 = vor.u32 %v4113_v22, %v3576_v25 }
 0x228   : > { %1090 = vmatpush.bf16.msra.mxu0 %v3563_v34 }
 0x229   : > { %1103 = vmatpush.bf16.msra.mxu1 %v3579_v28 }
 0x22d   : > { %1104 = vmatpush.bf16.msra.mxu1 %v3567_v39 }
 0x291   : > { %v887_v33 = vpop.xlane.xlu1 %886 }
 0x292   : > { %v890_v38 = vmul.f32 %v887_v33, %v5293_v17 }
 0x294   : > { %v892_v41 = vadd.f32 1e-05, %v890_v38 }
 0x296   : > { %4406 = vrsqrt.f32 %v892_v41  ;;  %vm900_vm15 = vweird.f32 %v892_v41 }
 0x299   : > { %v889_v42 = vpop.xlane.xlu1 %888 }
 0x29a   : > { %v891_v43 = vmul.f32 %v889_v42, %v5293_v17 }
 0x29c   : > { %v4407_v44 = vpop.eup %4406  ;;  %v893_v45 = vadd.f32 1e-05, %v891_v43 }
 0x29d   : > { %v895_v46 = vmul.f32 %v4407_v44, %v892_v41  ;;  %vm901_vm14 = vweird.f32 %v4407_v44 }
 0x29e   : > { %4408 = vrsqrt.f32 %v893_v45  ;;  %vm902_vm0 = vmor %vm900_vm15, %vm901_vm14  ;;  %vm910_vm2 = vweird.f32 %v893_v45 }
 0x29f   : > { %v896_v47 = vmul.f32 %v4407_v44, %v895_v46 }
 0x2a1   : > { %v897_v48 = vmul.f32 0.5, %v896_v47 }
 0x2a3   : > { %v898_v49 = vsub.f32 1.5, %v897_v48 }
 0x2a4   : > { %v4409_v50 = vpop.eup %4408 }
 0x2a5   : > { %v899_v51 = vmul.f32 %v4407_v44, %v898_v49  ;;  %v905_v52 = vmul.f32 %v4409_v50, %v893_v45  ;;  %vm911_vm1 = vweird.f32 %v4409_v50 }
 0x2a6   : > { %vm912_vm3 = vmor %vm910_vm2, %vm911_vm1 }
 0x2a7   : > { %v906_v53 = vmul.f32 %v4409_v50, %v905_v52  ;;  %v903_v54 = vsel %vm902_vm0, %v4407_v44, %v899_v51 }
 0x2a8   : > { %v914_v58 = vmul.f32 %v903_v54, %v5297_v20 }
 0x2a9   : > { %v907_v55 = vmul.f32 0.5, %v906_v53 }
 0x2aa   : > { %v917_v63 = vmul.f32 %v916_v59, %v914_v58 }
 0x2ab   : > { %v908_v57 = vsub.f32 1.5, %v907_v55 }
 0x2ac   : > { %v920_v2 = vadd.f32 %v919_v0, %v917_v63 }
 0x2ad   : > { %v909_v60 = vmul.f32 %v4409_v50, %v908_v57 }
 0x2af   : > { %v913_v61 = vsel %vm912_vm3, %v4409_v50, %v909_v60 }
 0x2b0   : > { %v915_v62 = vmul.f32 %v913_v61, %v5303_v24 }
 0x2b2   : > { %v918_v1 = vmul.f32 %v916_v59, %v915_v62 }
 0x2b4   : > { %v921_v3 = vadd.f32 %v919_v0, %v918_v1 }
 0x2b6   : > { %v922_v4 = vpack.c.bf16 %v921_v3, %v920_v2 }
 0x2b8   : > { %1091 = vmatmul.bf16.vlgmr.msra.gmra.mxu0 %v922_v4  ;;  %1105 = vmatmul.bf16.vlgmr.msra.gmra.mxu1 %v922_v4 }
 0x2b9   : > { %1119 = vmatmul.bf16.vlgmr.msra.gmra.mxu2 %v922_v4 }
 0x335   : > { %v1092_v5 = vpop.f32.mrf.mxu0  ;;  %v1106_v20 = vpop.f32.mrf.mxu1 }
 0x336   : > { %v1125_v6 = vpack.c.bf16 %v1106_v20, %v1092_v5 }
 0x338   : > { %v1134_v13 = vunpack.c.h.b16 %v1125_v6  ;;  %v1131_v25 = vunpack.c.l.b16 %v1125_v6 }
 0x33c   : > { %v1120_v7 = vpop.f32.mrf.mxu2 }
 0x33d   : > { %v1094_v8 = vpop.f32.mrf.mxu0  ;;  %v1108_v11 = vpop.f32.mrf.mxu1  ;;  %v1126_v15 = vpack.c.bf16 %v1120_v7, %v1120_v7 }
 0x33e   : > { %v1127_v12 = vpack.c.bf16 %v1108_v11, %v1094_v8 }
 0x33f   : > { %v1186_v22 = vunpack.c.l.b16 %v1126_v15 }
 0x340   : > { %v1135_v14 = vunpack.c.h.b16 %v1127_v12  ;;  %v1132_v21 = vunpack.c.l.b16 %v1127_v12 }
 0x342   : > { %v1136_v24 = vpack.c.b16 %v1135_v14, %v1134_v13  ;;  %v1133_v27 = vpack.c.b16 %v1132_v21, %v1131_v25 }
 0x344   : > { %v1122_v16 = vpop.f32.mrf.mxu2  ;;  %v1142_v18 = vsel %vm1137_vm4, %v1136_v24, 0 }
 0x345   : > { %v1128_v19 = vpack.c.bf16 %v1122_v16, %v1122_v16  ;;  %1151 = vmatpush.bf16.xpose.msrb.mxu0 %v1142_v18 }
 0x347   : > { %v1187_v23 = vunpack.c.l.b16 %v1128_v19 }
 0x349   : > { %v5365_v26 = vpack.c.b16 %v1187_v23, %v1186_v22 }
 0x34b   : > { %1200 = vmatpush.bf16.msra.mxu3 %v5365_v26 }
 0x34c   : > { %3656 = vmatmul.msk.bf16.vlgmr.msrb.gmra.mxu0 %vm1137_vm4, %v1133_v27 }
 0x3c9   : > { %v1153_v28 = vpop.f32.mrf.mxu0 }
 0x3ca   : > { %v1158_v29 = vmul.f32 0.17677669, %v1153_v28 }
 0x3cc   : > { %v1161_v30 = vsel %vm1160_vm5, %v1158_v29, -inf }
 0x3cd   : > { %1162 = vmax.xlane.f32.xlu2 %v1161_v30 }
 0x3d1   : > { %v1155_v31 = vpop.f32.mrf.mxu0 }
 0x3d2   : > { %v1159_v32 = vmul.f32 0.17677669, %v1155_v31 }
 0x3d4   : > { %v1164_v33 = vsel %vm1160_vm5, %v1159_v32, -inf }
 0x3d5   : > { %1165 = vmax.xlane.f32.xlu2 %v1164_v33 }
 0x3ed   : > { %1211 = vrot.lane.b32.xlu2 %v1136_v24, %s4890_s7 }
 0x3f5   : > { %1371 = vrot.lane.b32.xlu2 %v1136_v24, %s4891_s9 }
 0x3fd   : > { %1369 = vrot.lane.b32.xlu2 %v1133_v27, %s4891_s9 }
 0x440   : > { %v1163_v34 = vpop.xlane.xlu2 %1162 }
 0x441   : > { %v1167_v35 = vsub.f32 %v1158_v29, %v1163_v34 }
 0x443   : > { %v1169_v36 = vmul.f32 1.442695, %v1167_v35 }
 0x445   : > { %4410 = vpow2.f32 %v1169_v36 }
 0x448   : > { %v1166_v37 = vpop.xlane.xlu2 %1165 }
 0x449   : > { %v1168_v38 = vsub.f32 %v1159_v32, %v1166_v37 }
 0x44b   : > { %v4411_v39 = vpop.eup %4410  ;;  %v1171_v40 = vmul.f32 1.442695, %v1168_v38 }
 0x44c   : > { %v1173_v41 = vsel %vm1160_vm5, %v4411_v39, 0.0 }
 0x44d   : > { %4412 = vpow2.f32 %v1171_v40  ;;  %1174 = vadd.xlane.f32.xlu0 %v1173_v41 }
 0x450   : > { %v1212_v42 = vpop.permute.xlu2 %1211 }
 0x451   : > { %v1217_v43 = vsel %vm1137_vm4, %v1212_v42, 0 }
 0x452   : > { %1226 = vmatpush.bf16.xpose.msrb.mxu3 %v1217_v43 }
 0x453   : > { %v4413_v44 = vpop.eup %4412 }
 0x454   : > { %v1176_v45 = vsel %vm1160_vm5, %v4413_v44, 0.0 }
 0x455   : > { %1177 = vadd.xlane.f32.xlu1 %v1176_v45 }
 0x458   : > { %v1372_v52 = vpop.permute.xlu2 %1371 }
 0x459   : > { %v1377_v54 = vsel %vm1137_vm4, %v1372_v52, 0 }
 0x460   : > { %v1370_v60 = vpop.permute.xlu2 %1369 }
 0x461   : > { %1209 = vrot.lane.b32.xlu0 %v1133_v27, %s4890_s7 }
 0x469   : > { %1289 = vrot.lane.b32.xlu0 %v1133_v27, %s4892_s21 }
 0x46e   : > { %1291 = vrot.lane.b32.xlu1 %v1136_v24, %s4892_s21 }
 0x4c0   : > { %v1175_v46 = vpop.xlane.xlu0 %1174 }
 0x4c1   : > { %4414 = vrcp.f32 %v1175_v46 }
 0x4c7   : > { %v4415_v48 = vpop.eup %4414 }
 0x4c8   : > { %v1178_v47 = vpop.xlane.xlu1 %1177  ;;  %v1181_v50 = vmul.f32 %v4415_v48, %v4411_v39 }
 0x4c9   : > { %4416 = vrcp.f32 %v1178_v47 }
 0x4cf   : > { %v4417_v49 = vpop.eup %4416 }
 0x4d0   : > { %v1182_v51 = vmul.f32 %v4417_v49, %v4413_v44 }
 0x4d2   : > { %v1183_v53 = vpack.c.bf16 %v1182_v51, %v1181_v50 }
 0x4d3   : > { %v1210_v55 = vpop.permute.xlu0 %1209 }
 0x4d4   : > { %3657 = vmatmul.msk.bf16.vlgmr.msra.gmra.mxu3 %vm1160_vm5, %v1183_v53 }
 0x4d5   : > { %1386 = vmatpush.bf16.xpose.msra.mxu3 %v1377_v54 }
 0x4db   : > { %v1290_v59 = vpop.permute.xlu0 %1289 }
 0x4e0   : > { %v1292_v57 = vpop.permute.xlu1 %1291 }
 0x4e1   : > { %v1297_v58 = vsel %vm1137_vm4, %v1292_v57, 0 }
 0x4e2   : > { %1306 = vmatpush.bf16.xpose.msrb.mxu1 %v1297_v58 }
 0x4e4   : > { %3658 = vmatmul.msk.bf16.vlgmr.msrb.gmra.mxu3 %vm1137_vm4, %v1210_v55 }
 0x4e9   : > { %3660 = vmatmul.msk.bf16.vlgmr.msrb.gmra.mxu1 %vm1137_vm4, %v1290_v59 }
 0x4f4   : > { %3662 = vmatmul.msk.bf16.vlgmr.msra.gmra.mxu3 %vm1137_vm4, %v1370_v60 }
 0x557   : > { %v1202_v61 = vpop.f32.mrf.mxu3 }
 0x558   : > { %1207 = vst.msk [vmem:[#allocation3] sm:$0xff] %vm1137_vm4, %v1202_v61 }
 0x55f   : > { %v1204_v62 = vpop.f32.mrf.mxu3 }
 0x560   : > { %1208 = vst.msk [vmem:[#allocation3 + $0x8] sm:$0xff] %vm1137_vm4, %v1204_v62 }
 0x566   : > { %v1308_v63 = vpop.f32.mrf.mxu1 }
 0x567   : > { %v1313_v0 = vmul.f32 0.17677669, %v1308_v63  ;;  %v1228_v1 = vpop.f32.mrf.mxu3 }
 0x568   : > { %v1233_v2 = vmul.f32 0.17677669, %v1228_v1 }
 0x569   : > { %v1315_v3 = vsel %vm1160_vm5, %v1313_v0, -inf }
 0x56a   : > { %1316 = vmax.xlane.f32.xlu2 %v1315_v3  ;;  %v1235_v4 = vsel %vm1160_vm5, %v1233_v2, -inf }
 0x56b   : > { %1236 = vmax.xlane.f32.xlu1 %v1235_v4 }
 0x56e   : > { %v1310_v5 = vpop.f32.mrf.mxu1 }
 0x56f   : > { %v1314_v20 = vmul.f32 0.17677669, %v1310_v5  ;;  %v1230_v6 = vpop.f32.mrf.mxu3 }
 0x570   : > { %v1234_v7 = vmul.f32 0.17677669, %v1230_v6 }
 0x571   : > { %v1318_v8 = vsel %vm1160_vm5, %v1314_v20, -inf }
 0x572   : > { %v1238_v11 = vsel %vm1160_vm5, %v1234_v7, -inf }
 0x573   : > { %1319 = vmax.xlane.f32.xlu1 %v1318_v8  ;;  %1239 = vmax.xlane.f32.xlu0 %v1238_v11 }
 0x577   : > { %v1388_v12 = vpop.f32.mrf.mxu3 }
 0x578   : > { %v1393_v13 = vmul.f32 0.17677669, %v1388_v12 }
 0x57a   : > { %v1395_v14 = vsel %vm1160_vm5, %v1393_v13, -inf }
 0x57b   : > { %1396 = vmax.xlane.f32.xlu0 %v1395_v14 }
 0x57f   : > { %v1390_v24 = vpop.f32.mrf.mxu3 }
 0x580   : > { %v1394_v15 = vmul.f32 0.17677669, %v1390_v24 }
 0x582   : > { %v1398_v16 = vsel %vm1160_vm5, %v1394_v15, -inf }
 0x583   : > { %1399 = vmax.xlane.f32.xlu2 %v1398_v16 }
 0x59b   : > { %1258 = vrot.lane.b32.xlu2 %v5365_v26, %s4890_s7 }
 0x5dd   : > { %v1317_v18 = vpop.xlane.xlu2 %1316 }
 0x5de   : > { %v1321_v19 = vsub.f32 %v1313_v0, %v1317_v18  ;;  %v1237_v21 = vpop.xlane.xlu1 %1236  ;;  %v4141_v18 = vld [vmem:[%s5215_s16 + $0x38] sm:$0xff] }
 0x5df   : > { %v1241_v23 = vsub.f32 %v1233_v2, %v1237_v21  ;;  %1516 = vmatpush.bf16.msra.mxu1 %v4141_v18  ;;  %v4139_v21 = vld [vmem:[%s5215_s16 + $0x28] sm:$0xff] }
 0x5e0   : > { %v1323_v22 = vmul.f32 1.442695, %v1321_v19  ;;  %v4140_v19 = vld [vmem:[%s5215_s16 + $0x30] sm:$0xff] }
 0x5e1   : > { %v1243_v25 = vmul.f32 1.442695, %v1241_v23  ;;  %v4137_v23 = vld [vmem:[%s5215_s16 + $0x18] sm:$0xff] }
 0x5e2   : > { %4418 = vpow2.f32 %v1323_v22  ;;  %v4138_v22 = vld [vmem:[%s5215_s16 + $0x20] sm:$0xff] }
 0x5e3   : > { %4420 = vpow2.f32 %v1243_v25  ;;  %1517 = vmatpush.bf16.msra.mxu1 %v4140_v19  ;;  %v1582_v19 = vld [vmem:[#allocation2 + $0x10] sm:$0xff] }
 0x5e6   : > { %v1320_v27 = vpop.xlane.xlu1 %1319  ;;  %v1240_v28 = vpop.xlane.xlu0 %1239 }
 0x5e7   : > { %v1322_v29 = vsub.f32 %v1314_v20, %v1320_v27  ;;  %v1242_v32 = vsub.f32 %v1234_v7, %v1240_v28  ;;  %1518 = vmatpush.bf16.msra.mxu1 %v4139_v21  ;;  %v4136_v27 = vld [vmem:[%s5215_s16 + $0x10] sm:$0xff]  ;;  %v4135_v28 = vld [vmem:[%s5215_s16 + $0x8] sm:$0xff] }
 0x5e8   : > { %v4419_v30 = vpop.eup %4418  ;;  %v1583_v21 = vld [vmem:[#allocation2] sm:$0xff] }
 0x5e9   : > { %v1325_v31 = vmul.f32 1.442695, %v1322_v29  ;;  %v1327_v33 = vsel %vm1160_vm5, %v4419_v30, 0.0  ;;  %v1245_v34 = vmul.f32 1.442695, %v1242_v32  ;;  %v4421_v35 = vpop.eup %4420  ;;  %v4134_v29 = vld [vmem:[%s5215_s16] sm:$0xff] }
 0x5ea   : > { %1328 = vadd.xlane.f32.xlu1 %v1327_v33  ;;  %v1247_v40 = vsel %vm1160_vm5, %v4421_v35, 0.0  ;;  %s6264_s16 = sld [smem:[#allocation53_spill]] }
 0x5eb   : > { %4422 = vpow2.f32 %v1325_v31  ;;  %1519 = vmatpush.bf16.msra.mxu1 %v4138_v22 }
 0x5ec   : > { %4424 = vpow2.f32 %v1245_v34 }
 0x5ee   : > { %v1397_v36 = vpop.xlane.xlu0 %1396 }
 0x5ef   : > { %v1401_v37 = vsub.f32 %v1393_v13, %v1397_v36  ;;  %1520 = vmatpush.bf16.msra.mxu1 %v4137_v23  ;;  %v3738_v23 = vld [vmem:[%s5223_s12 + $0x10] sm:$0xf] }
 0x5f0   : > { %s4760_s15 = scalar_lea.hbm %s6264_s16, 32 }
 0x5f1   : > { %v4423_v38 = vpop.eup %4422  ;;  %v1403_v39 = vmul.f32 1.442695, %v1401_v37 }
 0x5f2   : > { %1248 = vadd.xlane.f32.xlu1 %v1247_v40  ;;  %v1330_v41 = vsel %vm1160_vm5, %v4423_v38, 0.0  ;;  %v4425_v43 = vpop.eup %4424 }
 0x5f3   : > { %4426 = vpow2.f32 %v1403_v39  ;;  %1331 = vadd.xlane.f32.xlu0 %v1330_v41  ;;  %v1250_v47 = vsel %vm1160_vm5, %v4425_v43, 0.0  ;;  %1521 = vmatpush.bf16.msra.mxu1 %v4136_v27 }
 0x5f6   : > { %v1400_v42 = vpop.xlane.xlu2 %1399 }
 0x5f7   : > { %v1402_v44 = vsub.f32 %v1394_v15, %v1400_v42  ;;  %1522 = vmatpush.bf16.msra.mxu1 %v4135_v28  ;;  %v4152_v28 = vld [vmem:[%s5223_s12 + $0x14] sm:$0xf] }
 0x5f9   : > { %v4427_v45 = vpop.eup %4426  ;;  %v1405_v46 = vmul.f32 1.442695, %v1402_v44 }
 0x5fa   : > { %v1407_v48 = vsel %vm1160_vm5, %v4427_v45, 0.0 }
 0x5fb   : > { %4428 = vpow2.f32 %v1405_v46  ;;  %1251 = vadd.xlane.f32.xlu0 %v1250_v47  ;;  %1408 = vadd.xlane.f32.xlu1 %v1407_v48  ;;  %v3786_v46 = vld [vmem:[%s5223_s12 + $0x70] sm:$0xf]  ;;  %v4165_v47 = vld [vmem:[%s5223_s12 + $0x74] sm:$0xf0]  ;;  %v3778_v48 = vld [vmem:[%s5223_s12 + $0x60] sm:$0xf] }
 0x5fc   : > { %1523 = vmatpush.bf16.msra.mxu1 %v4134_v29  ;;  %v3740_v29 = vld [vmem:[%s5223_s12 + $0x18] sm:$0xf0] }
 0x5fe   : > { %v1259_v49 = vpop.permute.xlu2 %1258 }
 0x5ff   : > { %1271 = vmatpush.bf16.msra.mxu0 %v1259_v49  ;;  %v4163_v49 = vld [vmem:[%s5223_s12 + $0x64] sm:$0xf0] }
 0x601   : > { %v4429_v50 = vpop.eup %4428 }
 0x602   : > { %v1410_v51 = vsel %vm1160_vm5, %v4429_v50, 0.0 }
 0x603   : > { %1411 = vadd.xlane.f32.xlu0 %v1410_v51  ;;  %v3788_v51 = vld [vmem:[%s5223_s12 + $0x78] sm:$0xf0] }
 0x614   : > { %1338 = vrot.lane.b32.xlu1 %v5365_v26, %s4892_s21 }
 0x617   : > { %1418 = vrot.lane.b32.xlu0 %v5365_v26, %s4891_s9 }
 0x65d   : > { %v1329_v52 = vpop.xlane.xlu1 %1328 }
 0x665   : > { %v1249_v54 = vpop.xlane.xlu1 %1248 }
 0x666   : > { %v1332_v53 = vpop.xlane.xlu0 %1331  ;;  %4430 = vrcp.f32 %v1249_v54  ;;  %v3780_v54 = vld [vmem:[%s5223_s12 + $0x68] sm:$0xf0] }
 0x66c   : > { %v4431_v57 = vpop.eup %4430 }
 0x66d   : > { %v1255_v59 = vmul.f32 %v4431_v57, %v4421_v35  ;;  %v4161_v57 = vld [vmem:[%s5223_s12 + $0x54] sm:$0xf0] }
 0x66e   : > { %v1252_v55 = vpop.xlane.xlu0 %1251  ;;  %v1409_v63 = vpop.xlane.xlu1 %1408 }
 0x66f   : > { %4432 = vrcp.f32 %v1252_v55  ;;  %v3770_v55 = vld [vmem:[%s5223_s12 + $0x50] sm:$0xf] }
 0x670   : > { %4434 = vrcp.f32 %v1332_v53  ;;  %v4162_v53 = vld [vmem:[%s5223_s12 + $0x64] sm:$0xf] }
 0x671   : > { %4436 = vrcp.f32 %v1329_v52 }
 0x675   : > { %v4433_v58 = vpop.eup %4432 }
 0x676   : > { %v1256_v60 = vmul.f32 %v4433_v58, %v4425_v43  ;;  %v1412_v62 = vpop.xlane.xlu0 %1411  ;;  %v4435_v26 = vpop.eup %4434  ;;  %v3783_v58 = vor.u32 %v4162_v53, %v3780_v54 }
 0x677   : > { %4438 = vrcp.f32 %v1412_v62  ;;  %v4437_v0 = vpop.eup %4436  ;;  %v1336_v2 = vmul.f32 %v4435_v26, %v4423_v38  ;;  %v5430_v38 = vld [vmem:[%s5252_s2 + $0x8] sm:$0x7]  ;;  %v3762_v62 = vld [vmem:[%s5223_s12 + $0x40] sm:$0xf] }
 0x678   : > { %v1257_v61 = vpack.c.bf16 %v1256_v60, %v1255_v59  ;;  %4440 = vrcp.f32 %v1409_v63  ;;  %v1335_v4 = vmul.f32 %v4437_v0, %v4419_v30  ;;  %v1532_v39 = vperm.slane %v5430_v38, 0  ;;  %v4160_v59 = vld [vmem:[%s5223_s12 + $0x54] sm:$0xf]  ;;  %v3772_v60 = vld [vmem:[%s5223_s12 + $0x58] sm:$0xf0] }
 0x679   : > { %v4159_v63 = vld [vmem:[%s5223_s12 + $0x44] sm:$0xf0]  ;;  %v3775_v26 = vor.u32 %v4160_v59, %v3772_v60  ;;  %v4158_v0 = vld [vmem:[%s5223_s12 + $0x44] sm:$0xf]  ;;  %v4148_v59 = vld [vmem:[%s5217_s22 + $0x30] sm:$0xff] }
 0x67a   : > { %3659 = vmatmul.msk.bf16.vlgmr.msra.gmra.mxu0 %vm1160_vm5, %v1257_v61  ;;  %v1337_v6 = vpack.c.bf16 %v1336_v2, %v1335_v4  ;;  %v3771_v61 = vor.u32 %v4161_v57, %v3770_v55  ;;  %v3763_v2 = vor.u32 %v4159_v63, %v3762_v62  ;;  %v4157_v4 = vld [vmem:[%s5223_s12 + $0x34] sm:$0xf0]  ;;  %v4147_v60 = vld [vmem:[%s5217_s22 + $0x28] sm:$0xff]  ;;  %v4144_v63 = vld [vmem:[%s5217_s22 + $0x10] sm:$0xff] }
 0x67b   : > { %v4145_v62 = vld [vmem:[%s5217_s22 + $0x18] sm:$0xff] }
 0x67d   : > { %v4439_v1 = vpop.eup %4438 }
 0x67e   : > { %v4441_v3 = vpop.eup %4440  ;;  %v1416_v20 = vmul.f32 %v4439_v1, %v4429_v50  ;;  %v4164_v50 = vld [vmem:[%s5223_s12 + $0x74] sm:$0xf]  ;;  %v3764_v1 = vld [vmem:[%s5223_s12 + $0x48] sm:$0xf0] }
 0x67f   : > { %v1415_v7 = vmul.f32 %v4441_v3, %v4427_v45  ;;  %v3791_v52 = vor.u32 %v4164_v50, %v3788_v51  ;;  %v3754_v3 = vld [vmem:[%s5223_s12 + $0x30] sm:$0xf]  ;;  %v1584_v51 = vld [vmem:[#allocation2 + $0x18] sm:$0xff] }
 0x681   : > { %v1417_v11 = vpack.c.bf16 %v1416_v20, %v1415_v7  ;;  %v4156_v20 = vld [vmem:[%s5223_s12 + $0x34] sm:$0xf]  ;;  %v3755_v7 = vor.u32 %v4157_v4, %v3754_v3 }
 0x686   : > { %v1339_v5 = vpop.permute.xlu1 %1338 }
 0x687   : > { %1351 = vmatpush.bf16.msrb.mxu2 %v1339_v5  ;;  %v3767_v5 = vor.u32 %v4158_v0, %v3764_v1 }
 0x689   : > { %v1419_v8 = vpop.permute.xlu0 %1418 }
 0x68a   : > { %3661 = vmatmul.msk.bf16.vlgmr.msrb.gmra.mxu2 %vm1160_vm5, %v1337_v6  ;;  %1431 = vmatpush.bf16.msrb.mxu0 %v1419_v8  ;;  %v3756_v6 = vld [vmem:[%s5223_s12 + $0x38] sm:$0xf0]  ;;  %v3746_v8 = vld [vmem:[%s5223_s12 + $0x20] sm:$0xf] }
 0x68d   : > { %3663 = vmatmul.msk.bf16.vlgmr.msrb.gmra.mxu0 %vm1160_vm5, %v1417_v11  ;;  %v4155_v11 = vld [vmem:[%s5223_s12 + $0x24] sm:$0xf0] }
 0x68e   : > { %1793 = vmatpush.bf16.msra.mxu0 %v3791_v52  ;;  %v3747_v18 = vor.u32 %v4155_v11, %v3746_v8  ;;  %v1585_v52 = vld [vmem:[#allocation2 + $0x8] sm:$0xff] }
 0x692   : > { %1794 = vmatpush.bf16.msra.mxu0 %v3783_v58  ;;  %v4149_v58 = vld [vmem:[%s5217_s22 + $0x38] sm:$0xff] }
 0x693   : > { %1662 = vmatpush.bf16.msra.mxu2 %v4149_v58 }
 0x696   : > { %1795 = vmatpush.bf16.msra.mxu0 %v3775_v26  ;;  %v4143_v26 = vld [vmem:[%s5217_s22 + $0x8] sm:$0xff] }
 0x697   : > { %1663 = vmatpush.bf16.msra.mxu2 %v4148_v59 }
 0x69a   : > { %1796 = vmatpush.bf16.msra.mxu0 %v3767_v5 }
 0x69b   : > { %1664 = vmatpush.bf16.msra.mxu2 %v4147_v60 }
 0x6f7   : > { %v1273_v12 = vpop.f32.mrf.mxu0 }
 0x6ff   : > { %v1275_v13 = vpop.f32.mrf.mxu0 }
 0x70a   : > { %v1433_v14 = vpop.f32.mrf.mxu0 }
 0x70b   : > { %1440 = vrot.lane.b32.xlu1 %v1433_v14, %s4890_s7  ;;  %v4154_v14 = vld [vmem:[%s5223_s12 + $0x24] sm:$0xf] }
 0x70d   : > { %v1353_v24 = vpop.f32.mrf.mxu2 }
 0x70e   : > { %1360 = vrot.lane.b32.xlu2 %v1353_v24, %s4892_s21  ;;  %v3748_v24 = vld [vmem:[%s5223_s12 + $0x28] sm:$0xf0] }
 0x70f   : > { %v3751_v27 = vor.u32 %v4154_v14, %v3748_v24 }
 0x712   : > { %v1435_v16 = vpop.f32.mrf.mxu0 }
 0x715   : > { %v1355_v15 = vpop.f32.mrf.mxu2 }
 0x716   : > { %1362 = vrot.lane.b32.xlu0 %v1355_v15, %s4892_s21  ;;  %1280 = vrot.lane.b32.xlu2 %v1273_v12, %s4891_s9  ;;  %v3759_v12 = vor.u32 %v4156_v20, %v3756_v6 }
 0x718   : > { %1797 = vmatpush.bf16.msra.mxu0 %v3759_v12 }
 0x71c   : > { %1798 = vmatpush.bf16.msra.mxu0 %v3751_v27  ;;  %v1575_v27 = vperm.slane %v5358_v56, 2 }
 0x71e   : > { %1282 = vrot.lane.b32.xlu2 %v1275_v13, %s4891_s9 }
 0x726   : > { %1442 = vrot.lane.b32.xlu2 %v1435_v16, %s4890_s7  ;;  %v1586_v16 = vperm.slane %v5358_v56, 4 }
 0x728   : > { %v1589_v53 = vmul.f32 %v1586_v16, %v1584_v51 }
 0x768   : > { %v1361_v25 = vpop.permute.xlu2 %1360 }
 0x770   : > { %v1281_v30 = vpop.permute.xlu2 %1280 }
 0x771   : > { %1287 = vst.msk [vmem:[#allocation3] sm:$0xff] %vm1286_vm6, %v1281_v30 }
 0x772   : > { %1367 = vst.msk [vmem:[#allocation3] sm:$0xff] %vm1366_vm7, %v1361_v25  ;;  %v4153_v25 = vld [vmem:[%s5223_s12 + $0x14] sm:$0xf0] }
 0x778   : > { %v1283_v31 = vpop.permute.xlu2 %1282 }
 0x779   : > { %1288 = vst.msk [vmem:[#allocation3 + $0x8] sm:$0xff] %vm1286_vm6, %v1283_v31  ;;  %v1587_v31 = vmul.f32 %v1586_v16, %v1582_v19 }
 0x77d   : > { %v1441_v32 = vpop.permute.xlu1 %1440 }
 0x77e   : > { %1447 = vst.msk [vmem:[#allocation3] sm:$0xff] %vm1446_vm8, %v1441_v32  ;;  %v1588_v32 = vmul.f32 %v1586_v16, %v1583_v21 }
 0x780   : > { %v1443_v34 = vpop.permute.xlu2 %1442 }
 0x785   : > { %v1449_v35 = vld [vmem:[#allocation3] sm:$0xff] }
 0x788   : > { %v1363_v33 = vpop.permute.xlu0 %1362 }
 0x789   : > { %1368 = vst.msk [vmem:[#allocation3 + $0x8] sm:$0xff] %vm1366_vm7, %v1363_v33  ;;  %v1591_v33 = vperm.slane %v5358_v56, 5 }
 0x78a   : > { %1448 = vst.msk [vmem:[#allocation3 + $0x8] sm:$0xff] %vm1446_vm8, %v1443_v34  ;;  %v3739_v34 = vor.u32 %v4153_v25, %v3738_v23 }
 0x78b   : > { %v1594_v54 = vadd.f32 %v1591_v33, %v1589_v53 }
 0x791   : > { %v1450_v36 = vld [vmem:[#allocation3 + $0x8] sm:$0xff] }
 0x792   : > { %v1451_v37 = vpack.c.bf16 %v1450_v36, %v1449_v35  ;;  %v3730_v35 = vld [vmem:[%s5223_s12] sm:$0xf]  ;;  %v4151_v36 = vld [vmem:[%s5223_s12 + $0x4] sm:$0xf0] }
 0x794   : > { %1524 = vmatmul.bf16.vlgmr.msra.gmra.mxu1 %v1451_v37  ;;  %v3743_v37 = vor.u32 %v4152_v28, %v3740_v29 }
 0x796   : > { %1799 = vmatpush.bf16.msra.mxu0 %v3743_v37 }
 0x811   : > { %v1525_v40 = vpop.f32.mrf.mxu1 }
 0x812   : > { %v1530_v41 = vadd.f32 %v1525_v40, %v5286_v9  ;;  %v3787_v9 = vor.u32 %v4165_v47, %v3786_v46  ;;  %v4150_v40 = vld [vmem:[%s5223_s12 + $0x4] sm:$0xf]  ;;  %v1593_v46 = vadd.f32 %v1591_v33, %v1588_v32  ;;  %v3731_v47 = vor.u32 %v4151_v36, %v3730_v35 }
 0x814   : > { %v5434_v42 = vadd.f32 %v1532_v39, %v1530_v41  ;;  %1774 = vmatpush.bf16.msrb.mxu3 %v3787_v9  ;;  %v3732_v41 = vld [vmem:[%s5223_s12 + $0x8] sm:$0xf0] }
 0x815   : > { %v3735_v9 = vor.u32 %v4150_v40, %v3732_v41 }
 0x816   : > { %1535 = vadd.xlane.f32.xlu0 %v5434_v42 }
 0x817   : > { %1800 = vmatpush.bf16.msra.mxu0 %v3735_v9 }
 0x819   : > { %v1527_v43 = vpop.f32.mrf.mxu1 }
 0x81a   : > { %v1531_v44 = vadd.f32 %v1527_v43, %v5290_v10  ;;  %v3779_v10 = vor.u32 %v4163_v49, %v3778_v48 }
 0x81c   : > { %v5438_v45 = vadd.f32 %v1532_v39, %v1531_v44  ;;  %1775 = vmatpush.bf16.msrb.mxu3 %v3779_v10  ;;  %v1592_v44 = vadd.f32 %v1591_v33, %v1587_v31  ;;  %v1590_v10 = vmul.f32 %v1586_v16, %v1585_v52 }
 0x81e   : > { %1537 = vadd.xlane.f32.xlu1 %v5438_v45  ;;  %v1596_v50 = vpack.c.bf16 %v1593_v46, %v1592_v44  ;;  %v1595_v55 = vadd.f32 %v1591_v33, %v1590_v10  ;;  %v1578_v33 = vperm.slane %v5358_v56, 3 }
 0x820   : > { %1776 = vmatpush.bf16.msrb.mxu3 %v3771_v61  ;;  %1801 = vmatmul.bf16.vlgmr.msra.gmra.mxu0 %v1596_v50  ;;  %v1597_v57 = vpack.c.bf16 %v1595_v55, %v1594_v54  ;;  %v4146_v61 = vld [vmem:[%s5217_s22 + $0x20] sm:$0xff] }
 0x821   : > { %1665 = vmatpush.bf16.msra.mxu2 %v4146_v61 }
 0x824   : > { %1777 = vmatpush.bf16.msrb.mxu3 %v3763_v2  ;;  %v4142_v2 = vld [vmem:[%s5217_s22] sm:$0xff] }
 0x825   : > { %1666 = vmatpush.bf16.msra.mxu2 %v4145_v62 }
 0x828   : > { %1778 = vmatpush.bf16.msrb.mxu3 %v3755_v7 }
 0x829   : > { %1667 = vmatpush.bf16.msra.mxu2 %v4144_v63 }
 0x82c   : > { %1779 = vmatpush.bf16.msrb.mxu3 %v3747_v18 }
 0x82d   : > { %1668 = vmatpush.bf16.msra.mxu2 %v4143_v26 }
 0x830   : > { %1780 = vmatpush.bf16.msrb.mxu3 %v3739_v34  ;;  %1806 = vmatmul.bf16.gmra.mxu0 %v1597_v57 }
 0x831   : > { %1669 = vmatpush.bf16.msra.mxu2 %v4142_v2 }
 0x834   : > { %1781 = vmatpush.bf16.msrb.mxu3 %v3731_v47 }
 0x837   : > { %1782 = vmatmul.bf16.vlgmr.msrb.gmra.mxu3 %v1596_v50 }
 0x847   : > { %1787 = vmatmul.bf16.gmra.mxu3 %v1597_v57 }
 0x889   : > { %v1536_v13 = vpop.xlane.xlu0 %1535 }
 0x88a   : > { %v1539_v15 = vmul.f32 %v1536_v13, %v5293_v17 }
 0x88c   : > { %v5468_v22 = vsub.f32 %v5434_v42, %v1539_v15 }
 0x88e   : > { %v1543_v30 = vmul.f32 %v5468_v22, %v5468_v22 }
 0x890   : > { %1545 = vadd.xlane.f32.xlu2 %v1543_v30 }
 0x891   : > { %v1538_v39 = vpop.xlane.xlu1 %1537 }
 0x892   : > { %v1540_v43 = vmul.f32 %v1538_v39, %v5293_v17 }
 0x894   : > { %v5483_v48 = vsub.f32 %v5438_v45, %v1540_v43 }
 0x896   : > { %v1544_v49 = vmul.f32 %v5483_v48, %v5483_v48 }
 0x898   : > { %1547 = vadd.xlane.f32.xlu0 %v1544_v49 }
 0x89d   : > { %v1802_v15 = vpop.f32.mrf.mxu0 }
 0x8a5   : > { %v1804_v29 = vpop.f32.mrf.mxu0 }
 0x8ad   : > { %v1807_v44 = vpop.f32.mrf.mxu0 }
 0x8ba   : > { %v1783_v23 = vpop.f32.mrf.mxu3 }
 0x8bb   : > { %v1812_v34 = vpack.c.bf16 %v1802_v15, %v1783_v23 }
 0x8bd   : > { %v1825_v40 = vunpack.c.l.b16 %v1812_v34  ;;  %v1879_v10 = vunpack.c.h.b16 %v1812_v34 }
 0x8c2   : > { %v1785_v36 = vpop.f32.mrf.mxu3 }
 0x8c3   : > { %v1813_v41 = vpack.c.bf16 %v1804_v29, %v1785_v36 }
 0x8c5   : > { %v1826_v43 = vunpack.c.l.b16 %v1813_v41  ;;  %v1880_v54 = vunpack.c.h.b16 %v1813_v41 }
 0x8c7   : > { %v1829_v46 = vpack.c.b16 %v1826_v43, %v1825_v40  ;;  %v5508_v59 = vpack.c.b16 %v1880_v54, %v1879_v10 }
 0x8c9   : > { %1908 = vrot.lane.b32.xlu2 %v1829_v46, %s4890_s7  ;;  %v1835_v60 = vsel %vm1137_vm4, %v1829_v46, 0 }
 0x8ca   : > { %v1788_v47 = vpop.f32.mrf.mxu3 }
 0x8cb   : > { %v1814_v9 = vpack.c.bf16 %v1807_v44, %v1788_v47 }
 0x8cd   : > { %v1827_v49 = vunpack.c.l.b16 %v1814_v9  ;;  %v1881_v50 = vunpack.c.h.b16 %v1814_v9 }
 0x8d1   : > { %1995 = vrot.lane.b32.xlu2 %v1829_v46, %s4892_s21 }
 0x8d2   : > { %v1790_v56 = vpop.f32.mrf.mxu3 }
 0x903   : > { %v1546_v0 = vpop.xlane.xlu2 %1545 }
 0x904   : > { %v1549_v1 = vmul.f32 %v1546_v0, %v5293_v17 }
 0x906   : > { %v1551_v3 = vadd.f32 1e-05, %v1549_v1 }
 0x908   : > { %4442 = vrsqrt.f32 %v1551_v3  ;;  %vm1559_vm10 = vweird.f32 %v1551_v3 }
 0x90b   : > { %v1548_v4 = vpop.xlane.xlu0 %1547 }
 0x90c   : > { %v1550_v5 = vmul.f32 %v1548_v4, %v5293_v17 }
 0x90e   : > { %v4443_v20 = vpop.eup %4442  ;;  %v1552_v6 = vadd.f32 1e-05, %v1550_v5 }
 0x90f   : > { %v1554_v7 = vmul.f32 %v4443_v20, %v1551_v3  ;;  %vm1560_vm9 = vweird.f32 %v4443_v20 }
 0x910   : > { %4444 = vrsqrt.f32 %v1552_v6  ;;  %vm1561_vm11 = vmor %vm1559_vm10, %vm1560_vm9  ;;  %vm1569_vm13 = vweird.f32 %v1552_v6 }
 0x911   : > { %v1555_v8 = vmul.f32 %v4443_v20, %v1554_v7 }
 0x913   : > { %v1556_v11 = vmul.f32 0.5, %v1555_v8 }
 0x915   : > { %v1557_v12 = vsub.f32 1.5, %v1556_v11 }
 0x916   : > { %v4445_v13 = vpop.eup %4444 }
 0x917   : > { %v1558_v14 = vmul.f32 %v4443_v20, %v1557_v12  ;;  %v1564_v24 = vmul.f32 %v4445_v13, %v1552_v6  ;;  %vm1570_vm12 = vweird.f32 %v4445_v13 }
 0x918   : > { %vm1571_vm14 = vmor %vm1569_vm13, %vm1570_vm12 }
 0x919   : > { %v1565_v16 = vmul.f32 %v4445_v13, %v1564_v24  ;;  %v1562_v18 = vsel %vm1561_vm11, %v4443_v20, %v1558_v14 }
 0x91a   : > { %v1573_v25 = vmul.f32 %v1562_v18, %v5468_v22 }
 0x91b   : > { %v1566_v19 = vmul.f32 0.5, %v1565_v16 }
 0x91c   : > { %v1576_v32 = vmul.f32 %v1575_v27, %v1573_v25 }
 0x91d   : > { %v1567_v21 = vsub.f32 1.5, %v1566_v19 }
 0x91e   : > { %v1579_v37 = vadd.f32 %v1578_v33, %v1576_v32 }
 0x91f   : > { %v1568_v28 = vmul.f32 %v4445_v13, %v1567_v21 }
 0x921   : > { %v1572_v30 = vsel %vm1571_vm14, %v4445_v13, %v1568_v28 }
 0x922   : > { %v1574_v31 = vmul.f32 %v1572_v30, %v5483_v48  ;;  %v1809_v48 = vpop.f32.mrf.mxu0 }
 0x923   : > { %v1815_v51 = vpack.c.bf16 %v1809_v48, %v1790_v56  ;;  %v1909_v61 = vpop.permute.xlu2 %1908 }
 0x924   : > { %v1577_v35 = vmul.f32 %v1575_v27, %v1574_v31  ;;  %v1916_v5 = vsel %vm1137_vm4, %v1909_v61, 0 }
 0x925   : > { %v1828_v52 = vunpack.c.l.b16 %v1815_v51  ;;  %v1882_v53 = vunpack.c.h.b16 %v1815_v51 }
 0x926   : > { %v1580_v39 = vadd.f32 %v1578_v33, %v1577_v35 }
 0x927   : > { %v1830_v55 = vpack.c.b16 %v1828_v52, %v1827_v49  ;;  %v5503_v57 = vpack.c.b16 %v1882_v53, %v1881_v50 }
 0x928   : > { %v1581_v22 = vpack.c.bf16 %v1580_v39, %v1579_v37 }
 0x929   : > { %1910 = vrot.lane.b32.xlu1 %v1830_v55, %s4890_s7  ;;  %1997 = vrot.lane.b32.xlu0 %v1830_v55, %s4892_s21  ;;  %v1838_v58 = vsel %vm1137_vm4, %v1830_v55, 0 }
 0x92a   : > { %1670 = vmatmul.bf16.vlgmr.msra.gmra.mxu2 %v1581_v22  ;;  %1846 = vmatpush.bf16.xpose.msrb.mxu1 %v1838_v58 }
 0x92b   : > { %1896 = vmatpush.bf16.msrb.mxu2 %v5503_v57  ;;  %v1996_v2 = vpop.permute.xlu2 %1995 }
 0x92c   : > { %v2003_v20 = vsel %vm1137_vm4, %v1996_v2, 0 }
 0x92f   : > { %1897 = vmatpush.bf16.msrb.mxu2 %v5508_v59 }
 0x931   : > { %2084 = vrot.lane.b32.xlu0 %v1830_v55, %s4891_s9 }
 0x932   : > { %1847 = vmatpush.bf16.xpose.msrb.mxu1 %v1835_v60 }
 0x99b   : > { %v1998_v63 = vpop.permute.xlu0 %1997  ;;  %v1911_v26 = vpop.permute.xlu1 %1910 }
 0x99c   : > { %v2006_v0 = vsel %vm1137_vm4, %v1998_v63, 0  ;;  %v1919_v1 = vsel %vm1137_vm4, %v1911_v26, 0 }
 0x99d   : > { %1927 = vmatpush.bf16.xpose.msra.mxu1 %v1919_v1  ;;  %2014 = vmatpush.bf16.xpose.msra.mxu3 %v2006_v0 }
 0x9a3   : > { %v2085_v12 = vpop.permute.xlu0 %2084 }
 0x9a4   : > { %v2093_v13 = vsel %vm1137_vm4, %v2085_v12, 0 }
 0x9a5   : > { %1928 = vmatpush.bf16.xpose.msra.mxu1 %v1916_v5  ;;  %2015 = vmatpush.bf16.xpose.msra.mxu3 %v2003_v20 }
 0x9ad   : > { %v1671_v62 = vpop.f32.mrf.mxu2 }
 0x9ae   : > { %v1676_v3 = vpack.c.bf16 %v1671_v62, %v1671_v62 }
 0x9b0   : > { %v1818_v7 = vunpack.c.l.b16 %v1676_v3 }
 0x9b5   : > { %v1673_v4 = vpop.f32.mrf.mxu2 }
 0x9b6   : > { %v1677_v6 = vpack.c.bf16 %v1673_v4, %v1673_v4 }
 0x9b8   : > { %v1819_v8 = vunpack.c.l.b16 %v1677_v6 }
 0x9ba   : > { %v1820_v11 = vpack.c.b16 %v1819_v8, %v1818_v7 }
 0x9bc   : > { %2080 = vrot.lane.b32.xlu2 %v1820_v11, %s4891_s9  ;;  %1993 = vrot.lane.b32.xlu0 %v1820_v11, %s4892_s21 }
 0x9bd   : > { %1906 = vrot.lane.b32.xlu1 %v1820_v11, %s4890_s7  ;;  %3792 = vmatmul.msk.bf16.vlgmr.msrb.gmra.mxu1 %vm1137_vm4, %v1820_v11 }
 0x9be   : > { %2101 = vmatpush.bf16.xpose.msrb.mxu1 %v2093_v13 }
 0x9c5   : > { %2082 = vrot.lane.b32.xlu1 %v1829_v46, %s4891_s9 }
 0xa16   : > { %v2081_v23 = vpop.permute.xlu2 %2080 }
 0xa2e   : > { %v1994_v14 = vpop.permute.xlu0 %1993 }
 0xa2f   : > { %v1907_v24 = vpop.permute.xlu1 %1906  ;;  %3796 = vmatmul.msk.bf16.vlgmr.msra.gmra.mxu3 %vm1137_vm4, %v1994_v14 }
 0xa30   : > { %3794 = vmatmul.msk.bf16.vlgmr.msra.gmra.mxu1 %vm1137_vm4, %v1907_v24 }
 0xa37   : > { %v2083_v15 = vpop.permute.xlu1 %2082 }
 0xa38   : > { %v2090_v16 = vsel %vm1137_vm4, %v2083_v15, 0 }
 0xa39   : > { %2102 = vmatpush.bf16.xpose.msrb.mxu1 %v2090_v16 }
 0xa3a   : > { %v1849_v18 = vpop.f32.mrf.mxu1 }
 0xa3b   : > { %v1854_v19 = vmul.f32 0.17677669, %v1849_v18 }
 0xa3d   : > { %v1856_v21 = vsel %vm1137_vm4, %v1854_v19, -inf }
 0xa3e   : > { %1857 = vmax.xlane.f32.xlu1 %v1856_v21 }
 0xa40   : > { %3798 = vmatmul.msk.bf16.vlgmr.msrb.gmra.mxu1 %vm1137_vm4, %v2081_v23 }
 0xa42   : > { %v1851_v25 = vpop.f32.mrf.mxu1 }
 0xa43   : > { %v1855_v27 = vmul.f32 0.17677669, %v1851_v25 }
 0xa45   : > { %v1859_v28 = vsel %vm1137_vm4, %v1855_v27, -inf }
 0xa46   : > { %1860 = vmax.xlane.f32.xlu0 %v1859_v28 }
 0xaad   : > { %v1930_v29 = vpop.f32.mrf.mxu1 }
 0xaae   : > { %v1935_v30 = vmul.f32 0.17677669, %v1930_v29 }
 0xab0   : > { %v1937_v31 = vsel %vm1137_vm4, %v1935_v30, -inf }
 0xab1   : > { %1938 = vmax.xlane.f32.xlu2 %v1937_v31  ;;  %v1858_v32 = vpop.xlane.xlu1 %1857 }
 0xab2   : > { %v1862_v33 = vsub.f32 %v1854_v19, %v1858_v32  ;;  %v2017_v34 = vpop.f32.mrf.mxu3 }
 0xab3   : > { %v2022_v35 = vmul.f32 0.17677669, %v2017_v34 }
 0xab4   : > { %v1864_v36 = vmul.f32 1.442695, %v1862_v33 }
 0xab5   : > { %v1932_v37 = vpop.f32.mrf.mxu1  ;;  %v2024_v39 = vsel %vm1137_vm4, %v2022_v35, -inf }
 0xab6   : > { %4446 = vpow2.f32 %v1864_v36  ;;  %2025 = vmax.xlane.f32.xlu1 %v2024_v39  ;;  %v1936_v40 = vmul.f32 0.17677669, %v1932_v37 }
 0xab8   : > { %v1940_v9 = vsel %vm1137_vm4, %v1936_v40, -inf }
 0xab9   : > { %v1861_v52 = vpop.xlane.xlu0 %1860 }
 0xaba   : > { %v2019_v41 = vpop.f32.mrf.mxu3  ;;  %v1863_v53 = vsub.f32 %v1855_v27, %v1861_v52 }
 0xabb   : > { %v5532_v22 = vmul.f32 0.17677669, %v2019_v41 }
 0xabc   : > { %v5534_v43 = vpop.eup %4446  ;;  %v1866_v10 = vmul.f32 1.442695, %v1863_v53 }
 0xabd   : > { %v2104_v44 = vpop.f32.mrf.mxu1  ;;  %v1868_v46 = vsel %vm1137_vm4, %v5534_v43, 0.0  ;;  %v2027_v47 = vsel %vm1137_vm4, %v5532_v22, -inf }
 0xabe   : > { %1869 = vadd.xlane.f32.xlu2 %v1868_v46  ;;  %2028 = vmax.xlane.f32.xlu0 %v2027_v47  ;;  %v2109_v48 = vmul.f32 0.17677669, %v2104_v44  ;;  %4448 = vpow2.f32 %v1866_v10 }
 0xabf   : > { %1941 = vmax.xlane.f32.xlu1 %v1940_v9 }
 0xac0   : > { %v2111_v49 = vsel %vm1137_vm4, %v2109_v48, -inf }
 0xac4   : > { %v4449_v54 = vpop.eup %4448 }
 0xac5   : > { %v2106_v56 = vpop.f32.mrf.mxu1  ;;  %v1871_v55 = vsel %vm1137_vm4, %v4449_v54, 0.0 }
 0xac6   : > { %v2110_v50 = vmul.f32 0.17677669, %v2106_v56  ;;  %2112 = vmax.xlane.f32.xlu0 %v2111_v49 }
 0xac8   : > { %v2114_v51 = vsel %vm1137_vm4, %v2110_v50, -inf }
 0xac9   : > { %2115 = vmax.xlane.f32.xlu2 %v2114_v51 }
 0xad8   : > { %1962 = vrot.lane.b32.xlu1 %v5503_v57, %s4890_s7 }
 0xb02   : > { %1872 = vadd.xlane.f32.xlu1 %v1871_v55 }
 0xb1b   : > { %2136 = vrot.lane.b32.xlu1 %v5503_v57, %s4891_s9 }
 0xb23   : > { %2049 = vrot.lane.b32.xlu1 %v5503_v57, %s4892_s21 }
 0xb24   : > { %v1939_v58 = vpop.xlane.xlu2 %1938 }
 0xb25   : > { %v1943_v60 = vsub.f32 %v1935_v30, %v1939_v58 }
 0xb27   : > { %v1945_v61 = vmul.f32 1.442695, %v1943_v60 }
 0xb29   : > { %4450 = vpow2.f32 %v1945_v61  ;;  %v2026_v62 = vpop.xlane.xlu1 %2025 }
 0xb2a   : > { %v2030_v63 = vsub.f32 %v2022_v35, %v2026_v62 }
 0xb2b   : > { %2047 = vrot.lane.b32.xlu1 %v5508_v59, %s4892_s21 }
 0xb2c   : > { %v2032_v26 = vmul.f32 1.442695, %v2030_v63 }
 0xb2e   : > { %4452 = vpow2.f32 %v2032_v26 }
 0xb2f   : > { %v5552_v0 = vpop.eup %4450 }
 0xb30   : > { %v1949_v1 = vsel %vm1137_vm4, %v5552_v0, 0.0 }
 0xb31   : > { %1950 = vadd.xlane.f32.xlu0 %v1949_v1  ;;  %v2029_v2 = vpop.xlane.xlu0 %2028  ;;  %v1870_v5 = vpop.xlane.xlu2 %1869 }
 0xb32   : > { %v1942_v3 = vpop.xlane.xlu1 %1941  ;;  %v2031_v25 = vsub.f32 %v5532_v22, %v2029_v2 }
 0xb33   : > { %v1944_v57 = vsub.f32 %v1936_v40, %v1942_v3 }
 0xb34   : > { %v5556_v4 = vpop.eup %4452  ;;  %v2034_v27 = vmul.f32 1.442695, %v2031_v25 }
 0xb35   : > { %v1947_v20 = vmul.f32 1.442695, %v1944_v57  ;;  %v2036_v6 = vsel %vm1137_vm4, %v5556_v4, 0.0 }
 0xb36   : > { %2037 = vadd.xlane.f32.xlu2 %v2036_v6  ;;  %v4172_v6 = vld [vmem:[%s5225_s11 + $0x30] sm:$0xff] }
 0xb37   : > { %4454 = vpow2.f32 %v1947_v20  ;;  %v4173_v20 = vld [vmem:[%s5225_s11 + $0x38] sm:$0xff] }
 0xb38   : > { %2234 = vmatpush.bf16.msrb.mxu3 %v4173_v20 }
 0xb39   : > { %v2113_v7 = vpop.xlane.xlu0 %2112 }
 0xb3a   : > { %v2117_v8 = vsub.f32 %v2109_v48, %v2113_v7 }
 0xb3c   : > { %v2119_v11 = vmul.f32 1.442695, %v2117_v8  ;;  %v2116_v12 = vpop.xlane.xlu2 %2115  ;;  %2235 = vmatpush.bf16.msrb.mxu3 %v4172_v6  ;;  %v4171_v8 = vld [vmem:[%s5225_s11 + $0x28] sm:$0xff] }
 0xb3d   : > { %v4455_v13 = vpop.eup %4454  ;;  %v2118_v14 = vsub.f32 %v2110_v50, %v2116_v12  ;;  %v4169_v12 = vld [vmem:[%s5225_s11 + $0x18] sm:$0xff]  ;;  %v4195_v6 = vld [vmem:[%s5231_s1 + $0xac] sm:$0xf] }
 0xb3e   : > { %4456 = vpow2.f32 %v2119_v11  ;;  %v1952_v24 = vsel %vm1137_vm4, %v4455_v13, 0.0  ;;  %v4170_v11 = vld [vmem:[%s5225_s11 + $0x20] sm:$0xff] }
 0xb3f   : > { %1953 = vadd.xlane.f32.xlu2 %v1952_v24  ;;  %v2121_v15 = vmul.f32 1.442695, %v2118_v14  ;;  %v4167_v14 = vld [vmem:[%s5225_s11 + $0x8] sm:$0xff]  ;;  %v4166_v24 = vld [vmem:[%s5225_s11] sm:$0xff] }
 0xb40   : > { %2236 = vmatpush.bf16.msrb.mxu3 %v4171_v8 }
 0xb41   : > { %4458 = vpow2.f32 %v2121_v15 }
 0xb42   : > { %4460 = vpow2.f32 %v2034_v27  ;;  %v2250_v27 = vperm.slane %v5430_v38, 1 }
 0xb43   : > { %4462 = vrcp.f32 %v1870_v5 }
 0xb44   : > { %v4457_v16 = vpop.eup %4456  ;;  %2237 = vmatpush.bf16.msrb.mxu3 %v4170_v11  ;;  %v3898_v11 = vld [vmem:[%s5231_s1 + $0x80] sm:$0xf] }
 0xb45   : > { %1960 = vrot.lane.b32.xlu0 %v5508_v59, %s4890_s7  ;;  %v2123_v18 = vsel %vm1137_vm4, %v4457_v16, 0.0 }
 0xb47   : > { %2124 = vadd.xlane.f32.xlu2 %v2123_v18  ;;  %v4459_v21 = vpop.eup %4458 }
 0xb48   : > { %v2126_v23 = vsel %vm1137_vm4, %v4459_v21, 0.0  ;;  %v4461_v28 = vpop.eup %4460  ;;  %2238 = vmatpush.bf16.msrb.mxu3 %v4169_v12  ;;  %v4192_v12 = vld [vmem:[%s5231_s1 + $0x8c] sm:$0xf0] }
 0xb49   : > { %v2039_v29 = vsel %vm1137_vm4, %v4461_v28, 0.0  ;;  %v4463_v31 = vpop.eup %4462 }
 0xb4a   : > { %v1963_v19 = vpop.permute.xlu1 %1962  ;;  %v1876_v33 = vmul.f32 %v4463_v31, %v5534_v43 }
 0xb4b   : > { %1975 = vmatpush.bf16.msra.mxu2 %v1963_v19 }
 0xb4f   : > { %2127 = vadd.xlane.f32.xlu2 %v2126_v23 }
 0xb67   : > { %2134 = vrot.lane.b32.xlu2 %v5508_v59, %s4891_s9 }
 0xb6f   : > { %2040 = vadd.xlane.f32.xlu0 %v2039_v29 }
 0xb75   : > { %v1873_v30 = vpop.xlane.xlu1 %1872 }
 0xb76   : > { %4464 = vrcp.f32 %v1873_v30 }
 0xb7c   : > { %v4465_v32 = vpop.eup %4464 }
 0xb7d   : > { %v1877_v34 = vmul.f32 %v4465_v32, %v4449_v54 }
 0xb7f   : > { %v1878_v35 = vpack.c.bf16 %v1877_v34, %v1876_v33 }
 0xb81   : > { %3793 = vmatmul.msk.bf16.vlgmr.msrb.gmra.mxu2 %vm1137_vm4, %v1878_v35 }
 0xb8d   : > { %v2137_v36 = vpop.permute.xlu1 %2136 }
 0xb95   : > { %v2050_v37 = vpop.permute.xlu1 %2049 }
 0xb96   : > { %2062 = vmatpush.bf16.msrb.mxu0 %v2050_v37 }
 0xb9d   : > { %v2048_v39 = vpop.permute.xlu1 %2047 }
 0xb9e   : > { %2063 = vmatpush.bf16.msrb.mxu0 %v2048_v39 }
 0xba4   : > { %v1951_v40 = vpop.xlane.xlu0 %1950 }
 0xba5   : > { %4466 = vrcp.f32 %v1951_v40  ;;  %v4204_v40 = vld [vmem:[%s5231_s1 + $0xec] sm:$0xf0] }
 0xba9   : > { %v2038_v59 = vpop.xlane.xlu2 %2037 }
 0xbab   : > { %v4467_v22 = vpop.eup %4466 }
 0xbac   : > { %v1957_v43 = vmul.f32 %v4467_v22, %v5552_v0 }
 0xbb2   : > { %v1954_v41 = vpop.xlane.xlu2 %1953 }
 0xbb3   : > { %4468 = vrcp.f32 %v1954_v41  ;;  %v4202_v41 = vld [vmem:[%s5231_s1 + $0xe4] sm:$0xf] }
 0xbb7   : > { %v1961_v44 = vpop.permute.xlu0 %1960 }
 0xbb8   : > { %1976 = vmatpush.bf16.msra.mxu2 %v1961_v44  ;;  %v3948_v44 = vld [vmem:[%s5231_s1 + $0xf0] sm:$0xf0] }
 0xbb9   : > { %v4469_v46 = vpop.eup %4468 }
 0xbba   : > { %v1958_v47 = vmul.f32 %v4469_v46, %v4455_v13  ;;  %v2125_v9 = vpop.xlane.xlu2 %2124  ;;  %v4168_v13 = vld [vmem:[%s5225_s11 + $0x10] sm:$0xff]  ;;  %v3954_v46 = vld [vmem:[%s5231_s1 + $0xe8] sm:$0xf]  ;;  %s3244_s11 = sshll.u32 %s5259_s14, 4  ;;  %s3245_s11 = int_to_ptr.vmem [resolvable:$true] %s3244_s11 }
 0xbbb   : > { %4470 = vrcp.f32 %v2125_v9  ;;  %2239 = vmatpush.bf16.msrb.mxu3 %v4168_v13  ;;  %v4190_v13 = vld [vmem:[%s5231_s1 + $0x84] sm:$0xf] }
 0xbbc   : > { %2149 = vmatpush.bf16.msrb.mxu2 %v2137_v36  ;;  %v1959_v48 = vpack.c.bf16 %v1958_v47, %v1957_v43  ;;  %v4205_v43 = vld [vmem:[%s5231_s1 + $0xf4] sm:$0xf0]  ;;  %v3951_v47 = vor.u32 %v4202_v41, %v3948_v44  ;;  %v4184_v41 = vld [vmem:[%s5231_s1 + $0x4c] sm:$0xf0] }
 0xbbd   : > { %v3955_v9 = vor.u32 %v4205_v43, %v3954_v46  ;;  %v3868_v46 = vld [vmem:[%s5231_s1 + $0x50] sm:$0xf0]  ;;  %v3874_v43 = vld [vmem:[%s5231_s1 + $0x48] sm:$0xf] }
 0xbbe   : > { %3795 = vmatmul.msk.bf16.vlgmr.msra.gmra.mxu2 %vm1137_vm4, %v1959_v48  ;;  %v4203_v48 = vld [vmem:[%s5231_s1 + $0xec] sm:$0xf]  ;;  %2516 = vmatpush.bf16.msra.mxu1 %v3951_v47  ;;  %v4185_v47 = vld [vmem:[%s5231_s1 + $0x54] sm:$0xf0] }
 0xbbf   : > { %2240 = vmatpush.bf16.msrb.mxu3 %v4167_v14  ;;  %v3899_v14 = vor.u32 %v4192_v12, %v3898_v11  ;;  %v3844_v12 = vld [vmem:[%s5231_s1 + $0x18] sm:$0xf0] }
 0xbc1   : > { %v4471_v49 = vpop.eup %4470 }
 0xbc2   : > { %v2128_v56 = vpop.xlane.xlu2 %2127  ;;  %v2131_v51 = vmul.f32 %v4471_v49, %v4457_v16 }
 0xbc3   : > { %4472 = vrcp.f32 %v2128_v56  ;;  %2241 = vmatpush.bf16.msrb.mxu3 %v4166_v24  ;;  %v3956_v56 = vld [vmem:[%s5231_s1 + $0xf8] sm:$0xf0]  ;;  %v3900_v24 = vld [vmem:[%s5231_s1 + $0x90] sm:$0xf0] }
 0xbc4   : > { %4474 = vrcp.f32 %v2038_v59  ;;  %v3946_v59 = vld [vmem:[%s5231_s1 + $0xe0] sm:$0xf]  ;;  %v3959_v49 = vor.u32 %v4203_v48, %v3956_v56  ;;  %v3875_v48 = vor.u32 %v4185_v47, %v3874_v43  ;;  %v4183_v56 = vld [vmem:[%s5231_s1 + $0x4c] sm:$0xf] }
 0xbc5   : > { %v3947_v22 = vor.u32 %v4204_v40, %v3946_v59  ;;  %v3866_v40 = vld [vmem:[%s5231_s1 + $0x40] sm:$0xf] }
 0xbc6   : > { %v3867_v44 = vor.u32 %v4184_v41, %v3866_v40 }
 0xbc7   : > { %2502 = vmatpush.bf16.msra.mxu0 %v3947_v22  ;;  %2544 = vmatpush.bf16.msra.mxu3 %v3959_v49  ;;  %v4182_v22 = vld [vmem:[%s5231_s1 + $0x44] sm:$0xf]  ;;  %v3876_v49 = vld [vmem:[%s5231_s1 + $0x58] sm:$0xf0] }
 0xbc9   : > { %v4473_v50 = vpop.eup %4472 }
 0xbca   : > { %v2132_v52 = vmul.f32 %v4473_v50, %v4459_v21  ;;  %v2135_v53 = vpop.permute.xlu2 %2134  ;;  %v4475_v55 = vpop.eup %4474  ;;  %v3930_v50 = vld [vmem:[%s5231_s1 + $0xc0] sm:$0xf] }
 0xbcb   : > { %2150 = vmatpush.bf16.msrb.mxu2 %v2135_v53  ;;  %v2044_v60 = vmul.f32 %v4475_v55, %v5556_v4  ;;  %v4201_v55 = vld [vmem:[%s5231_s1 + $0xd4] sm:$0xf0] }
 0xbcc   : > { %v2133_v10 = vpack.c.bf16 %v2132_v52, %v2131_v51  ;;  %v4200_v51 = vld [vmem:[%s5231_s1 + $0xcc] sm:$0xf0]  ;;  %v4198_v52 = vld [vmem:[%s5231_s1 + $0xc4] sm:$0xf] }
 0xbcd   : > { %v3931_v53 = vor.u32 %v4200_v51, %v3930_v50  ;;  %v3879_v50 = vor.u32 %v4183_v56, %v3876_v49  ;;  %v3850_v51 = vld [vmem:[%s5231_s1 + $0x20] sm:$0xf] }
 0xbce   : > { %3799 = vmatmul.msk.bf16.vlgmr.msrb.gmra.mxu2 %vm1137_vm4, %v2133_v10  ;;  %v3932_v10 = vld [vmem:[%s5231_s1 + $0xd0] sm:$0xf0] }
 0xbcf   : > { %2530 = vmatpush.bf16.msra.mxu2 %v3955_v9  ;;  %2503 = vmatpush.bf16.msra.mxu0 %v3931_v53  ;;  %v3871_v9 = vor.u32 %v4182_v22, %v3868_v46  ;;  %v4178_v53 = vld [vmem:[%s5231_s1 + $0x24] sm:$0xf] }
 0xbe2   : > { %v2041_v54 = vpop.xlane.xlu0 %2040 }
 0xbe3   : > { %4476 = vrcp.f32 %v2041_v54  ;;  %v3938_v54 = vld [vmem:[%s5231_s1 + $0xc8] sm:$0xf] }
 0xbe9   : > { %v4477_v58 = vpop.eup %4476 }
 0xbea   : > { %v2045_v61 = vmul.f32 %v4477_v58, %v4461_v28  ;;  %v3935_v58 = vor.u32 %v4198_v52, %v3932_v10  ;;  %v4180_v52 = vld [vmem:[%s5231_s1 + $0x2c] sm:$0xf0] }
 0xbeb   : > { %v3851_v10 = vor.u32 %v4180_v52, %v3850_v51 }
 0xbec   : > { %v2046_v62 = vpack.c.bf16 %v2045_v61, %v2044_v60  ;;  %v3939_v60 = vor.u32 %v4201_v55, %v3938_v54  ;;  %v4199_v61 = vld [vmem:[%s5231_s1 + $0xcc] sm:$0xf]  ;;  %2517 = vmatpush.bf16.msra.mxu1 %v3935_v58  ;;  %v3852_v54 = vld [vmem:[%s5231_s1 + $0x30] sm:$0xf0]  ;;  %v3858_v55 = vld [vmem:[%s5231_s1 + $0x28] sm:$0xf] }
 0xbed   : > { %v4181_v58 = vld [vmem:[%s5231_s1 + $0x34] sm:$0xf0] }
 0xbee   : > { %3797 = vmatmul.msk.bf16.vlgmr.msrb.gmra.mxu0 %vm1137_vm4, %v2046_v62  ;;  %v3940_v62 = vld [vmem:[%s5231_s1 + $0xd8] sm:$0xf0]  ;;  %2531 = vmatpush.bf16.msra.mxu2 %v3939_v60  ;;  %v3855_v60 = vor.u32 %v4178_v53, %v3852_v54 }
 0xc04   : > { %v1899_v63 = vpop.f32.mrf.mxu2 }
 0xc05   : > { %1904 = vst.msk [vmem:[#allocation3] sm:$0xff] %vm1137_vm4, %v1899_v63  ;;  %v3943_v63 = vor.u32 %v4199_v61, %v3940_v62  ;;  %v3859_v61 = vor.u32 %v4181_v58, %v3858_v55  ;;  %v4179_v62 = vld [vmem:[%s5231_s1 + $0x2c] sm:$0xf] }
 0xc07   : > { %2545 = vmatpush.bf16.msra.mxu3 %v3943_v63  ;;  %v3860_v63 = vld [vmem:[%s5231_s1 + $0x38] sm:$0xf0] }
 0xc0c   : > { %v1901_v26 = vpop.f32.mrf.mxu2 }
 0xc0d   : > { %1905 = vst.msk [vmem:[#allocation3 + $0x8] sm:$0xff] %vm1137_vm4, %v1901_v26  ;;  %v3914_v26 = vld [vmem:[%s5231_s1 + $0xa0] sm:$0xf] }
 0xc41   : > { %v1978_v0 = vpop.f32.mrf.mxu2 }
 0xc42   : > { %1985 = vrot.lane.b32.xlu1 %v1978_v0, %s4891_s9  ;;  %v4196_v0 = vld [vmem:[%s5231_s1 + $0xac] sm:$0xf0] }
 0xc49   : > { %v1980_v1 = vpop.f32.mrf.mxu2 }
 0xc4a   : > { %1987 = vrot.lane.b32.xlu2 %v1980_v1, %s4891_s9  ;;  %v4194_v1 = vld [vmem:[%s5231_s1 + $0xa4] sm:$0xf] }
 0xc51   : > { %v2152_v2 = vpop.f32.mrf.mxu2 }
 0xc52   : > { %2159 = vrot.lane.b32.xlu0 %v2152_v2, %s4890_s7  ;;  %v3915_v2 = vor.u32 %v4196_v0, %v3914_v26  ;;  %v3834_v26 = vld [vmem:[%s5231_s1] sm:$0xf] }
 0xc54   : > { %2504 = vmatpush.bf16.msra.mxu0 %v3915_v2  ;;  %v4176_v2 = vld [vmem:[%s5231_s1 + $0xc] sm:$0xf0] }
 0xc58   : > { %2505 = vmatpush.bf16.msra.mxu0 %v3899_v14 }
 0xc59   : > { %v2154_v57 = vpop.f32.mrf.mxu2 }
 0xc6b   : > { %v2065_v3 = vpop.f32.mrf.mxu0 }
 0xc6c   : > { %2072 = vrot.lane.b32.xlu1 %v2065_v3, %s4892_s21  ;;  %v3916_v3 = vld [vmem:[%s5231_s1 + $0xb0] sm:$0xf0] }
 0xc73   : > { %v2067_v4 = vpop.f32.mrf.mxu0 }
 0xc74   : > { %2161 = vrot.lane.b32.xlu1 %v2154_v57, %s4890_s7  ;;  %2074 = vrot.lane.b32.xlu2 %v2067_v4, %s4892_s21  ;;  %v3922_v57 = vld [vmem:[%s5231_s1 + $0xa8] sm:$0xf]  ;;  %v4197_v4 = vld [vmem:[%s5231_s1 + $0xb4] sm:$0xf0] }
 0xc75   : > { %v3923_v20 = vor.u32 %v4197_v4, %v3922_v57  ;;  %v3836_v57 = vld [vmem:[%s5231_s1 + $0x10] sm:$0xf0] }
 0xc77   : > { %2532 = vmatpush.bf16.msra.mxu2 %v3923_v20 }
 0xca4   : > { %v1988_v5 = vpop.permute.xlu2 %1987 }
 0xca5   : > { %1992 = vst.msk [vmem:[#allocation3 + $0x8] sm:$0xff] %vm1286_vm6, %v1988_v5  ;;  %v3919_v5 = vor.u32 %v4194_v1, %v3916_v3  ;;  %v3863_v1 = vor.u32 %v4179_v62, %v3860_v63  ;;  %v4174_v3 = vld [vmem:[%s5231_s1 + $0x4] sm:$0xf] }
 0xca6   : > { %v3839_v20 = vor.u32 %v4174_v3, %v3836_v57 }
 0xca7   : > { %2518 = vmatpush.bf16.msra.mxu1 %v3919_v5  ;;  %v3835_v5 = vor.u32 %v4176_v2, %v3834_v26 }
 0xcb4   : > { %v1986_v7 = vpop.permute.xlu1 %1985 }
 0xcb5   : > { %1991 = vst.msk [vmem:[#allocation3] sm:$0xff] %vm1286_vm6, %v1986_v7  ;;  %v3924_v7 = vld [vmem:[%s5231_s1 + $0xb8] sm:$0xf0] }
 0xcb6   : > { %v3927_v8 = vor.u32 %v4195_v6, %v3924_v7  ;;  %v3842_v6 = vld [vmem:[%s5231_s1 + $0x8] sm:$0xf]  ;;  %v4177_v7 = vld [vmem:[%s5231_s1 + $0x14] sm:$0xf0] }
 0xcb7   : > { %v3843_v11 = vor.u32 %v4177_v7, %v3842_v6 }
 0xcb8   : > { %2546 = vmatpush.bf16.msra.mxu3 %v3927_v8  ;;  %v4175_v8 = vld [vmem:[%s5231_s1 + $0xc] sm:$0xf] }
 0xcb9   : > { %v3847_v14 = vor.u32 %v4175_v8, %v3844_v12 }
 0xcc4   : > { %v2160_v18 = vpop.permute.xlu0 %2159 }
 0xcce   : > { %v2075_v15 = vpop.permute.xlu2 %2074 }
 0xccf   : > { %2079 = vst.msk [vmem:[#allocation3 + $0x8] sm:$0xff] %vm1366_vm7, %v2075_v15  ;;  %v3906_v15 = vld [vmem:[%s5231_s1 + $0x88] sm:$0xf] }
 0xcde   : > { %v2073_v16 = vpop.permute.xlu1 %2072 }
 0xcdf   : > { %2078 = vst.msk [vmem:[#allocation3] sm:$0xff] %vm1366_vm7, %v2073_v16  ;;  %v4193_v16 = vld [vmem:[%s5231_s1 + $0x94] sm:$0xf0] }
 0xce0   : > { %2165 = vst.msk [vmem:[#allocation3] sm:$0xff] %vm1446_vm8, %v2160_v18  ;;  %v3903_v18 = vor.u32 %v4190_v13, %v3900_v24 }
 0xce2   : > { %2519 = vmatpush.bf16.msra.mxu1 %v3903_v18 }
 0xce6   : > { %v2162_v19 = vpop.permute.xlu1 %2161 }
 0xce7   : > { %2166 = vst.msk [vmem:[#allocation3 + $0x8] sm:$0xff] %vm1446_vm8, %v2162_v19  ;;  %v2167_v21 = vld [vmem:[#allocation3] sm:$0xff]  ;;  %v3907_v19 = vor.u32 %v4193_v16, %v3906_v15 }
 0xce9   : > { %2533 = vmatpush.bf16.msra.mxu2 %v3907_v19 }
 0xcee   : > { %v2168_v23 = vld [vmem:[#allocation3 + $0x8] sm:$0xff] }
 0xcef   : > { %v2169_v25 = vpack.c.bf16 %v2168_v23, %v2167_v21  ;;  %v4191_v21 = vld [vmem:[%s5231_s1 + $0x8c] sm:$0xf]  ;;  %v3908_v23 = vld [vmem:[%s5231_s1 + $0x98] sm:$0xf0] }
 0xcf1   : > { %2242 = vmatmul.bf16.vlgmr.msrb.gmra.mxu3 %v2169_v25  ;;  %v3911_v25 = vor.u32 %v4191_v21, %v3908_v23 }
 0xcf3   : > { %2547 = vmatpush.bf16.msra.mxu3 %v3911_v25 }
 0xd74   : > { %v2243_v28 = vpop.f32.mrf.mxu3 }
 0xd75   : > { %v2248_v29 = vadd.f32 %v2243_v28, %v5434_v42  ;;  %v4188_v28 = vld [vmem:[%s5231_s1 + $0x6c] sm:$0xf0] }
 0xd77   : > { %v5600_v30 = vadd.f32 %v2250_v27, %v2248_v29  ;;  %v4186_v29 = vld [vmem:[%s5231_s1 + $0x64] sm:$0xf] }
 0xd79   : > { %2253 = vadd.xlane.f32.xlu2 %v5600_v30 }
 0xd7c   : > { %v2245_v31 = vpop.f32.mrf.mxu3 }
 0xd7d   : > { %v2249_v32 = vadd.f32 %v2245_v31, %v5438_v45 }
 0xd7f   : > { %v5604_v33 = vadd.f32 %v2250_v27, %v2249_v32  ;;  %v3882_v27 = vld [vmem:[%s5231_s1 + $0x60] sm:$0xf]  ;;  %v3884_v32 = vld [vmem:[%s5231_s1 + $0x70] sm:$0xf0] }
 0xd80   : > { %v3883_v31 = vor.u32 %v4188_v28, %v3882_v27 }
 0xd81   : > { %2255 = vadd.xlane.f32.xlu1 %v5604_v33 }
 0xd82   : > { %2506 = vmatpush.bf16.msra.mxu0 %v3883_v31 }
 0xd86   : > { %2507 = vmatpush.bf16.msra.mxu0 %v3867_v44 }
 0xd8a   : > { %2508 = vmatpush.bf16.msra.mxu0 %v3851_v10 }
 0xd8e   : > { %2509 = vmatpush.bf16.msra.mxu0 %v3835_v5 }
 0xdec   : > { %v2254_v38 = vpop.xlane.xlu2 %2253 }
 0xded   : > { %v2257_v42 = vmul.f32 %v2254_v38, %v5293_v17  ;;  %v3890_v38 = vld [vmem:[%s5231_s1 + $0x68] sm:$0xf] }
 0xdef   : > { %v5609_v34 = vsub.f32 %v5600_v30, %v2257_v42  ;;  %v4189_v42 = vld [vmem:[%s5231_s1 + $0x74] sm:$0xf0] }
 0xdf1   : > { %v2261_v35 = vmul.f32 %v5609_v34, %v5609_v34 }
 0xdf3   : > { %2263 = vadd.xlane.f32.xlu0 %v2261_v35  ;;  %v3887_v35 = vor.u32 %v4186_v29, %v3884_v32 }
 0xdf4   : > { %v2256_v45 = vpop.xlane.xlu1 %2255 }
 0xdf5   : > { %v2258_v36 = vmul.f32 %v2256_v45, %v5293_v17  ;;  %v3891_v45 = vor.u32 %v4189_v42, %v3890_v38  ;;  %2520 = vmatpush.bf16.msra.mxu1 %v3887_v35  ;;  %v4498_v35 = vld [vmem:[%s5252_s2] sm:$0xff] }
 0xdf6   : > { %v2296_v41 = vperm.slane %v4498_v35, 7 }
 0xdf7   : > { %v5615_v37 = vsub.f32 %v5604_v33, %v2258_v36  ;;  %v4187_v36 = vld [vmem:[%s5231_s1 + $0x6c] sm:$0xf]  ;;  %2534 = vmatpush.bf16.msra.mxu2 %v3891_v45  ;;  %v2293_v45 = vperm.slane %v4498_v35, 6 }
 0xdf9   : > { %v2262_v39 = vmul.f32 %v5615_v37, %v5615_v37  ;;  %2521 = vmatpush.bf16.msra.mxu1 %v3871_v9 }
 0xdfb   : > { %2265 = vadd.xlane.f32.xlu2 %v2262_v39  ;;  %v3892_v39 = vld [vmem:[%s5231_s1 + $0x78] sm:$0xf0]  ;;  %2535 = vmatpush.bf16.msra.mxu2 %v3875_v48 }
 0xdfc   : > { %v3895_v59 = vor.u32 %v4187_v36, %v3892_v39 }
 0xdfd   : > { %2522 = vmatpush.bf16.msra.mxu1 %v3855_v60 }
 0xdfe   : > { %2548 = vmatpush.bf16.msra.mxu3 %v3895_v59 }
 0xdff   : > { %2536 = vmatpush.bf16.msra.mxu2 %v3859_v61 }
 0xe01   : > { %2523 = vmatpush.bf16.msra.mxu1 %v3839_v20 }
 0xe02   : > { %2549 = vmatpush.bf16.msra.mxu3 %v3879_v50 }
 0xe03   : > { %2537 = vmatpush.bf16.msra.mxu2 %v3843_v11 }
 0xe06   : > { %2550 = vmatpush.bf16.msra.mxu3 %v3863_v1 }
 0xe0a   : > { %2551 = vmatpush.bf16.msra.mxu3 %v3847_v14 }
 0xe66   : > { %v2264_v0 = vpop.xlane.xlu0 %2263 }
 0xe67   : > { %v2267_v4 = vmul.f32 %v2264_v0, %v5293_v17 }
 0xe69   : > { %v2269_v13 = vadd.f32 1e-05, %v2267_v4 }
 0xe6b   : > { %4478 = vrsqrt.f32 %v2269_v13  ;;  %vm2277_vm0 = vweird.f32 %v2269_v13 }
 0xe6e   : > { %v2266_v24 = vpop.xlane.xlu2 %2265 }
 0xe6f   : > { %v2268_v15 = vmul.f32 %v2266_v24, %v5293_v17 }
 0xe71   : > { %v4479_v16 = vpop.eup %4478  ;;  %v2270_v18 = vadd.f32 1e-05, %v2268_v15 }
 0xe72   : > { %v2272_v19 = vmul.f32 %v4479_v16, %v2269_v13  ;;  %vm2278_vm15 = vweird.f32 %v4479_v16 }
 0xe73   : > { %4480 = vrsqrt.f32 %v2270_v18  ;;  %vm2279_vm1 = vmor %vm2277_vm0, %vm2278_vm15  ;;  %vm2287_vm3 = vweird.f32 %v2270_v18 }
 0xe74   : > { %v2273_v21 = vmul.f32 %v4479_v16, %v2272_v19 }
 0xe76   : > { %v2274_v23 = vmul.f32 0.5, %v2273_v21 }
 0xe78   : > { %v2275_v25 = vsub.f32 1.5, %v2274_v23 }
 0xe79   : > { %v4481_v27 = vpop.eup %4480 }
 0xe7a   : > { %v2276_v28 = vmul.f32 %v4479_v16, %v2275_v25  ;;  %v2282_v29 = vmul.f32 %v4481_v27, %v2270_v18  ;;  %vm2288_vm2 = vweird.f32 %v4481_v27 }
 0xe7b   : > { %vm2289_vm4 = vmor %vm2287_vm3, %vm2288_vm2 }
 0xe7c   : > { %v2283_v31 = vmul.f32 %v4481_v27, %v2282_v29  ;;  %v2280_v32 = vsel %vm2279_vm1, %v4479_v16, %v2276_v28 }
 0xe7d   : > { %v2291_v17 = vmul.f32 %v2280_v32, %v5609_v34  ;;  %v5689_v34 = vld [vmem:[%s5257_s19] sm:$0xf]  ;;  %s6263_s19 = sld [smem:[#allocation30_spill]] }
 0xe7e   : > { %v2284_v38 = vmul.f32 0.5, %v2283_v31  ;;  %v2334_v47 = vperm.slane %v5689_v34, 0  ;;  %v2335_v9 = vperm.slane %v5689_v34, 1  ;;  %v2336_v52 = vperm.slane %v5689_v34, 2 }
 0xe7f   : > { %v2294_v40 = vmul.f32 %v2293_v45, %v2291_v17  ;;  %v2337_v61 = vperm.slane %v5689_v34, 3 }
 0xe80   : > { %v2285_v42 = vsub.f32 1.5, %v2284_v38 }
 0xe81   : > { %v2297_v44 = vadd.f32 %v2296_v41, %v2294_v40 }
 0xe82   : > { %v2286_v36 = vmul.f32 %v4481_v27, %v2285_v42 }
 0xe83   : > { %s4238_s25 = sshll.u32 %s6263_s19, 4 }
 0xe84   : > { %v2290_v39 = vsel %vm2289_vm4, %v4481_v27, %v2286_v36  ;;  %s3243_s22 = scalar_lea.hbm %s6264_s16, %s4238_s25 }
 0xe85   : > { %v2292_v59 = vmul.f32 %v2290_v39, %v5615_v37  ;;  %s3246_s1 = sshll.u32 %s3243_s22, 4  ;;  %s3247_s1 = int_to_ptr.hbm [resolvable:$true] %s3246_s1 }
 0xe86   : > { %s4754_s26 = sshra.s32 %s3247_s1, 4  ;;  %s4755_s26 = int_to_ptr.hbm [resolvable:$true] %s4754_s26 }
 0xe87   : > { %v2295_v22 = vmul.f32 %v2293_v45, %v2292_v59  ;;  %s4756_s30 = scalar_lea.hbm %s4755_s26, 16  ;;  %p4761_p0 = scmp.lt.s32.totalorder %s4755_s26, %s6264_s16 }
 0xe88   : > { %p4757_p12 = scmp.ne.s32.totalorder %s4755_s26, %s4756_s30  ;;  %p4762_p7 = scmp.lt.s32.totalorder %s4760_s15, %s4756_s30 }
 0xe89   : > { %v2298_v46 = vadd.f32 %v2296_v41, %v2295_v22 }
 0xe8a   : > { %p4758_p4 = pnand %p4757_p12, %p5127_p3  ;;  %p4763_p9 = por %p4762_p7, %p4761_p0 }
 0xe8b   : > { %v2299_v43 = vpack.c.bf16 %v2298_v46, %v2297_v44 }
 0xe8c   : > { %p4759_p6 = pneg %p4758_p4 }
 0xe8d   : > { %2510 = vmatmul.bf16.vlgmr.msra.gmra.mxu0 %v2299_v43  ;;  %2524 = vmatmul.bf16.vlgmr.msra.gmra.mxu1 %v2299_v43 }
 0xe8e   : > { %2538 = vmatmul.bf16.vlgmr.msra.gmra.mxu2 %v2299_v43  ;;  %2552 = vmatmul.bf16.vlgmr.msra.gmra.mxu3 %v2299_v43  ;;  %p4764_p13 = pnand %p4763_p9, %p4759_p6 }
 0xf0a   : > { %v2511_v48 = vpop.f32.mrf.mxu0  ;;  %v2525_v56 = vpop.f32.mrf.mxu1 }
 0xf0b   : > { %v5693_v49 = vadd.f32 %v2511_v48, %v2334_v47  ;;  %v5697_v37 = vadd.f32 %v2525_v56, %v2335_v9 }
 0xf0d   : > { %v5700_v50 = vmul.f32 0.70710677, %v5693_v49  ;;  %v5703_v51 = vmul.f32 0.70710677, %v5697_v37 }
 0xf0f   : > { %v2574_v53 = vmul.f32 %v5700_v50, %v5700_v50  ;;  %v2614_v10 = vmul.f32 %v5703_v51, %v5703_v51 }
 0xf11   : > { %v5710_v54 = vmin.f32 %v2574_v53, 16.0  ;;  %v5712_v55 = vmin.f32 %v2614_v10, 16.0  ;;  %v2539_v58 = vpop.f32.mrf.mxu2  ;;  %v2553_v63 = vpop.f32.mrf.mxu3 }
 0xf12   : > { %v5716_v60 = vadd.f32 %v2539_v58, %v2336_v52  ;;  %v5730_v5 = vadd.f32 %v2553_v63, %v2337_v61  ;;  %v2513_v16 = vpop.f32.mrf.mxu0 }
 0xf13   : > { %v2587_v62 = vmul.f32 3.8918573e-05, %v5710_v54  ;;  %v2576_v26 = vmul.f32 2.1237322e-06, %v5710_v54  ;;  %v2627_v0 = vmul.f32 3.8918573e-05, %v5712_v55  ;;  %v5746_v28 = vadd.f32 %v2513_v16, %v2334_v47 }
 0xf14   : > { %v5723_v1 = vmul.f32 0.70710677, %v5716_v60  ;;  %v2616_v3 = vmul.f32 2.1237322e-06, %v5712_v55  ;;  %v5738_v24 = vmul.f32 0.70710677, %v5730_v5 }
 0xf15   : > { %v2588_v2 = vadd.f32 0.001143296, %v2587_v62  ;;  %v2628_v57 = vadd.f32 0.001143296, %v2627_v0  ;;  %v2577_v6 = vadd.f32 0.00028619796, %v2576_v26  ;;  %v2527_v62 = vpop.f32.mrf.mxu1 }
 0xf16   : > { %v2654_v4 = vmul.f32 %v5723_v1, %v5723_v1  ;;  %v2617_v12 = vadd.f32 0.00028619796, %v2616_v3  ;;  %v2694_v27 = vmul.f32 %v5738_v24, %v5738_v24  ;;  %v5754_v36 = vmul.f32 0.70710677, %v5746_v28 }
 0xf17   : > { %v2589_v20 = vmul.f32 %v2588_v2, %v5710_v54  ;;  %v2629_v7 = vmul.f32 %v2628_v57, %v5712_v55  ;;  %v2578_v18 = vmul.f32 %v2577_v6, %v5710_v54  ;;  %v2528_v57 = vadd.f32 %v2527_v62, %v2335_v9 }
 0xf18   : > { %v5734_v8 = vmin.f32 %v2654_v4, 16.0  ;;  %v2618_v25 = vmul.f32 %v2617_v12, %v5712_v55  ;;  %v5751_v45 = vmin.f32 %v2694_v27, 16.0  ;;  %v2734_v47 = vmul.f32 %v5754_v36, %v5754_v36 }
 0xf19   : > { %v2590_v11 = vadd.f32 0.014752088, %v2589_v20  ;;  %v2630_v13 = vadd.f32 0.014752088, %v2629_v7  ;;  %v2579_v32 = vadd.f32 0.0036580483, %v2578_v18  ;;  %v2541_v9 = vpop.f32.mrf.mxu2 }
 0xf1a   : > { %v2667_v14 = vmul.f32 3.8918573e-05, %v5734_v8  ;;  %v2619_v17 = vadd.f32 0.0036580483, %v2618_v25  ;;  %v2656_v35 = vmul.f32 2.1237322e-06, %v5734_v8 }
 0xf1b   : > { %v2591_v15 = vmul.f32 %v2590_v11, %v5710_v54  ;;  %v2631_v19 = vmul.f32 %v2630_v13, %v5712_v55  ;;  %v2580_v41 = vmul.f32 %v2579_v32, %v5710_v54  ;;  %v2707_v43 = vmul.f32 3.8918573e-05, %v5751_v45 }
 0xf1c   : > { %v2668_v21 = vadd.f32 0.001143296, %v2667_v14  ;;  %v2620_v22 = vmul.f32 %v2619_v17, %v5712_v55  ;;  %v2657_v44 = vadd.f32 0.00028619796, %v2656_v35  ;;  %v5768_v26 = vmin.f32 %v2734_v47, 16.0 }
 0xf1d   : > { %v2592_v23 = vadd.f32 0.112945676, %v2591_v15  ;;  %v2632_v31 = vadd.f32 0.112945676, %v2631_v19  ;;  %v2581_v53 = vadd.f32 0.05243302, %v2580_v41 }
 0xf1e   : > { %v2669_v38 = vmul.f32 %v2668_v21, %v5734_v8  ;;  %v2621_v10 = vadd.f32 0.05243302, %v2620_v22  ;;  %v2658_v58 = vmul.f32 %v2657_v44, %v5734_v8  ;;  %v2708_v63 = vadd.f32 0.001143296, %v2707_v43 }
 0xf1f   : > { %v2593_v29 = vmul.f32 %v2592_v23, %v5710_v54  ;;  %v2633_v59 = vmul.f32 %v2632_v31, %v5712_v55  ;;  %v2696_v2 = vmul.f32 2.1237322e-06, %v5751_v45  ;;  %v2582_v4 = vmul.f32 %v2581_v53, %v5710_v54 }
 0xf20   : > { %v2670_v40 = vadd.f32 0.014752088, %v2669_v38  ;;  %v2622_v20 = vmul.f32 %v2621_v10, %v5712_v55  ;;  %v2659_v6 = vadd.f32 0.0036580483, %v2658_v58  ;;  %v2709_v7 = vmul.f32 %v2708_v63, %v5751_v45 }
 0xf21   : > { %v2594_v42 = vadd.f32 0.4994258, %v2593_v29  ;;  %v2634_v48 = vadd.f32 0.4994258, %v2633_v59  ;;  %v2736_v11 = vmul.f32 2.1237322e-06, %v5768_v26  ;;  %v5793_v38 = vadd.f32 %v2541_v9, %v2336_v52 }
 0xf22   : > { %v2671_v56 = vmul.f32 %v2670_v40, %v5734_v8  ;;  %v2747_v12 = vmul.f32 3.8918573e-05, %v5768_v26  ;;  %v2697_v14 = vadd.f32 0.00028619796, %v2696_v2  ;;  %v5784_v18 = vmul.f32 0.70710677, %v2528_v57 }
 0xf23   : > { %v2595_v39 = vmul.f32 %v2594_v42, %v5710_v54  ;;  %v2635_v0 = vmul.f32 %v2634_v48, %v5712_v55  ;;  %v2583_v19 = vadd.f32 0.18741608, %v2582_v4  ;;  %v2623_v21 = vadd.f32 0.18741608, %v2622_v20 }
 0xf24   : > { %v2672_v3 = vadd.f32 0.112945676, %v2671_v56  ;;  %v2660_v23 = vmul.f32 %v2659_v6, %v5734_v8  ;;  %v2710_v25 = vadd.f32 0.014752088, %v2709_v7  ;;  %v2737_v27 = vadd.f32 0.00028619796, %v2736_v11 }
 0xf25   : > { %v5760_v46 = vadd.f32 1.0, %v2595_v39  ;;  %v5779_v13 = vadd.f32 1.0, %v2635_v0  ;;  %v2748_v29 = vadd.f32 0.001143296, %v2747_v12  ;;  %v2698_v32 = vmul.f32 %v2697_v14, %v5751_v45 }
 0xf26   : > { %v2673_v16 = vmul.f32 %v2672_v3, %v5734_v8  ;;  %v2738_v17 = vmul.f32 %v2737_v27, %v5768_v26  ;;  %v2774_v39 = vmul.f32 %v5784_v18, %v5784_v18  ;;  %v2584_v59 = vmul.f32 %v2583_v19, %v5710_v54 }
 0xf27   : > { %4482 = vrcp.f32 %v5760_v46  ;;  %v2749_v35 = vmul.f32 %v2748_v29, %v5768_v26  ;;  %v2661_v40 = vadd.f32 0.05243302, %v2660_v23  ;;  %v2624_v41 = vmul.f32 %v2623_v21, %v5712_v55  ;;  %v4213_v21 = vld [vmem:[%s5233_s5 + $0x38] sm:$0xff] }
 0xf28   : > { %4484 = vrcp.f32 %v5779_v13  ;;  %v2674_v42 = vadd.f32 0.4994258, %v2673_v16  ;;  %v2711_v22 = vmul.f32 %v2710_v25, %v5751_v45  ;;  %v5802_v43 = vmin.f32 %v2774_v39, 16.0  ;;  %v4221_v23 = vld [vmem:[%s5233_s5 + $0x78] sm:$0xff]  ;;  %3171 = vmatpush.bf16.msrb.mxu0 %v4213_v21 }
 0xf29   : > { %v2750_v44 = vadd.f32 0.014752088, %v2749_v35  ;;  %v2739_v47 = vadd.f32 0.0036580483, %v2738_v17  ;;  %v5805_v48 = vmul.f32 0.70710677, %v5793_v38  ;;  %v2662_v62 = vmul.f32 %v2661_v40, %v5734_v8  ;;  %3185 = vmatpush.bf16.msrb.mxu1 %v4221_v23 }
 0xf2a   : > { %v5808_v56 = vmul.f32 0.5, %v5693_v49  ;;  %v5811_v53 = vmul.f32 0.5, %v5697_v37  ;;  %v2675_v54 = vmul.f32 %v2674_v42, %v5734_v8  ;;  %v2699_v10 = vadd.f32 0.0036580483, %v2698_v32 }
 0xf2b   : > { %v2585_v58 = vadd.f32 1.1283791, %v2584_v59  ;;  %v2751_v63 = vmul.f32 %v2750_v44, %v5768_v26  ;;  %v2776_v0 = vmul.f32 2.1237322e-06, %v5802_v43  ;;  %v5819_v2 = vadd.f32 1.1283791, %v2624_v41 }
 0xf2c   : > { %v2712_v49 = vadd.f32 0.112945676, %v2711_v22  ;;  %v5822_v37 = vmul.f32 0.5, %v5746_v28  ;;  %v5824_v3 = vmul.f32 0.5, %v2528_v57  ;;  %v2606_v20 = vand.u32 2147483647, %v5760_v46 }
 0xf2d   : > { %v5781_v15 = vpop.eup %4482  ;;  %v2740_v6 = vmul.f32 %v2739_v47, %v5768_v26  ;;  %v2814_v7 = vmul.f32 %v5805_v48, %v5805_v48  ;;  %v5831_v11 = vadd.f32 1.0, %v2675_v54  ;;  %v2700_v12 = vmul.f32 %v2699_v10, %v5751_v45  ;;  %v4212_v22 = vld [vmem:[%s5233_s5 + $0x30] sm:$0xff]  ;;  %v4210_v59 = vld [vmem:[%s5233_s5 + $0x20] sm:$0xff] }
 0xf2e   : > { %v2598_v31 = vmul.f32 %v5781_v15, %v5760_v46  ;;  %v5814_v55 = vpop.eup %4484  ;;  %v2752_v14 = vadd.f32 0.112945676, %v2751_v63  ;;  %v2777_v16 = vadd.f32 0.00028619796, %v2776_v0  ;;  %v5835_v28 = vmul.f32 %v2585_v58, %v5700_v50  ;;  %v4220_v44 = vld [vmem:[%s5233_s5 + $0x70] sm:$0xff]  ;;  %v4229_v58 = vld [vmem:[%s5233_s5 + $0xb8] sm:$0xff]  ;;  %3172 = vmatpush.bf16.msrb.mxu0 %v4212_v22 }
 0xf2f   : > { %v2608_v57 = vand.u32 2147483648, %v5760_v46  ;;  %v2638_v9 = vmul.f32 %v5814_v55, %v5779_v13  ;;  %v2663_v19 = vadd.f32 0.18741608, %v2662_v62  ;;  %vm2603_vm5 = vweird.f32 %v5781_v15  ;;  %v4237_v62 = vld [vmem:[%s5233_s5 + $0xf8] sm:$0xff]  ;;  %3186 = vmatpush.bf16.msrb.mxu1 %v4220_v44  ;;  %3199 = vmatpush.bf16.msrb.mxu2 %v4229_v58  ;;  %v4235_v58 = vld [vmem:[%s5233_s5 + $0xe8] sm:$0xff] }
 0xf30   : > { %v2599_v52 = vsub.f32 1.0, %v2598_v31  ;;  %v2713_v25 = vmul.f32 %v2712_v49, %v5751_v45  ;;  %v2753_v27 = vmul.f32 %v2752_v14, %v5768_v26  ;;  %v2787_v29 = vmul.f32 3.8918573e-05, %v5802_v43  ;;  %3213 = vmatpush.bf16.msrb.mxu3 %v4237_v62  ;;  %v4211_v14 = vld [vmem:[%s5233_s5 + $0x28] sm:$0xff] }
 0xf31   : > { %v2741_v31 = vadd.f32 0.05243302, %v2740_v6  ;;  %v2778_v32 = vmul.f32 %v2777_v16, %v5802_v43  ;;  %v5848_v42 = vmin.f32 %v2814_v7, 16.0  ;;  %4486 = vrcp.f32 %v5831_v11 }
 0xf32   : > { %v2600_v4 = vmul.f32 %v5781_v15, %v2599_v52  ;;  %v2701_v17 = vadd.f32 0.05243302, %v2700_v12  ;;  %v2754_v35 = vadd.f32 0.4994258, %v2753_v27  ;;  %v2788_v39 = vadd.f32 0.001143296, %v2787_v29  ;;  %3173 = vmatpush.bf16.msrb.mxu0 %v4211_v14 }
 0xf33   : > { %vm2602_vm6 = vweird.f32 %v5760_v46  ;;  %vm5852_vm7 = vcmp.eq.f32.partialorder %v2606_v20, 8.507059e+37  ;;  %v2609_v40 = vor.u32 1.1754944e-38, %v2608_v57  ;;  %v2639_v41 = vsub.f32 1.0, %v2638_v9  ;;  %v2555_v20 = vpop.f32.mrf.mxu3  ;;  %v4228_v29 = vld [vmem:[%s5233_s5 + $0xb0] sm:$0xff]  ;;  %v4209_v14 = vld [vmem:[%s5233_s5 + $0x18] sm:$0xff] }
 0xf34   : > { %v2601_v50 = vadd.f32 %v5781_v15, %v2600_v4  ;;  %vm5860_vm8 = vmor %vm2602_vm6, %vm2603_vm5  ;;  %v2714_v47 = vadd.f32 0.4994258, %v2713_v25  ;;  %v2755_v54 = vmul.f32 %v2754_v35, %v5768_v26  ;;  %v2789_v10 = vmul.f32 %v2788_v39, %v5802_v43  ;;  %3200 = vmatpush.bf16.msrb.mxu2 %v4228_v29  ;;  %v4226_v29 = vld [vmem:[%s5233_s5 + $0xa0] sm:$0xff] }
 0xf35   : > { %v2816_v46 = vmul.f32 2.1237322e-06, %v5848_v42  ;;  %vm2642_vm9 = vweird.f32 %v5779_v13  ;;  %v2664_v0 = vmul.f32 %v2663_v19, %v5734_v8  ;;  %v2742_v49 = vmul.f32 %v2741_v31, %v5768_v26  ;;  %v4219_v19 = vld [vmem:[%s5233_s5 + $0x68] sm:$0xff] }
 0xf36   : > { %v2605_v63 = vsel %vm5860_vm8, %v5781_v15, %v2601_v50  ;;  %v2779_v4 = vadd.f32 0.0036580483, %v2778_v32  ;;  %v2702_v6 = vmul.f32 %v2701_v17, %v5751_v45  ;;  %v5876_v7 = vadd.f32 1.0, %v2755_v54  ;;  %v4236_v50 = vld [vmem:[%s5233_s5 + $0xf0] sm:$0xff]  ;;  %3187 = vmatpush.bf16.msrb.mxu1 %v4219_v19  ;;  %3174 = vmatpush.bf16.msrb.mxu0 %v4210_v59 }
 0xf37   : > { %v2790_v12 = vadd.f32 0.014752088, %v2789_v10  ;;  %v2827_v15 = vmul.f32 3.8918573e-05, %v5848_v42  ;;  %v2640_v8 = vmul.f32 %v5814_v55, %v2639_v41  ;;  %v2646_v16 = vand.u32 2147483647, %v5779_v13  ;;  %v5884_v21 = vpop.eup %4486  ;;  %3214 = vmatpush.bf16.msrb.mxu3 %v4236_v50 }
 0xf38   : > { %v2648_v57 = vand.u32 2147483648, %v5779_v13  ;;  %v2817_v9 = vadd.f32 0.00028619796, %v2816_v46  ;;  %v2610_v23 = vsel %vm5852_vm7, %v2609_v40, %v2605_v63  ;;  %v2715_v25 = vmul.f32 %v2714_v47, %v5751_v45  ;;  %v4218_v40 = vld [vmem:[%s5233_s5 + $0x60] sm:$0xff] }
 0xf39   : > { %4488 = vrcp.f32 %v5876_v7  ;;  %v5892_v27 = vadd.f32 %v2555_v20, %v2337_v61  ;;  %v5896_v31 = vadd.f32 1.1283791, %v2664_v0  ;;  %v2743_v32 = vadd.f32 0.18741608, %v2742_v49 }
 0xf3a   : > { %v2780_v17 = vmul.f32 %v2779_v4, %v5802_v43  ;;  %v2791_v35 = vmul.f32 %v2790_v12, %v5802_v43  ;;  %vm2643_vm10 = vweird.f32 %v5814_v55  ;;  %v5901_v39 = vadd.f32 0.18741608, %v2702_v6  ;;  %3188 = vmatpush.bf16.msrb.mxu1 %v4218_v40  ;;  %3175 = vmatpush.bf16.msrb.mxu0 %v4209_v14 }
 0xf3b   : > { %v2818_v34 = vmul.f32 %v2817_v9, %v5848_v42  ;;  %v2828_v61 = vadd.f32 0.001143296, %v2827_v15  ;;  %v5907_v41 = vmul.f32 %v2610_v23, %v5835_v28  ;;  %v5910_v22 = vadd.f32 %v5814_v55, %v2640_v8  ;;  %v4227_v28 = vld [vmem:[%s5233_s5 + $0xa8] sm:$0xff]  ;;  %vm5937_vm11 = vmor %vm2642_vm9, %vm2643_vm10  ;;  %v4217_v8 = vld [vmem:[%s5233_s5 + $0x58] sm:$0xff]  ;;  %3215 = vmatpush.bf16.msrb.mxu3 %v4235_v58 }
 0xf3c   : > { %v2678_v44 = vmul.f32 %v5884_v21, %v5831_v11  ;;  %v2792_v52 = vadd.f32 0.112945676, %v2791_v35  ;;  %v5914_v47 = vor.u32 1.1754944e-38, %v2648_v57  ;;  %v5916_v54 = vadd.f32 1.0, %v2715_v25  ;;  %3201 = vmatpush.bf16.msrb.mxu2 %v4227_v28 }
 0xf3d   : > { %v2829_v10 = vmul.f32 %v2828_v61, %v5848_v42  ;;  %v5920_v46 = vmul.f32 0.70710677, %v5892_v27  ;;  %v2686_v62 = vand.u32 2147483647, %v5831_v11  ;;  %v2744_v63 = vmul.f32 %v2743_v32, %v5768_v26 }
 0xf3e   : > { %v2781_v0 = vadd.f32 0.05243302, %v2780_v17  ;;  %v2793_v49 = vmul.f32 %v2792_v52, %v5802_v43  ;;  %v5931_v20 = vmul.f32 %v5819_v2, %v5703_v51  ;;  %v2819_v12 = vadd.f32 0.0036580483, %v2818_v34  ;;  %3189 = vmatpush.bf16.msrb.mxu1 %v4217_v8  ;;  %v4233_v8 = vld [vmem:[%s5233_s5 + $0xd8] sm:$0xff] }
 0xf3f   : > { %v5927_v4 = vpop.eup %4488  ;;  %v2830_v26 = vadd.f32 0.014752088, %v2829_v10  ;;  %v2854_v15 = vmul.f32 %v5920_v46, %v5920_v46  ;;  %v3960_v51 = vclamps-f32 %v5907_v41, 1.0  ;;  %v2645_v13 = vsel %vm5937_vm11, %v5814_v55, %v5910_v22  ;;  %v4208_v41 = vld [vmem:[%s5233_s5 + $0x10] sm:$0xff]  ;;  %v4206_v55 = vld [vmem:[%s5233_s5] sm:$0xff] }
 0xf40   : > { %v2679_v2 = vsub.f32 1.0, %v2678_v44  ;;  %v2758_v57 = vmul.f32 %v5927_v4, %v5876_v7  ;;  %vm5952_vm12 = vcmp.eq.f32.partialorder %v2646_v16, 8.507059e+37  ;;  %4490 = vrcp.f32 %v5916_v54  ;;  %v4234_v16 = vld [vmem:[%s5233_s5 + $0xe0] sm:$0xff]  ;;  %3202 = vmatpush.bf16.msrb.mxu2 %v4226_v29  ;;  %v4216_v44 = vld [vmem:[%s5233_s5 + $0x50] sm:$0xff]  ;;  %3176 = vmatpush.bf16.msrb.mxu0 %v4208_v41  ;;  %v4207_v29 = vld [vmem:[%s5233_s5 + $0x8] sm:$0xff] }
 0xf41   : > { %v2794_v19 = vadd.f32 0.4994258, %v2793_v49  ;;  %v2831_v23 = vmul.f32 %v2830_v26, %v5848_v42  ;;  %v5958_v25 = vmin.f32 %v2854_v15, 16.0  ;;  %v2745_v50 = vadd.f32 1.1283791, %v2744_v63  ;;  %3216 = vmatpush.bf16.msrb.mxu3 %v4234_v16  ;;  %v4214_v22 = vld [vmem:[%s5233_s5 + $0x40] sm:$0xff] }
 0xf42   : > { %v2759_v32 = vsub.f32 1.0, %v2758_v57  ;;  %v2768_v17 = vand.u32 2147483648, %v5876_v7  ;;  %v2782_v35 = vmul.f32 %v2781_v0, %v5802_v43  ;;  %v2820_v61 = vmul.f32 %v2819_v12, %v5848_v42  ;;  %v4225_v12 = vld [vmem:[%s5233_s5 + $0x98] sm:$0xff]  ;;  %3190 = vmatpush.bf16.msrb.mxu1 %v4216_v44 }
 0xf43   : > { %v2795_v34 = vmul.f32 %v2794_v19, %v5802_v43  ;;  %v2832_v59 = vadd.f32 0.112945676, %v2831_v23  ;;  %v2856_v40 = vmul.f32 2.1237322e-06, %v5958_v25  ;;  %vm2763_vm13 = vweird.f32 %v5927_v4 }
 0xf44   : > { %v2760_v52 = vmul.f32 %v5927_v4, %v2759_v32  ;;  %v2766_v10 = vand.u32 2147483647, %v5876_v7  ;;  %v2867_v28 = vmul.f32 3.8918573e-05, %v5958_v25  ;;  %v2680_v58 = vmul.f32 %v5884_v21, %v2679_v2  ;;  %3203 = vmatpush.bf16.msrb.mxu2 %v4225_v12  ;;  %v4215_v32 = vld [vmem:[%s5233_s5 + $0x48] sm:$0xff]  ;;  %3177 = vmatpush.bf16.msrb.mxu0 %v4207_v29 }
 0xf45   : > { %v5974_v63 = vadd.f32 1.0, %v2795_v34  ;;  %v2833_v0 = vmul.f32 %v2832_v59, %v5848_v42  ;;  %v2857_v49 = vadd.f32 0.00028619796, %v2856_v40  ;;  %vm2762_vm14 = vweird.f32 %v5876_v7  ;;  %3217 = vmatpush.bf16.msrb.mxu3 %v4233_v8  ;;  %v4232_v59 = vld [vmem:[%s5233_s5 + $0xd0] sm:$0xff]  ;;  %v4223_v12 = vld [vmem:[%s5233_s5 + $0x88] sm:$0xff] }
 0xf46   : > { %v2761_v26 = vadd.f32 %v5927_v4, %v2760_v52  ;;  %v2769_v15 = vor.u32 1.1754944e-38, %v2768_v17  ;;  %v2868_v14 = vadd.f32 0.001143296, %v2867_v28  ;;  %v5981_v57 = vpop.eup %4490  ;;  %v2746_v2 = vmul.f32 %v2745_v50, %v5754_v36  ;;  %vm5986_vm15 = vmor %vm2762_vm14, %vm2763_vm13  ;;  %3191 = vmatpush.bf16.msrb.mxu1 %v4215_v32 }
 0xf47   : > { %v2783_v23 = vadd.f32 0.18741608, %v2782_v35  ;;  %4492 = vrcp.f32 %v5974_v63  ;;  %v2821_v7 = vadd.f32 0.05243302, %v2820_v61  ;;  %vm2767_vm0 = vcmp.eq.f32.partialorder %v2766_v10, 8.507059e+37  ;;  %v4224_v61 = vld [vmem:[%s5233_s5 + $0x90] sm:$0xff] }
 0xf48   : > { %v2765_v36 = vsel %vm5986_vm15, %v5927_v4, %v2761_v26  ;;  %v2834_v50 = vadd.f32 0.4994258, %v2833_v0  ;;  %v2858_v17 = vmul.f32 %v2857_v49, %v5958_v25  ;;  %vm2683_vm1 = vweird.f32 %v5884_v21  ;;  %3204 = vmatpush.bf16.msrb.mxu2 %v4224_v61  ;;  %v4231_v26 = vld [vmem:[%s5233_s5 + $0xc8] sm:$0xff]  ;;  %3178 = vmatpush.bf16.msrb.mxu0 %v4206_v55 }
 0xf49   : > { %v2688_v35 = vand.u32 2147483648, %v5831_v11  ;;  %v2770_v16 = vsel %vm2767_vm0, %v2769_v15, %v2765_v36  ;;  %v2869_v34 = vmul.f32 %v2868_v14, %v5958_v25  ;;  %v2894_v40 = vadd.f32 1.0, %v3960_v51  ;;  %3218 = vmatpush.bf16.msrb.mxu3 %v4232_v59 }
 0xf4a   : > { %v2650_v4 = vsel %vm5952_vm12, %v5914_v47, %v2645_v13  ;;  %v2771_v41 = vmul.f32 %v2770_v16, %v2746_v2  ;;  %v2835_v44 = vmul.f32 %v2834_v50, %v5848_v42  ;;  %v2681_v52 = vadd.f32 %v5884_v21, %v2680_v58  ;;  %3192 = vmatpush.bf16.msrb.mxu1 %v4214_v22 }
 0xf4b   : > { %v2784_v10 = vmul.f32 %v2783_v23, %v5802_v43  ;;  %v2822_v28 = vmul.f32 %v2821_v7, %v5848_v42  ;;  %v2870_v51 = vadd.f32 0.014752088, %v2869_v34  ;;  %vm2682_vm2 = vweird.f32 %v5831_v11 }
 0xf4c   : > { %v3964_v47 = vclamps-f32 %v2771_v41, 1.0  ;;  %v6017_v6 = vadd.f32 1.0, %v2835_v44  ;;  %v2859_v13 = vadd.f32 0.0036580483, %v2858_v17  ;;  %vm6021_vm3 = vcmp.eq.f32.partialorder %v2686_v62, 8.507059e+37  ;;  %vm6033_vm4 = vmor %vm2682_vm2, %vm2683_vm1  ;;  %3205 = vmatpush.bf16.msrb.mxu2 %v4223_v12  ;;  %v4222_v17 = vld [vmem:[%s5233_s5 + $0x80] sm:$0xff] }
 0xf4d   : > { %v4493_v9 = vpop.eup %4492  ;;  %v2689_v58 = vor.u32 1.1754944e-38, %v2688_v35  ;;  %v2718_v0 = vmul.f32 %v5981_v57, %v5916_v54  ;;  %v2871_v49 = vmul.f32 %v2870_v51, %v5958_v25  ;;  %v2651_v15 = vmul.f32 %v2650_v4, %v5931_v20  ;;  %3219 = vmatpush.bf16.msrb.mxu3 %v4231_v26  ;;  %v4230_v35 = vld [vmem:[%s5233_s5 + $0xc0] sm:$0xff]  ;;  %s3232_s5 = scalar_lea.sflag [#allocation6], %s5197_s29 }
 0xf4e   : > { %v2898_v11 = vadd.f32 1.0, %v3964_v47  ;;  %v2798_v62 = vmul.f32 %v4493_v9, %v5974_v63  ;;  %4494 = vrcp.f32 %v6017_v6  ;;  %v2902_v8 = vmul.f32 %v2894_v40, %v5808_v56 }
 0xf4f   : > { %v2685_v20 = vsel %vm6033_vm4, %v5884_v21, %v2681_v52  ;;  %v2785_v2 = vadd.f32 1.1283791, %v2784_v10  ;;  %v2823_v19 = vadd.f32 0.18741608, %v2822_v28  ;;  %v2860_v29 = vmul.f32 %v2859_v13, %v5958_v25 }
 0xf50   : > { %v2906_v23 = vmul.f32 %v2898_v11, %v5822_v37  ;;  %v2799_v7 = vsub.f32 1.0, %v2798_v62  ;;  %v2872_v32 = vadd.f32 0.112945676, %v2871_v49  ;;  %v2719_v36 = vsub.f32 1.0, %v2718_v0  ;;  %3206 = vmatpush.bf16.msrb.mxu2 %v4222_v17 }
 0xf51   : > { %v2806_v50 = vand.u32 2147483647, %v5974_v63  ;;  %v2808_v56 = vand.u32 2147483648, %v5974_v63  ;;  %vm2803_vm5 = vweird.f32 %v4493_v9  ;;  %v3961_v61 = vclamps-f32 %v2651_v15, 1.0  ;;  %3220 = vmatpush.bf16.msrb.mxu3 %v4230_v35 }
 0xf52   : > { %v2910_v16 = vpack.c.bf16 %v2906_v23, %v2902_v8  ;;  %v2800_v21 = vmul.f32 %v4493_v9, %v2799_v7  ;;  %v2873_v34 = vmul.f32 %v2872_v32, %v5958_v25  ;;  %v2666_v37 = vmul.f32 %v5896_v31, %v5723_v1 }
 0xf53   : > { %v2690_v59 = vsel %vm6021_vm3, %v2689_v58, %v2685_v20  ;;  %v2704_v40 = vmul.f32 %v5901_v39, %v5751_v45  ;;  %vm2722_vm6 = vweird.f32 %v5916_v54  ;;  %vm2802_vm7 = vweird.f32 %v5974_v63 }
 0xf54   : > { %v4495_v4 = vpop.eup %4494  ;;  %v2801_v41 = vadd.f32 %v4493_v9, %v2800_v21  ;;  %v2861_v44 = vadd.f32 0.05243302, %v2860_v29  ;;  %v2874_v52 = vadd.f32 0.4994258, %v2873_v34  ;;  %3179 = vmatmul.bf16.vlgmr.msrb.gmra.mxu0 %v2910_v16  ;;  %v2720_v10 = vmul.f32 %v5981_v57, %v2719_v36  ;;  %vm2804_vm8 = vmor %vm2802_vm7, %vm2803_vm5 }
 0xf55   : > { %v2809_v1 = vor.u32 1.1754944e-38, %v2808_v56  ;;  %v2824_v31 = vmul.f32 %v2823_v19, %v5848_v42  ;;  %v2838_v45 = vmul.f32 %v4495_v4, %v6017_v6  ;;  %v2786_v39 = vmul.f32 %v2785_v2, %v5784_v18 }
 0xf56   : > { %v2805_v28 = vsel %vm2804_vm8, %v4493_v9, %v2801_v41  ;;  %vm2807_vm9 = vcmp.eq.f32.partialorder %v2806_v50, 8.507059e+37  ;;  %v2875_v51 = vmul.f32 %v2874_v52, %v5958_v25  ;;  %v2895_v63 = vadd.f32 1.0, %v3961_v61 }
 0xf57   : > { %v2691_v55 = vmul.f32 %v2690_v59, %v2666_v37  ;;  %v2810_v22 = vsel %vm2807_vm9, %v2809_v1, %v2805_v28  ;;  %v2839_v47 = vsub.f32 1.0, %v2838_v45  ;;  %v2848_v43 = vand.u32 2147483648, %v6017_v6 }
 0xf58   : > { %v2811_v13 = vmul.f32 %v2810_v22, %v2786_v39  ;;  %v2862_v58 = vmul.f32 %v2861_v44, %v5958_v25  ;;  %v2876_v0 = vadd.f32 1.0, %v2875_v51  ;;  %v2825_v49 = vadd.f32 1.1283791, %v2824_v31 }
 0xf59   : > { %v2840_v42 = vmul.f32 %v4495_v4, %v2839_v47  ;;  %vm2843_vm10 = vweird.f32 %v4495_v4  ;;  %v2846_v12 = vand.u32 2147483647, %v6017_v6  ;;  %v2721_v18 = vadd.f32 %v5981_v57, %v2720_v10 }
 0xf5a   : > { %vm2723_vm11 = vweird.f32 %v5981_v57  ;;  %v3965_v9 = vclamps-f32 %v2811_v13, 1.0  ;;  %4496 = vrcp.f32 %v2876_v0  ;;  %v2726_v26 = vand.u32 2147483647, %v5916_v54 }
 0xf5b   : > { %v2728_v15 = vand.u32 2147483648, %v5916_v54  ;;  %v2841_v14 = vadd.f32 %v4495_v4, %v2840_v42  ;;  %vm2842_vm12 = vweird.f32 %v6017_v6  ;;  %v3962_v11 = vclamps-f32 %v2691_v55, 1.0  ;;  %vm6074_vm14 = vmor %vm2722_vm6, %vm2723_vm11 }
 0xf5c   : > { %v2899_v62 = vadd.f32 1.0, %v3965_v9  ;;  %vm2844_vm13 = vmor %vm2842_vm12, %vm2843_vm10  ;;  %v2849_v8 = vor.u32 1.1754944e-38, %v2848_v43  ;;  %v2863_v20 = vadd.f32 0.18741608, %v2862_v58  ;;  %v2705_v2 = vadd.f32 1.1283791, %v2704_v40 }
 0xf5d   : > { %v2826_v23 = vmul.f32 %v2825_v49, %v5805_v48  ;;  %v2845_v7 = vsel %vm2844_vm13, %v4495_v4, %v2841_v14  ;;  %vm2847_vm15 = vcmp.eq.f32.partialorder %v2846_v12, 8.507059e+37  ;;  %v2903_v29 = vmul.f32 %v2895_v63, %v5811_v53 }
 0xf5e   : > { %v2725_v6 = vsel %vm6074_vm14, %v5981_v57, %v2721_v18  ;;  %v2907_v32 = vmul.f32 %v2899_v62, %v5824_v3  ;;  %v2850_v36 = vsel %vm2847_vm15, %v2849_v8, %v2845_v7  ;;  %v2729_v50 = vor.u32 1.1754944e-38, %v2728_v15 }
 0xf5f   : > { %v2851_v56 = vmul.f32 %v2850_v36, %v2826_v23  ;;  %v2896_v17 = vadd.f32 1.0, %v3962_v11  ;;  %vm2727_vm0 = vcmp.eq.f32.partialorder %v2726_v26, 8.507059e+37  ;;  %v2864_v16 = vmul.f32 %v2863_v20, %v5958_v25 }
 0xf60   : > { %v4497_v54 = vpop.eup %4496  ;;  %v2911_v35 = vpack.c.bf16 %v2907_v32, %v2903_v29  ;;  %v2730_v48 = vsel %vm2727_vm0, %v2729_v50, %v2725_v6  ;;  %v2560_v53 = vmul.f32 0.5, %v5716_v60  ;;  %v2706_v61 = vmul.f32 %v2705_v2, %v5738_v24 }
 0xf61   : > { %v3966_v21 = vclamps-f32 %v2851_v56, 1.0  ;;  %v2878_v34 = vmul.f32 %v4497_v54, %v2876_v0  ;;  %v2564_v57 = vmul.f32 0.5, %v5793_v38  ;;  %v2865_v4 = vadd.f32 1.1283791, %v2864_v16 }
 0xf62   : > { %3193 = vmatmul.bf16.vlgmr.msrb.gmra.mxu1 %v2911_v35  ;;  %v2904_v59 = vmul.f32 %v2896_v17, %v2560_v53  ;;  %v2731_v40 = vmul.f32 %v2730_v48, %v2706_v61  ;;  %v2888_v41 = vand.u32 2147483648, %v2876_v0  ;;  %vm2883_vm1 = vweird.f32 %v4497_v54 }
 0xf63   : > { %v2900_v3 = vadd.f32 1.0, %v3966_v21  ;;  %v2879_v37 = vsub.f32 1.0, %v2878_v34  ;;  %v2886_v25 = vand.u32 2147483647, %v2876_v0  ;;  %vm2882_vm2 = vweird.f32 %v2876_v0 }
 0xf64   : > { %vm2884_vm3 = vmor %vm2882_vm2, %vm2883_vm1  ;;  %v2889_v60 = vor.u32 1.1754944e-38, %v2888_v41  ;;  %v3963_v31 = vclamps-f32 %v2731_v40, 1.0  ;;  %v2866_v24 = vmul.f32 %v2865_v4, %v5920_v46  ;;  %v2561_v63 = vmul.f32 0.5, %v5730_v5  ;;  %v4499_v46 = vld [vmem:[%s5252_s2 + $0x8] sm:$0x7] }
 0xf65   : > { %v2908_v44 = vmul.f32 %v2900_v3, %v2564_v57  ;;  %v2880_v52 = vmul.f32 %v4497_v54, %v2879_v37  ;;  %vm2887_vm4 = vcmp.eq.f32.partialorder %v2886_v25, 8.507059e+37  ;;  %v2565_v55 = vmul.f32 0.5, %v5892_v27 }
 0xf66   : > { %v2897_v28 = vadd.f32 1.0, %v3963_v31  ;;  %v2978_v0 = vperm.slane %v4499_v46, 2 }
 0xf67   : > { %v2912_v10 = vpack.c.bf16 %v2908_v44, %v2904_v59  ;;  %v2881_v1 = vadd.f32 %v4497_v54, %v2880_v52 }
 0xf68   : > { %v2905_v47 = vmul.f32 %v2897_v28, %v2561_v63 }
 0xf69   : > { %v2885_v38 = vsel %vm2884_vm3, %v4497_v54, %v2881_v1  ;;  %3207 = vmatmul.bf16.vlgmr.msrb.gmra.mxu2 %v2912_v10 }
 0xf6a   : > { %v2890_v45 = vsel %vm2887_vm4, %v2889_v60, %v2885_v38 }
 0xf6b   : > { %v2891_v39 = vmul.f32 %v2890_v45, %v2866_v24 }
 0xf6d   : > { %v3967_v51 = vclamps-f32 %v2891_v39, 1.0 }
 0xf6f   : > { %v2901_v22 = vadd.f32 1.0, %v3967_v51 }
 0xf71   : > { %v2909_v13 = vmul.f32 %v2901_v22, %v2565_v55 }
 0xf73   : > { %v2913_v43 = vpack.c.bf16 %v2909_v13, %v2905_v47 }
 0xf75   : > { %3221 = vmatmul.bf16.vlgmr.msrb.gmra.mxu3 %v2913_v43 }
 0xfd1   : > { %v3180_v58 = vpop.f32.mrf.mxu0 }
 0xfd2   : > { %v3181_v49 = vadd.f32 %v3180_v58, %v2978_v0 }
 0xfd9   : > { %v3182_v9 = vpop.f32.mrf.mxu0 }
 0xfda   : > { %v3183_v5 = vadd.f32 %v3182_v9, %v2978_v0 }
 0xfdf   : > { %v3194_v42 = vpop.f32.mrf.mxu1 }
 0xfe0   : > { %v3195_v18 = vadd.f32 %v3194_v42, %v3181_v49 }
 0xfe7   : > { %v3196_v14 = vpop.f32.mrf.mxu1 }
 0xfe8   : > { %v3197_v62 = vadd.f32 %v3196_v14, %v3183_v5 }
 0xfec   : > { %v3208_v12 = vpop.f32.mrf.mxu2 }
 0xfed   : > { %v3209_v26 = vadd.f32 %v3208_v12, %v3195_v18 }
 0xff4   : > { %v3210_v11 = vpop.f32.mrf.mxu2 }
 0xff5   : > { %v3211_v20 = vadd.f32 %v3210_v11, %v3197_v62 }
 0xff8   : > { %v3222_v15 = vpop.f32.mrf.mxu3 }
 0xff9   : > { %v3223_v27 = vadd.f32 %v3222_v15, %v3209_v26 }
 0xffb   : > { %v3227_v8 = vadd.f32 %v3223_v27, %v5600_v30 }
 0xffd   : > { %3229 = vst [vmem:[%s5259_s14] sm:$0xff] %v3227_v8 }
0x1000   : > { %v3224_v2 = vpop.f32.mrf.mxu3 }
0x1001   : > { %v3225_v19 = vadd.f32 %v3224_v2, %v3211_v20 }
0x1003   : > { %v3228_v23 = vadd.f32 %v3225_v19, %v5604_v33 }
0x1005   : > { %3230 = vst [vmem:[%s5259_s14 + $0x8] sm:$0xff] %v3228_v23 }
0x1006   : > { %4767 = shalt.err (!%p4764_p13)
}
0x1007   : > { %s4893_s14 = smov 128   ;;  %s4894_s29 = smov 8  }
0x1008   : > { %4258 = dma.vmem_to_hbm [thread:$0]  (%p5127_p3), %s3245_s11, 256, %s3247_s1, %s3232_s5, %s4893_s14, %s4893_s14, %s4894_s29  }
0x1009 PF: > { %p4290_p10 = scmp.ge.s32.totalorder %s4878_s27, 2  ;;  %s3261_s3 = sand.u32 1, %s4850_s20  }
0x100a   : > { %s3262_s28 = scalar_lea.sflag [#allocation6], %s3261_s3 }
0x100b   : > { %p4286_p1 = pnand %p4290_p10, %p5143_p2 }
0x100d   : > { %p4287_p5 = pneg %p4286_p1 }
0x100f   : > { %4833 = dma.done.wait (%p4287_p5), %s3262_s28, 256  }
0x1010   : > { %4835 = vsyncadd (%p4287_p5), %s3262_s28, 4294967040  ;;  %s39_s27 = sadd.s32 1, %s4878_s27   ;;  %s6267_s17 = sld [smem:[#allocation25_spill]] }
0x1011   : > { %p36_p8 = scmp.ge.s32.totalorder %s39_s27, 6   ;;  %s6268_s18 = sld [smem:[#allocation26_spill]] }
0x1012   : > { %s6269_s19 = sld [smem:[#allocation39_spill]] }
0x1013   : > { %s6270_s20 = sld [smem:[#allocation27_spill]] }
0x1014   : > { %s6271_s21 = sld [smem:[#allocation28_spill]] }
0x1015   : > { %s6272_s22 = sld [smem:[#allocation40_spill]]  ;;  %38 = sbr.rel (!%p36_p8) target bundleno = 30 (0x1e), region = 207 }
0x1016   : > { %s6273_s23 = sld [smem:[#allocation31_spill]] }
0x1017   : > { %s6274_s24 = sld [smem:[#allocation32_spill]] }
0x1018   : > { %s6275_s25 = sld [smem:[#allocation35_spill]] }
0x1019   : > { %s6276_s26 = sld [smem:[#allocation36_spill]] }
0x101a   :  { %3268 = vsyncpa [#allocation5], 1 }
0x101b   :  { %3270 = vsyncpa [#allocation5 + $0x1], 1 }
0x101c   :  { %3271 = vsyncpa [#allocation8], 1 }
0x101d   :  { %3273 = vsyncpa [#allocation8 + $0x1], 1 }
0x101e   :  { %3274 = vsyncpa [#allocation11], 1 }
0x101f   :  { %3276 = vsyncpa [#allocation11 + $0x1], 1 }
0x1020   :  { %3277 = vsyncpa [#allocation14], 1 }
0x1021   :  { %3279 = vsyncpa [#allocation14 + $0x1], 1 }
0x1022   :  { %3280 = vsyncpa [#allocation17], 1 }
0x1023   :  { %3282 = vsyncpa [#allocation17 + $0x1], 1 }
0x1024   :  { %3283 = vsyncpa [#allocation6], 1 }
0x1025   :  { %3285 = vsyncpa [#allocation6 + $0x1], 1 }

</bundles_post_ra>
